<compile_context>
chip_gen: v7x
topology: tpu7x:2x2x1
jax: 0.10.0
libtpu: 0.0.40
codegen_flags: <defaults>
</compile_context>

<pallas_src>
import jax
import jax.numpy as jnp
from jax import lax
from jax.experimental import pallas as pl
from jax.experimental.pallas import tpu as pltpu


# ----------------------------------------------------------------------------
# Shape helpers
# ----------------------------------------------------------------------------
def _conv_dims(input_shape):
    C, H, W = input_shape
    oh1, ow1 = (H - 8) // 4 + 1, (W - 8) // 4 + 1     # conv1: k8 s4
    oh2, ow2 = (oh1 - 4) // 2 + 1, (ow1 - 4) // 2 + 1  # conv2: k4 s2
    oh3, ow3 = oh2 - 2, ow2 - 2                        # conv3: k3 s1
    return oh1, ow1, oh2, ow2, oh3, ow3


def _im2col_conv1_phases(x_nchw, oh1, ow1):
    """uint8 NCHW -> bf16 (B, 2, 2, oh1//2, ow1//2, 64*C) conv1 patches.

    Row (b, p, q, m, n) holds the 8x8xC patch of conv1 output position
    (2m + p, 2n + q); patch elements are ordered (kh, kw, c) to match the
    repacked conv1 weight.  Pure layout work done in XLA on uint8; the final
    bf16 cast is exact for 0..255 and keeps the kernel DMA lane-dense.
    """
    B, C, H, W = x_nchw.shape
    x = jnp.transpose(x_nchw, (0, 2, 3, 1))            # NHWC, still uint8
    taps = []
    for di in range(8):
        for dj in range(8):
            taps.append(x[:, di:di + 4 * oh1:4, dj:dj + 4 * ow1:4, :])
    p = jnp.stack(taps, axis=3)                        # (B, oh1, ow1, 64, C)
    p = p.reshape(B, oh1, ow1, 64 * C)
    A, Bc = oh1 // 2, ow1 // 2
    p = p.reshape(B, A, 2, Bc, 2, 64 * C)              # y=(m,p), x=(n,q)
    p = jnp.transpose(p, (0, 2, 4, 1, 3, 5))           # (B, 2, 2, A, Bc, K1)
    return p.astype(jnp.bfloat16)


# ----------------------------------------------------------------------------
# Fused forward kernel: BB images per grid step, everything in VMEM
# ----------------------------------------------------------------------------
def _fused_kernel(x_ref, w1_ref, b1_ref, w2_ref, b2_ref, w3_ref, b3_ref,
                  f1w_ref, f1b_ref, f2w_ref, f2b_ref, o_ref):
    BB = x_ref.shape[0]
    A, Bc, K1 = x_ref.shape[3], x_ref.shape[4], x_ref.shape[5]
    oh2, ow2 = A - 1, Bc - 1
    oh3, ow3 = oh2 - 2, ow2 - 2

    def mm(a, b):
        return jnp.dot(a, b, preferred_element_type=jnp.float32)

    w1 = w1_ref[...]            # (K1, 32), already scaled by 1/256
    b1 = b1_ref[...]            # (1, 32)

    # ---- conv1: 8x8 stride 4 (+ReLU).  One lane-dense matmul per conv2
    # ---- phase (p, q) so conv2's stride-2 accesses become unit-stride.
    a1 = [[None, None], [None, None]]
    for p in range(2):
        for q in range(2):
            xi = x_ref[:, p, q, :, :, :].astype(jnp.float32)   # (BB,A,Bc,K1)
            y = mm(xi.reshape(BB * A * Bc, K1), w1)
            y = jnp.maximum(y + b1, 0.0)
            a1[p][q] = y.reshape(BB, A, Bc, 32)

    # ---- conv2: 4x4 stride 2 (+ReLU): 16 2D matmuls, single f32 accumulator.
    acc2 = jnp.zeros((BB * oh2 * ow2, 64), jnp.float32)
    for i in range(4):
        for j in range(4):
            src = a1[i % 2][j % 2]
            patch = src[:, i // 2:i // 2 + oh2, j // 2:j // 2 + ow2, :]
            acc2 = acc2 + mm(patch.reshape(BB * oh2 * ow2, 32),
                             w2_ref[i * 4 + j])
    a2 = jnp.maximum(acc2 + b2_ref[...], 0.0).reshape(BB, oh2, ow2, 64)

    # ---- conv3: 3x3 stride 1 (+ReLU): 9 2D matmuls.
    acc3 = jnp.zeros((BB * oh3 * ow3, 64), jnp.float32)
    for i in range(3):
        for j in range(3):
            patch = a2[:, i:i + oh3, j:j + ow3, :]
            acc3 = acc3 + mm(patch.reshape(BB * oh3 * ow3, 64),
                             w3_ref[i * 3 + j])
    a3 = jnp.maximum(acc3 + b3_ref[...], 0.0).reshape(BB, oh3, ow3, 64)

    # ---- FC1 (+ReLU): the PyTorch NCHW .view(B,-1) flatten is absorbed into
    # ---- f1w's (y, x, c) row order; accumulate (BB,64)@(64,256) per position.
    h = jnp.zeros((BB, 256), jnp.float32)
    for yy in range(oh3):
        for xx in range(ow3):
            h = h + mm(a3[:, yy, xx, :], f1w_ref[yy, xx])
    h = jnp.maximum(h + f1b_ref[...], 0.0)

    # ---- FC2 (256 -> 1): VPU dot + lane reduction epilogue.
    o_ref[...] = (jnp.sum(h * f2w_ref[...], axis=-1, keepdims=True)
                  + f2b_ref[...])


# ----------------------------------------------------------------------------
# Wrapper
# ----------------------------------------------------------------------------
def atari_distill_forward(x_nchw, kparams, *, block_batch=8):
    B, C, H, W = x_nchw.shape
    oh1, ow1, _, _, _, _ = _conv_dims((C, H, W))
    assert oh1 % 2 == 0 and ow1 % 2 == 0, "conv1 output must be even-sized"

    A, Bc, K1 = oh1 // 2, ow1 // 2, 64 * C
    xcol = _im2col_conv1_phases(x_nchw, oh1, ow1)      # (B, 2, 2, A, Bc, K1)

    # Images per grid step: whole batch if it fits in one step, otherwise a
    # multiple of 8 (keeps the (BB, 1) output block legally tiled).
    if B <= block_batch:
        BB = B
    else:
        BB = max(8, (block_batch // 8) * 8)
    Bp = pl.cdiv(B, BB) * BB
    if Bp != B:
        xcol = jnp.pad(xcol, ((0, Bp - B),) + ((0, 0),) * 5)

    def resident(arr):                                  # weight stays in VMEM
        nd = arr.ndim
        return pl.BlockSpec(arr.shape, lambda g, _n=nd: (0,) * _n)

    out = pl.pallas_call(
        _fused_kernel,
        out_shape=jax.ShapeDtypeStruct((Bp, 1), jnp.float32),
        grid=(Bp // BB,),
        in_specs=[
            pl.BlockSpec((BB, 2, 2, A, Bc, K1),
                         lambda g: (g, 0, 0, 0, 0, 0)),
            resident(kparams["w1"]), resident(kparams["b1"]),
            resident(kparams["w2"]), resident(kparams["b2"]),
            resident(kparams["w3"]), resident(kparams["b3"]),
            resident(kparams["f1w"]), resident(kparams["f1b"]),
            resident(kparams["f2w"]), resident(kparams["f2b"]),
        ],
        out_specs=pl.BlockSpec((BB, 1), lambda g: (g, 0)),
        compiler_params=pltpu.CompilerParams(
            dimension_semantics=("parallel",)),
    )(xcol, kparams["w1"], kparams["b1"], kparams["w2"], kparams["b2"],
      kparams["w3"], kparams["b3"], kparams["f1w"], kparams["f1b"],
      kparams["f2w"], kparams["f2b"])
    return out[:B]


# ----------------------------------------------------------------------------
# One-time parameter repack (outside the hot path)
# ----------------------------------------------------------------------------
def prepare_kernel_params(params, input_shape):
    C = input_shape[0]
    _, _, _, _, oh3, ow3 = _conv_dims(input_shape)
    return {
        # conv1 weight as 2D im2col matrix with the 1/256 input scale folded
        # in (power of two => bit-exact in f32).
        "w1": (jnp.transpose(params["c1_w"], (2, 3, 1, 0))
               .reshape(64 * C, 32) * (1.0 / 256.0)),
        "b1": params["c1_b"].reshape(1, 32),
        "w2": jnp.transpose(params["c2_w"], (2, 3, 1, 0)).reshape(16, 32, 64),
        "b2": params["c2_b"].reshape(1, 64),
        "w3": jnp.transpose(params["c3_w"], (2, 3, 1, 0)).reshape(9, 64, 64),
        "b3": params["c3_b"].reshape(1, 64),
        # rows (c, y, x) -> (y, x, c): absorbs the NCHW flatten permutation
        "f1w": jnp.transpose(
            params["f1_w"].reshape(64, oh3, ow3, 256), (1, 2, 0, 3)),
        "f1b": params["f1_b"].reshape(1, 256),
        "f2w": jnp.transpose(params["f2_w"], (1, 0)),    # (1, 256)
        "f2b": params["f2_b"].reshape(1, 1),
    }


# ----------------------------------------------------------------------------
# Pure-JAX reference (no Pallas) for correctness check
# ----------------------------------------------------------------------------
def reference_forward(x_nchw, params):
    fx = x_nchw.astype(jnp.float32) / 256.0

    def conv(x, w, b, stride):
        y = lax.conv_general_dilated(
            x, w, (stride, stride), "VALID",
            dimension_numbers=("NCHW", "OIHW", "NCHW"),
            precision=lax.Precision.HIGHEST)
        return jax.nn.relu(y + b[None, :, None, None])

    h = conv(fx, params["c1_w"], params["c1_b"], 4)
    h = conv(h, params["c2_w"], params["c2_b"], 2)
    h = conv(h, params["c3_w"], params["c3_b"], 1)
    flat = h.reshape(h.shape[0], -1)
    h = jax.nn.relu(
        jnp.dot(flat, params["f1_w"], precision=lax.Precision.HIGHEST)
        + params["f1_b"])
    return (jnp.dot(h, params["f2_w"], precision=lax.Precision.HIGHEST)
            + params["f2_b"])


# ----------------------------------------------------------------------------
# Deterministic parameter init (shapes match the nn.Module __init__)
# ----------------------------------------------------------------------------
def init_params(key, input_shape):
    C, _, _ = input_shape
    _, _, _, _, oh3, ow3 = _conv_dims(input_shape)
    conv_out_size = 64 * oh3 * ow3

    ks = jax.random.split(key, 10)

    def nrm(k, shape, scale=0.05):
        return (scale * jax.random.normal(k, shape)).astype(jnp.float32)

    return {
        "c1_w": nrm(ks[0], (32, C, 8, 8)),
        "c1_b": nrm(ks[1], (32,)),
        "c2_w": nrm(ks[2], (64, 32, 4, 4)),
        "c2_b": nrm(ks[3], (64,)),
        "c3_w": nrm(ks[4], (64, 64, 3, 3)),
        "c3_b": nrm(ks[5], (64,)),
        "f1_w": nrm(ks[6], (conv_out_size, 256)),   # stored as [in, out]
        "f1_b": nrm(ks[7], (1, 256)),
        "f2_w": nrm(ks[8], (256, 1)),
        "f2_b": nrm(ks[9], (1, 1)),
    }


if __name__ == "__main__":
    key = jax.random.PRNGKey(0)
    k_param, k_x = jax.random.split(key)

    # Small Atari-like input: batch=2, channels=4, spatial=36x36 (smallest
    # spatial size the conv stack supports).
    input_shape = (4, 36, 36)
    batch = 2
    params = init_params(k_param, input_shape)
    kparams = prepare_kernel_params(params, input_shape)

    x = jax.random.randint(k_x, (batch,) + input_shape, 0, 256,
                           dtype=jnp.int32).astype(jnp.uint8)

    fwd = jax.jit(atari_distill_forward)
    out = jax.block_until_ready(fwd(x, kparams))
    assert out.shape == (batch, 1), out.shape

    ref = jax.block_until_ready(reference_forward(x, params))
    assert jnp.allclose(out, ref, atol=1e-3, rtol=1e-3), (
        f"mismatch: max abs diff {jnp.max(jnp.abs(out - ref))}")

    print("KERNEL_OK")
</pallas_src>

<mosaic_0001>
module attributes {stable_mosaic.version = 11 : i64} {
  func.func @_fused_kernel(%arg0: i32, %arg1: memref<2x2x2x4x4x256xbf16, #tpu.memory_space<vmem>>, %arg2: memref<256x32xf32, #tpu.memory_space<vmem>>, %arg3: memref<1x32xf32, #tpu.memory_space<vmem>>, %arg4: memref<16x32x64xf32, #tpu.memory_space<vmem>>, %arg5: memref<1x64xf32, #tpu.memory_space<vmem>>, %arg6: memref<9x64x64xf32, #tpu.memory_space<vmem>>, %arg7: memref<1x64xf32, #tpu.memory_space<vmem>>, %arg8: memref<1x1x64x256xf32, #tpu.memory_space<vmem>>, %arg9: memref<1x256xf32, #tpu.memory_space<vmem>>, %arg10: memref<1x256xf32, #tpu.memory_space<vmem>>, %arg11: memref<1x1xf32, #tpu.memory_space<vmem>>, %arg12: memref<2x1xf32, #tpu.memory_space<vmem>>) attributes {dimension_semantics = [#tpu.dimension_semantics<parallel>], iteration_bounds = array<i64: 1>, scalar_prefetch = 0 : i64, scratch_operands = 0 : i64, tpu.core_type = #tpu.core_type<tc>, window_params = [{transform_indices = @transform_0, window_bounds = array<i64: 2, 2, 2, 4, 4, 256>}, {pipeline_mode = #tpu.pipeline_mode<synchronous>, transform_indices = @transform_1, window_bounds = array<i64: 256, 32>}, {pipeline_mode = #tpu.pipeline_mode<synchronous>, transform_indices = @transform_2, window_bounds = array<i64: 1, 32>}, {pipeline_mode = #tpu.pipeline_mode<synchronous>, transform_indices = @transform_3, window_bounds = array<i64: 16, 32, 64>}, {pipeline_mode = #tpu.pipeline_mode<synchronous>, transform_indices = @transform_4, window_bounds = array<i64: 1, 64>}, {pipeline_mode = #tpu.pipeline_mode<synchronous>, transform_indices = @transform_5, window_bounds = array<i64: 9, 64, 64>}, {pipeline_mode = #tpu.pipeline_mode<synchronous>, transform_indices = @transform_6, window_bounds = array<i64: 1, 64>}, {pipeline_mode = #tpu.pipeline_mode<synchronous>, transform_indices = @transform_7, window_bounds = array<i64: 1, 1, 64, 256>}, {pipeline_mode = #tpu.pipeline_mode<synchronous>, transform_indices = @transform_8, window_bounds = array<i64: 1, 256>}, {pipeline_mode = #tpu.pipeline_mode<synchronous>, transform_indices = @transform_9, window_bounds = array<i64: 1, 256>}, {pipeline_mode = #tpu.pipeline_mode<synchronous>, transform_indices = @transform_10, window_bounds = array<i64: 1, 1>}, {transform_indices = @transform_11, window_bounds = array<i64: 2, 1>}]} {
    %c0 = arith.constant 0 : index
    %c0_0 = arith.constant 0 : index
    %0 = vector.load %arg2[%c0, %c0_0] : memref<256x32xf32, #tpu.memory_space<vmem>>, vector<256x32xf32>
    %c0_1 = arith.constant 0 : index
    %c0_2 = arith.constant 0 : index
    %1 = vector.load %arg3[%c0_1, %c0_2] : memref<1x32xf32, #tpu.memory_space<vmem>>, vector<1x32xf32>
    %c0_3 = arith.constant 0 : index
    %c0_4 = arith.constant 0 : index
    %c0_5 = arith.constant 0 : index
    %c0_6 = arith.constant 0 : index
    %c0_7 = arith.constant 0 : index
    %c0_8 = arith.constant 0 : index
    %2 = vector.load %arg1[%c0_3, %c0_4, %c0_5, %c0_6, %c0_7, %c0_8] : memref<2x2x2x4x4x256xbf16, #tpu.memory_space<vmem>>, vector<2x1x1x4x4x256xbf16>
    %3 = vector.shape_cast %2 : vector<2x1x1x4x4x256xbf16> to vector<2x4x4x256xbf16>
    %4 = arith.extf %3 : vector<2x4x4x256xbf16> to vector<2x4x4x256xf32>
    %5 = vector.shape_cast %4 : vector<2x4x4x256xf32> to vector<32x256xf32>
    %cst = arith.constant dense<0.000000e+00> : vector<32x32xf32>
    %6 = tpu.matmul %5, %0, %cst {dimension_numbers = #tpu.dot_dimension_numbers<[1], [0], [0], [1], [0, 0, 1, 1], [], []>} : vector<32x256xf32>, vector<256x32xf32>, vector<32x32xf32> -> vector<32x32xf32>
    %7 = vector.broadcast %1 : vector<1x32xf32> to vector<32x32xf32>
    %8 = arith.addf %6, %7 : vector<32x32xf32>
    %cst_9 = arith.constant 0.000000e+00 : f32
    %9 = vector.broadcast %cst_9 : f32 to vector<32x32xf32>
    %10 = arith.maximumf %8, %9 : vector<32x32xf32>
    %11 = vector.shape_cast %10 : vector<32x32xf32> to vector<2x4x4x32xf32>
    %c0_10 = arith.constant 0 : index
    %c0_11 = arith.constant 0 : index
    %c1 = arith.constant 1 : index
    %c0_12 = arith.constant 0 : index
    %c0_13 = arith.constant 0 : index
    %c0_14 = arith.constant 0 : index
    %12 = vector.load %arg1[%c0_10, %c0_11, %c1, %c0_12, %c0_13, %c0_14] : memref<2x2x2x4x4x256xbf16, #tpu.memory_space<vmem>>, vector<2x1x1x4x4x256xbf16>
    %13 = vector.shape_cast %12 : vector<2x1x1x4x4x256xbf16> to vector<2x4x4x256xbf16>
    %14 = arith.extf %13 : vector<2x4x4x256xbf16> to vector<2x4x4x256xf32>
    %15 = vector.shape_cast %14 : vector<2x4x4x256xf32> to vector<32x256xf32>
    %cst_15 = arith.constant dense<0.000000e+00> : vector<32x32xf32>
    %16 = tpu.matmul %15, %0, %cst_15 {dimension_numbers = #tpu.dot_dimension_numbers<[1], [0], [0], [1], [0, 0, 1, 1], [], []>} : vector<32x256xf32>, vector<256x32xf32>, vector<32x32xf32> -> vector<32x32xf32>
    %17 = vector.broadcast %1 : vector<1x32xf32> to vector<32x32xf32>
    %18 = arith.addf %16, %17 : vector<32x32xf32>
    %cst_16 = arith.constant 0.000000e+00 : f32
    %19 = vector.broadcast %cst_16 : f32 to vector<32x32xf32>
    %20 = arith.maximumf %18, %19 : vector<32x32xf32>
    %21 = vector.shape_cast %20 : vector<32x32xf32> to vector<2x4x4x32xf32>
    %c0_17 = arith.constant 0 : index
    %c1_18 = arith.constant 1 : index
    %c0_19 = arith.constant 0 : index
    %c0_20 = arith.constant 0 : index
    %c0_21 = arith.constant 0 : index
    %c0_22 = arith.constant 0 : index
    %22 = vector.load %arg1[%c0_17, %c1_18, %c0_19, %c0_20, %c0_21, %c0_22] : memref<2x2x2x4x4x256xbf16, #tpu.memory_space<vmem>>, vector<2x1x1x4x4x256xbf16>
    %23 = vector.shape_cast %22 : vector<2x1x1x4x4x256xbf16> to vector<2x4x4x256xbf16>
    %24 = arith.extf %23 : vector<2x4x4x256xbf16> to vector<2x4x4x256xf32>
    %25 = vector.shape_cast %24 : vector<2x4x4x256xf32> to vector<32x256xf32>
    %cst_23 = arith.constant dense<0.000000e+00> : vector<32x32xf32>
    %26 = tpu.matmul %25, %0, %cst_23 {dimension_numbers = #tpu.dot_dimension_numbers<[1], [0], [0], [1], [0, 0, 1, 1], [], []>} : vector<32x256xf32>, vector<256x32xf32>, vector<32x32xf32> -> vector<32x32xf32>
    %27 = vector.broadcast %1 : vector<1x32xf32> to vector<32x32xf32>
    %28 = arith.addf %26, %27 : vector<32x32xf32>
    %cst_24 = arith.constant 0.000000e+00 : f32
    %29 = vector.broadcast %cst_24 : f32 to vector<32x32xf32>
    %30 = arith.maximumf %28, %29 : vector<32x32xf32>
    %31 = vector.shape_cast %30 : vector<32x32xf32> to vector<2x4x4x32xf32>
    %c0_25 = arith.constant 0 : index
    %c1_26 = arith.constant 1 : index
    %c1_27 = arith.constant 1 : index
    %c0_28 = arith.constant 0 : index
    %c0_29 = arith.constant 0 : index
    %c0_30 = arith.constant 0 : index
    %32 = vector.load %arg1[%c0_25, %c1_26, %c1_27, %c0_28, %c0_29, %c0_30] : memref<2x2x2x4x4x256xbf16, #tpu.memory_space<vmem>>, vector<2x1x1x4x4x256xbf16>
    %33 = vector.shape_cast %32 : vector<2x1x1x4x4x256xbf16> to vector<2x4x4x256xbf16>
    %34 = arith.extf %33 : vector<2x4x4x256xbf16> to vector<2x4x4x256xf32>
    %35 = vector.shape_cast %34 : vector<2x4x4x256xf32> to vector<32x256xf32>
    %cst_31 = arith.constant dense<0.000000e+00> : vector<32x32xf32>
    %36 = tpu.matmul %35, %0, %cst_31 {dimension_numbers = #tpu.dot_dimension_numbers<[1], [0], [0], [1], [0, 0, 1, 1], [], []>} : vector<32x256xf32>, vector<256x32xf32>, vector<32x32xf32> -> vector<32x32xf32>
    %37 = vector.broadcast %1 : vector<1x32xf32> to vector<32x32xf32>
    %38 = arith.addf %36, %37 : vector<32x32xf32>
    %cst_32 = arith.constant 0.000000e+00 : f32
    %39 = vector.broadcast %cst_32 : f32 to vector<32x32xf32>
    %40 = arith.maximumf %38, %39 : vector<32x32xf32>
    %41 = vector.shape_cast %40 : vector<32x32xf32> to vector<2x4x4x32xf32>
    %cst_33 = arith.constant 0.000000e+00 : f32
    %42 = vector.broadcast %cst_33 : f32 to vector<18x64xf32>
    %43 = vector.extract_strided_slice %11 {offsets = [0, 0, 0, 0], sizes = [2, 3, 3, 32], strides = [1, 1, 1, 1]} : vector<2x4x4x32xf32> to vector<2x3x3x32xf32>
    %44 = vector.shape_cast %43 : vector<2x3x3x32xf32> to vector<18x32xf32>
    %c0_34 = arith.constant 0 : index
    %c0_35 = arith.constant 0 : index
    %c0_36 = arith.constant 0 : index
    %45 = vector.load %arg4[%c0_34, %c0_35, %c0_36] : memref<16x32x64xf32, #tpu.memory_space<vmem>>, vector<1x32x64xf32>
    %46 = vector.shape_cast %45 : vector<1x32x64xf32> to vector<32x64xf32>
    %cst_37 = arith.constant dense<0.000000e+00> : vector<18x64xf32>
    %47 = tpu.matmul %44, %46, %cst_37 {dimension_numbers = #tpu.dot_dimension_numbers<[1], [0], [0], [1], [0, 0, 1, 1], [], []>} : vector<18x32xf32>, vector<32x64xf32>, vector<18x64xf32> -> vector<18x64xf32>
    %48 = arith.addf %42, %47 : vector<18x64xf32>
    %49 = vector.extract_strided_slice %21 {offsets = [0, 0, 0, 0], sizes = [2, 3, 3, 32], strides = [1, 1, 1, 1]} : vector<2x4x4x32xf32> to vector<2x3x3x32xf32>
    %50 = vector.shape_cast %49 : vector<2x3x3x32xf32> to vector<18x32xf32>
    %c1_38 = arith.constant 1 : index
    %c0_39 = arith.constant 0 : index
    %c0_40 = arith.constant 0 : index
    %51 = vector.load %arg4[%c1_38, %c0_39, %c0_40] : memref<16x32x64xf32, #tpu.memory_space<vmem>>, vector<1x32x64xf32>
    %52 = vector.shape_cast %51 : vector<1x32x64xf32> to vector<32x64xf32>
    %cst_41 = arith.constant dense<0.000000e+00> : vector<18x64xf32>
    %53 = tpu.matmul %50, %52, %cst_41 {dimension_numbers = #tpu.dot_dimension_numbers<[1], [0], [0], [1], [0, 0, 1, 1], [], []>} : vector<18x32xf32>, vector<32x64xf32>, vector<18x64xf32> -> vector<18x64xf32>
    %54 = arith.addf %48, %53 : vector<18x64xf32>
    %55 = vector.extract_strided_slice %11 {offsets = [0, 0, 1, 0], sizes = [2, 3, 3, 32], strides = [1, 1, 1, 1]} : vector<2x4x4x32xf32> to vector<2x3x3x32xf32>
    %56 = vector.shape_cast %55 : vector<2x3x3x32xf32> to vector<18x32xf32>
    %c2 = arith.constant 2 : index
    %c0_42 = arith.constant 0 : index
    %c0_43 = arith.constant 0 : index
    %57 = vector.load %arg4[%c2, %c0_42, %c0_43] : memref<16x32x64xf32, #tpu.memory_space<vmem>>, vector<1x32x64xf32>
    %58 = vector.shape_cast %57 : vector<1x32x64xf32> to vector<32x64xf32>
    %cst_44 = arith.constant dense<0.000000e+00> : vector<18x64xf32>
    %59 = tpu.matmul %56, %58, %cst_44 {dimension_numbers = #tpu.dot_dimension_numbers<[1], [0], [0], [1], [0, 0, 1, 1], [], []>} : vector<18x32xf32>, vector<32x64xf32>, vector<18x64xf32> -> vector<18x64xf32>
    %60 = arith.addf %54, %59 : vector<18x64xf32>
    %61 = vector.extract_strided_slice %21 {offsets = [0, 0, 1, 0], sizes = [2, 3, 3, 32], strides = [1, 1, 1, 1]} : vector<2x4x4x32xf32> to vector<2x3x3x32xf32>
    %62 = vector.shape_cast %61 : vector<2x3x3x32xf32> to vector<18x32xf32>
    %c3 = arith.constant 3 : index
    %c0_45 = arith.constant 0 : index
    %c0_46 = arith.constant 0 : index
    %63 = vector.load %arg4[%c3, %c0_45, %c0_46] : memref<16x32x64xf32, #tpu.memory_space<vmem>>, vector<1x32x64xf32>
    %64 = vector.shape_cast %63 : vector<1x32x64xf32> to vector<32x64xf32>
    %cst_47 = arith.constant dense<0.000000e+00> : vector<18x64xf32>
    %65 = tpu.matmul %62, %64, %cst_47 {dimension_numbers = #tpu.dot_dimension_numbers<[1], [0], [0], [1], [0, 0, 1, 1], [], []>} : vector<18x32xf32>, vector<32x64xf32>, vector<18x64xf32> -> vector<18x64xf32>
    %66 = arith.addf %60, %65 : vector<18x64xf32>
    %67 = vector.extract_strided_slice %31 {offsets = [0, 0, 0, 0], sizes = [2, 3, 3, 32], strides = [1, 1, 1, 1]} : vector<2x4x4x32xf32> to vector<2x3x3x32xf32>
    %68 = vector.shape_cast %67 : vector<2x3x3x32xf32> to vector<18x32xf32>
    %c4 = arith.constant 4 : index
    %c0_48 = arith.constant 0 : index
    %c0_49 = arith.constant 0 : index
    %69 = vector.load %arg4[%c4, %c0_48, %c0_49] : memref<16x32x64xf32, #tpu.memory_space<vmem>>, vector<1x32x64xf32>
    %70 = vector.shape_cast %69 : vector<1x32x64xf32> to vector<32x64xf32>
    %cst_50 = arith.constant dense<0.000000e+00> : vector<18x64xf32>
    %71 = tpu.matmul %68, %70, %cst_50 {dimension_numbers = #tpu.dot_dimension_numbers<[1], [0], [0], [1], [0, 0, 1, 1], [], []>} : vector<18x32xf32>, vector<32x64xf32>, vector<18x64xf32> -> vector<18x64xf32>
    %72 = arith.addf %66, %71 : vector<18x64xf32>
    %73 = vector.extract_strided_slice %41 {offsets = [0, 0, 0, 0], sizes = [2, 3, 3, 32], strides = [1, 1, 1, 1]} : vector<2x4x4x32xf32> to vector<2x3x3x32xf32>
    %74 = vector.shape_cast %73 : vector<2x3x3x32xf32> to vector<18x32xf32>
    %c5 = arith.constant 5 : index
    %c0_51 = arith.constant 0 : index
    %c0_52 = arith.constant 0 : index
    %75 = vector.load %arg4[%c5, %c0_51, %c0_52] : memref<16x32x64xf32, #tpu.memory_space<vmem>>, vector<1x32x64xf32>
    %76 = vector.shape_cast %75 : vector<1x32x64xf32> to vector<32x64xf32>
    %cst_53 = arith.constant dense<0.000000e+00> : vector<18x64xf32>
    %77 = tpu.matmul %74, %76, %cst_53 {dimension_numbers = #tpu.dot_dimension_numbers<[1], [0], [0], [1], [0, 0, 1, 1], [], []>} : vector<18x32xf32>, vector<32x64xf32>, vector<18x64xf32> -> vector<18x64xf32>
    %78 = arith.addf %72, %77 : vector<18x64xf32>
    %79 = vector.extract_strided_slice %31 {offsets = [0, 0, 1, 0], sizes = [2, 3, 3, 32], strides = [1, 1, 1, 1]} : vector<2x4x4x32xf32> to vector<2x3x3x32xf32>
    %80 = vector.shape_cast %79 : vector<2x3x3x32xf32> to vector<18x32xf32>
    %c6 = arith.constant 6 : index
    %c0_54 = arith.constant 0 : index
    %c0_55 = arith.constant 0 : index
    %81 = vector.load %arg4[%c6, %c0_54, %c0_55] : memref<16x32x64xf32, #tpu.memory_space<vmem>>, vector<1x32x64xf32>
    %82 = vector.shape_cast %81 : vector<1x32x64xf32> to vector<32x64xf32>
    %cst_56 = arith.constant dense<0.000000e+00> : vector<18x64xf32>
    %83 = tpu.matmul %80, %82, %cst_56 {dimension_numbers = #tpu.dot_dimension_numbers<[1], [0], [0], [1], [0, 0, 1, 1], [], []>} : vector<18x32xf32>, vector<32x64xf32>, vector<18x64xf32> -> vector<18x64xf32>
    %84 = arith.addf %78, %83 : vector<18x64xf32>
    %85 = vector.extract_strided_slice %41 {offsets = [0, 0, 1, 0], sizes = [2, 3, 3, 32], strides = [1, 1, 1, 1]} : vector<2x4x4x32xf32> to vector<2x3x3x32xf32>
    %86 = vector.shape_cast %85 : vector<2x3x3x32xf32> to vector<18x32xf32>
    %c7 = arith.constant 7 : index
    %c0_57 = arith.constant 0 : index
    %c0_58 = arith.constant 0 : index
    %87 = vector.load %arg4[%c7, %c0_57, %c0_58] : memref<16x32x64xf32, #tpu.memory_space<vmem>>, vector<1x32x64xf32>
    %88 = vector.shape_cast %87 : vector<1x32x64xf32> to vector<32x64xf32>
    %cst_59 = arith.constant dense<0.000000e+00> : vector<18x64xf32>
    %89 = tpu.matmul %86, %88, %cst_59 {dimension_numbers = #tpu.dot_dimension_numbers<[1], [0], [0], [1], [0, 0, 1, 1], [], []>} : vector<18x32xf32>, vector<32x64xf32>, vector<18x64xf32> -> vector<18x64xf32>
    %90 = arith.addf %84, %89 : vector<18x64xf32>
    %91 = vector.extract_strided_slice %11 {offsets = [0, 1, 0, 0], sizes = [2, 3, 3, 32], strides = [1, 1, 1, 1]} : vector<2x4x4x32xf32> to vector<2x3x3x32xf32>
    %92 = vector.shape_cast %91 : vector<2x3x3x32xf32> to vector<18x32xf32>
    %c8 = arith.constant 8 : index
    %c0_60 = arith.constant 0 : index
    %c0_61 = arith.constant 0 : index
    %93 = vector.load %arg4[%c8, %c0_60, %c0_61] : memref<16x32x64xf32, #tpu.memory_space<vmem>>, vector<1x32x64xf32>
    %94 = vector.shape_cast %93 : vector<1x32x64xf32> to vector<32x64xf32>
    %cst_62 = arith.constant dense<0.000000e+00> : vector<18x64xf32>
    %95 = tpu.matmul %92, %94, %cst_62 {dimension_numbers = #tpu.dot_dimension_numbers<[1], [0], [0], [1], [0, 0, 1, 1], [], []>} : vector<18x32xf32>, vector<32x64xf32>, vector<18x64xf32> -> vector<18x64xf32>
    %96 = arith.addf %90, %95 : vector<18x64xf32>
    %97 = vector.extract_strided_slice %21 {offsets = [0, 1, 0, 0], sizes = [2, 3, 3, 32], strides = [1, 1, 1, 1]} : vector<2x4x4x32xf32> to vector<2x3x3x32xf32>
    %98 = vector.shape_cast %97 : vector<2x3x3x32xf32> to vector<18x32xf32>
    %c9 = arith.constant 9 : index
    %c0_63 = arith.constant 0 : index
    %c0_64 = arith.constant 0 : index
    %99 = vector.load %arg4[%c9, %c0_63, %c0_64] : memref<16x32x64xf32, #tpu.memory_space<vmem>>, vector<1x32x64xf32>
    %100 = vector.shape_cast %99 : vector<1x32x64xf32> to vector<32x64xf32>
    %cst_65 = arith.constant dense<0.000000e+00> : vector<18x64xf32>
    %101 = tpu.matmul %98, %100, %cst_65 {dimension_numbers = #tpu.dot_dimension_numbers<[1], [0], [0], [1], [0, 0, 1, 1], [], []>} : vector<18x32xf32>, vector<32x64xf32>, vector<18x64xf32> -> vector<18x64xf32>
    %102 = arith.addf %96, %101 : vector<18x64xf32>
    %103 = vector.extract_strided_slice %11 {offsets = [0, 1, 1, 0], sizes = [2, 3, 3, 32], strides = [1, 1, 1, 1]} : vector<2x4x4x32xf32> to vector<2x3x3x32xf32>
    %104 = vector.shape_cast %103 : vector<2x3x3x32xf32> to vector<18x32xf32>
    %c10 = arith.constant 10 : index
    %c0_66 = arith.constant 0 : index
    %c0_67 = arith.constant 0 : index
    %105 = vector.load %arg4[%c10, %c0_66, %c0_67] : memref<16x32x64xf32, #tpu.memory_space<vmem>>, vector<1x32x64xf32>
    %106 = vector.shape_cast %105 : vector<1x32x64xf32> to vector<32x64xf32>
    %cst_68 = arith.constant dense<0.000000e+00> : vector<18x64xf32>
    %107 = tpu.matmul %104, %106, %cst_68 {dimension_numbers = #tpu.dot_dimension_numbers<[1], [0], [0], [1], [0, 0, 1, 1], [], []>} : vector<18x32xf32>, vector<32x64xf32>, vector<18x64xf32> -> vector<18x64xf32>
    %108 = arith.addf %102, %107 : vector<18x64xf32>
    %109 = vector.extract_strided_slice %21 {offsets = [0, 1, 1, 0], sizes = [2, 3, 3, 32], strides = [1, 1, 1, 1]} : vector<2x4x4x32xf32> to vector<2x3x3x32xf32>
    %110 = vector.shape_cast %109 : vector<2x3x3x32xf32> to vector<18x32xf32>
    %c11 = arith.constant 11 : index
    %c0_69 = arith.constant 0 : index
    %c0_70 = arith.constant 0 : index
    %111 = vector.load %arg4[%c11, %c0_69, %c0_70] : memref<16x32x64xf32, #tpu.memory_space<vmem>>, vector<1x32x64xf32>
    %112 = vector.shape_cast %111 : vector<1x32x64xf32> to vector<32x64xf32>
    %cst_71 = arith.constant dense<0.000000e+00> : vector<18x64xf32>
    %113 = tpu.matmul %110, %112, %cst_71 {dimension_numbers = #tpu.dot_dimension_numbers<[1], [0], [0], [1], [0, 0, 1, 1], [], []>} : vector<18x32xf32>, vector<32x64xf32>, vector<18x64xf32> -> vector<18x64xf32>
    %114 = arith.addf %108, %113 : vector<18x64xf32>
    %115 = vector.extract_strided_slice %31 {offsets = [0, 1, 0, 0], sizes = [2, 3, 3, 32], strides = [1, 1, 1, 1]} : vector<2x4x4x32xf32> to vector<2x3x3x32xf32>
    %116 = vector.shape_cast %115 : vector<2x3x3x32xf32> to vector<18x32xf32>
    %c12 = arith.constant 12 : index
    %c0_72 = arith.constant 0 : index
    %c0_73 = arith.constant 0 : index
    %117 = vector.load %arg4[%c12, %c0_72, %c0_73] : memref<16x32x64xf32, #tpu.memory_space<vmem>>, vector<1x32x64xf32>
    %118 = vector.shape_cast %117 : vector<1x32x64xf32> to vector<32x64xf32>
    %cst_74 = arith.constant dense<0.000000e+00> : vector<18x64xf32>
    %119 = tpu.matmul %116, %118, %cst_74 {dimension_numbers = #tpu.dot_dimension_numbers<[1], [0], [0], [1], [0, 0, 1, 1], [], []>} : vector<18x32xf32>, vector<32x64xf32>, vector<18x64xf32> -> vector<18x64xf32>
    %120 = arith.addf %114, %119 : vector<18x64xf32>
    %121 = vector.extract_strided_slice %41 {offsets = [0, 1, 0, 0], sizes = [2, 3, 3, 32], strides = [1, 1, 1, 1]} : vector<2x4x4x32xf32> to vector<2x3x3x32xf32>
    %122 = vector.shape_cast %121 : vector<2x3x3x32xf32> to vector<18x32xf32>
    %c13 = arith.constant 13 : index
    %c0_75 = arith.constant 0 : index
    %c0_76 = arith.constant 0 : index
    %123 = vector.load %arg4[%c13, %c0_75, %c0_76] : memref<16x32x64xf32, #tpu.memory_space<vmem>>, vector<1x32x64xf32>
    %124 = vector.shape_cast %123 : vector<1x32x64xf32> to vector<32x64xf32>
    %cst_77 = arith.constant dense<0.000000e+00> : vector<18x64xf32>
    %125 = tpu.matmul %122, %124, %cst_77 {dimension_numbers = #tpu.dot_dimension_numbers<[1], [0], [0], [1], [0, 0, 1, 1], [], []>} : vector<18x32xf32>, vector<32x64xf32>, vector<18x64xf32> -> vector<18x64xf32>
    %126 = arith.addf %120, %125 : vector<18x64xf32>
    %127 = vector.extract_strided_slice %31 {offsets = [0, 1, 1, 0], sizes = [2, 3, 3, 32], strides = [1, 1, 1, 1]} : vector<2x4x4x32xf32> to vector<2x3x3x32xf32>
    %128 = vector.shape_cast %127 : vector<2x3x3x32xf32> to vector<18x32xf32>
    %c14 = arith.constant 14 : index
    %c0_78 = arith.constant 0 : index
    %c0_79 = arith.constant 0 : index
    %129 = vector.load %arg4[%c14, %c0_78, %c0_79] : memref<16x32x64xf32, #tpu.memory_space<vmem>>, vector<1x32x64xf32>
    %130 = vector.shape_cast %129 : vector<1x32x64xf32> to vector<32x64xf32>
    %cst_80 = arith.constant dense<0.000000e+00> : vector<18x64xf32>
    %131 = tpu.matmul %128, %130, %cst_80 {dimension_numbers = #tpu.dot_dimension_numbers<[1], [0], [0], [1], [0, 0, 1, 1], [], []>} : vector<18x32xf32>, vector<32x64xf32>, vector<18x64xf32> -> vector<18x64xf32>
    %132 = arith.addf %126, %131 : vector<18x64xf32>
    %133 = vector.extract_strided_slice %41 {offsets = [0, 1, 1, 0], sizes = [2, 3, 3, 32], strides = [1, 1, 1, 1]} : vector<2x4x4x32xf32> to vector<2x3x3x32xf32>
    %134 = vector.shape_cast %133 : vector<2x3x3x32xf32> to vector<18x32xf32>
    %c15 = arith.constant 15 : index
    %c0_81 = arith.constant 0 : index
    %c0_82 = arith.constant 0 : index
    %135 = vector.load %arg4[%c15, %c0_81, %c0_82] : memref<16x32x64xf32, #tpu.memory_space<vmem>>, vector<1x32x64xf32>
    %136 = vector.shape_cast %135 : vector<1x32x64xf32> to vector<32x64xf32>
    %cst_83 = arith.constant dense<0.000000e+00> : vector<18x64xf32>
    %137 = tpu.matmul %134, %136, %cst_83 {dimension_numbers = #tpu.dot_dimension_numbers<[1], [0], [0], [1], [0, 0, 1, 1], [], []>} : vector<18x32xf32>, vector<32x64xf32>, vector<18x64xf32> -> vector<18x64xf32>
    %138 = arith.addf %132, %137 : vector<18x64xf32>
    %c0_84 = arith.constant 0 : index
    %c0_85 = arith.constant 0 : index
    %139 = vector.load %arg5[%c0_84, %c0_85] : memref<1x64xf32, #tpu.memory_space<vmem>>, vector<1x64xf32>
    %140 = vector.broadcast %139 : vector<1x64xf32> to vector<18x64xf32>
    %141 = arith.addf %138, %140 : vector<18x64xf32>
    %cst_86 = arith.constant 0.000000e+00 : f32
    %142 = vector.broadcast %cst_86 : f32 to vector<18x64xf32>
    %143 = arith.maximumf %141, %142 : vector<18x64xf32>
    %144 = vector.shape_cast %143 : vector<18x64xf32> to vector<2x3x3x64xf32>
    %cst_87 = arith.constant 0.000000e+00 : f32
    %145 = vector.broadcast %cst_87 : f32 to vector<2x64xf32>
    %146 = vector.extract_strided_slice %144 {offsets = [0, 0, 0, 0], sizes = [2, 1, 1, 64], strides = [1, 1, 1, 1]} : vector<2x3x3x64xf32> to vector<2x1x1x64xf32>
    %147 = vector.shape_cast %146 : vector<2x1x1x64xf32> to vector<2x64xf32>
    %c0_88 = arith.constant 0 : index
    %c0_89 = arith.constant 0 : index
    %c0_90 = arith.constant 0 : index
    %148 = vector.load %arg6[%c0_88, %c0_89, %c0_90] : memref<9x64x64xf32, #tpu.memory_space<vmem>>, vector<1x64x64xf32>
    %149 = vector.shape_cast %148 : vector<1x64x64xf32> to vector<64x64xf32>
    %cst_91 = arith.constant dense<0.000000e+00> : vector<2x64xf32>
    %150 = tpu.matmul %147, %149, %cst_91 {dimension_numbers = #tpu.dot_dimension_numbers<[1], [0], [0], [1], [0, 0, 1, 1], [], []>} : vector<2x64xf32>, vector<64x64xf32>, vector<2x64xf32> -> vector<2x64xf32>
    %151 = arith.addf %145, %150 : vector<2x64xf32>
    %152 = vector.extract_strided_slice %144 {offsets = [0, 0, 1, 0], sizes = [2, 1, 1, 64], strides = [1, 1, 1, 1]} : vector<2x3x3x64xf32> to vector<2x1x1x64xf32>
    %153 = vector.shape_cast %152 : vector<2x1x1x64xf32> to vector<2x64xf32>
    %c1_92 = arith.constant 1 : index
    %c0_93 = arith.constant 0 : index
    %c0_94 = arith.constant 0 : index
    %154 = vector.load %arg6[%c1_92, %c0_93, %c0_94] : memref<9x64x64xf32, #tpu.memory_space<vmem>>, vector<1x64x64xf32>
    %155 = vector.shape_cast %154 : vector<1x64x64xf32> to vector<64x64xf32>
    %cst_95 = arith.constant dense<0.000000e+00> : vector<2x64xf32>
    %156 = tpu.matmul %153, %155, %cst_95 {dimension_numbers = #tpu.dot_dimension_numbers<[1], [0], [0], [1], [0, 0, 1, 1], [], []>} : vector<2x64xf32>, vector<64x64xf32>, vector<2x64xf32> -> vector<2x64xf32>
    %157 = arith.addf %151, %156 : vector<2x64xf32>
    %158 = vector.extract_strided_slice %144 {offsets = [0, 0, 2, 0], sizes = [2, 1, 1, 64], strides = [1, 1, 1, 1]} : vector<2x3x3x64xf32> to vector<2x1x1x64xf32>
    %159 = vector.shape_cast %158 : vector<2x1x1x64xf32> to vector<2x64xf32>
    %c2_96 = arith.constant 2 : index
    %c0_97 = arith.constant 0 : index
    %c0_98 = arith.constant 0 : index
    %160 = vector.load %arg6[%c2_96, %c0_97, %c0_98] : memref<9x64x64xf32, #tpu.memory_space<vmem>>, vector<1x64x64xf32>
    %161 = vector.shape_cast %160 : vector<1x64x64xf32> to vector<64x64xf32>
    %cst_99 = arith.constant dense<0.000000e+00> : vector<2x64xf32>
    %162 = tpu.matmul %159, %161, %cst_99 {dimension_numbers = #tpu.dot_dimension_numbers<[1], [0], [0], [1], [0, 0, 1, 1], [], []>} : vector<2x64xf32>, vector<64x64xf32>, vector<2x64xf32> -> vector<2x64xf32>
    %163 = arith.addf %157, %162 : vector<2x64xf32>
    %164 = vector.extract_strided_slice %144 {offsets = [0, 1, 0, 0], sizes = [2, 1, 1, 64], strides = [1, 1, 1, 1]} : vector<2x3x3x64xf32> to vector<2x1x1x64xf32>
    %165 = vector.shape_cast %164 : vector<2x1x1x64xf32> to vector<2x64xf32>
    %c3_100 = arith.constant 3 : index
    %c0_101 = arith.constant 0 : index
    %c0_102 = arith.constant 0 : index
    %166 = vector.load %arg6[%c3_100, %c0_101, %c0_102] : memref<9x64x64xf32, #tpu.memory_space<vmem>>, vector<1x64x64xf32>
    %167 = vector.shape_cast %166 : vector<1x64x64xf32> to vector<64x64xf32>
    %cst_103 = arith.constant dense<0.000000e+00> : vector<2x64xf32>
    %168 = tpu.matmul %165, %167, %cst_103 {dimension_numbers = #tpu.dot_dimension_numbers<[1], [0], [0], [1], [0, 0, 1, 1], [], []>} : vector<2x64xf32>, vector<64x64xf32>, vector<2x64xf32> -> vector<2x64xf32>
    %169 = arith.addf %163, %168 : vector<2x64xf32>
    %170 = vector.extract_strided_slice %144 {offsets = [0, 1, 1, 0], sizes = [2, 1, 1, 64], strides = [1, 1, 1, 1]} : vector<2x3x3x64xf32> to vector<2x1x1x64xf32>
    %171 = vector.shape_cast %170 : vector<2x1x1x64xf32> to vector<2x64xf32>
    %c4_104 = arith.constant 4 : index
    %c0_105 = arith.constant 0 : index
    %c0_106 = arith.constant 0 : index
    %172 = vector.load %arg6[%c4_104, %c0_105, %c0_106] : memref<9x64x64xf32, #tpu.memory_space<vmem>>, vector<1x64x64xf32>
    %173 = vector.shape_cast %172 : vector<1x64x64xf32> to vector<64x64xf32>
    %cst_107 = arith.constant dense<0.000000e+00> : vector<2x64xf32>
    %174 = tpu.matmul %171, %173, %cst_107 {dimension_numbers = #tpu.dot_dimension_numbers<[1], [0], [0], [1], [0, 0, 1, 1], [], []>} : vector<2x64xf32>, vector<64x64xf32>, vector<2x64xf32> -> vector<2x64xf32>
    %175 = arith.addf %169, %174 : vector<2x64xf32>
    %176 = vector.extract_strided_slice %144 {offsets = [0, 1, 2, 0], sizes = [2, 1, 1, 64], strides = [1, 1, 1, 1]} : vector<2x3x3x64xf32> to vector<2x1x1x64xf32>
    %177 = vector.shape_cast %176 : vector<2x1x1x64xf32> to vector<2x64xf32>
    %c5_108 = arith.constant 5 : index
    %c0_109 = arith.constant 0 : index
    %c0_110 = arith.constant 0 : index
    %178 = vector.load %arg6[%c5_108, %c0_109, %c0_110] : memref<9x64x64xf32, #tpu.memory_space<vmem>>, vector<1x64x64xf32>
    %179 = vector.shape_cast %178 : vector<1x64x64xf32> to vector<64x64xf32>
    %cst_111 = arith.constant dense<0.000000e+00> : vector<2x64xf32>
    %180 = tpu.matmul %177, %179, %cst_111 {dimension_numbers = #tpu.dot_dimension_numbers<[1], [0], [0], [1], [0, 0, 1, 1], [], []>} : vector<2x64xf32>, vector<64x64xf32>, vector<2x64xf32> -> vector<2x64xf32>
    %181 = arith.addf %175, %180 : vector<2x64xf32>
    %182 = vector.extract_strided_slice %144 {offsets = [0, 2, 0, 0], sizes = [2, 1, 1, 64], strides = [1, 1, 1, 1]} : vector<2x3x3x64xf32> to vector<2x1x1x64xf32>
    %183 = vector.shape_cast %182 : vector<2x1x1x64xf32> to vector<2x64xf32>
    %c6_112 = arith.constant 6 : index
    %c0_113 = arith.constant 0 : index
    %c0_114 = arith.constant 0 : index
    %184 = vector.load %arg6[%c6_112, %c0_113, %c0_114] : memref<9x64x64xf32, #tpu.memory_space<vmem>>, vector<1x64x64xf32>
    %185 = vector.shape_cast %184 : vector<1x64x64xf32> to vector<64x64xf32>
    %cst_115 = arith.constant dense<0.000000e+00> : vector<2x64xf32>
    %186 = tpu.matmul %183, %185, %cst_115 {dimension_numbers = #tpu.dot_dimension_numbers<[1], [0], [0], [1], [0, 0, 1, 1], [], []>} : vector<2x64xf32>, vector<64x64xf32>, vector<2x64xf32> -> vector<2x64xf32>
    %187 = arith.addf %181, %186 : vector<2x64xf32>
    %188 = vector.extract_strided_slice %144 {offsets = [0, 2, 1, 0], sizes = [2, 1, 1, 64], strides = [1, 1, 1, 1]} : vector<2x3x3x64xf32> to vector<2x1x1x64xf32>
    %189 = vector.shape_cast %188 : vector<2x1x1x64xf32> to vector<2x64xf32>
    %c7_116 = arith.constant 7 : index
    %c0_117 = arith.constant 0 : index
    %c0_118 = arith.constant 0 : index
    %190 = vector.load %arg6[%c7_116, %c0_117, %c0_118] : memref<9x64x64xf32, #tpu.memory_space<vmem>>, vector<1x64x64xf32>
    %191 = vector.shape_cast %190 : vector<1x64x64xf32> to vector<64x64xf32>
    %cst_119 = arith.constant dense<0.000000e+00> : vector<2x64xf32>
    %192 = tpu.matmul %189, %191, %cst_119 {dimension_numbers = #tpu.dot_dimension_numbers<[1], [0], [0], [1], [0, 0, 1, 1], [], []>} : vector<2x64xf32>, vector<64x64xf32>, vector<2x64xf32> -> vector<2x64xf32>
    %193 = arith.addf %187, %192 : vector<2x64xf32>
    %194 = vector.extract_strided_slice %144 {offsets = [0, 2, 2, 0], sizes = [2, 1, 1, 64], strides = [1, 1, 1, 1]} : vector<2x3x3x64xf32> to vector<2x1x1x64xf32>
    %195 = vector.shape_cast %194 : vector<2x1x1x64xf32> to vector<2x64xf32>
    %c8_120 = arith.constant 8 : index
    %c0_121 = arith.constant 0 : index
    %c0_122 = arith.constant 0 : index
    %196 = vector.load %arg6[%c8_120, %c0_121, %c0_122] : memref<9x64x64xf32, #tpu.memory_space<vmem>>, vector<1x64x64xf32>
    %197 = vector.shape_cast %196 : vector<1x64x64xf32> to vector<64x64xf32>
    %cst_123 = arith.constant dense<0.000000e+00> : vector<2x64xf32>
    %198 = tpu.matmul %195, %197, %cst_123 {dimension_numbers = #tpu.dot_dimension_numbers<[1], [0], [0], [1], [0, 0, 1, 1], [], []>} : vector<2x64xf32>, vector<64x64xf32>, vector<2x64xf32> -> vector<2x64xf32>
    %199 = arith.addf %193, %198 : vector<2x64xf32>
    %c0_124 = arith.constant 0 : index
    %c0_125 = arith.constant 0 : index
    %200 = vector.load %arg7[%c0_124, %c0_125] : memref<1x64xf32, #tpu.memory_space<vmem>>, vector<1x64xf32>
    %201 = vector.broadcast %200 : vector<1x64xf32> to vector<2x64xf32>
    %202 = arith.addf %199, %201 : vector<2x64xf32>
    %cst_126 = arith.constant 0.000000e+00 : f32
    %203 = vector.broadcast %cst_126 : f32 to vector<2x64xf32>
    %204 = arith.maximumf %202, %203 : vector<2x64xf32>
    %205 = vector.shape_cast %204 : vector<2x64xf32> to vector<2x1x1x64xf32>
    %cst_127 = arith.constant 0.000000e+00 : f32
    %206 = vector.broadcast %cst_127 : f32 to vector<2x256xf32>
    %207 = vector.shape_cast %205 : vector<2x1x1x64xf32> to vector<2x64xf32>
    %c0_128 = arith.constant 0 : index
    %c0_129 = arith.constant 0 : index
    %c0_130 = arith.constant 0 : index
    %c0_131 = arith.constant 0 : index
    %208 = vector.load %arg8[%c0_128, %c0_129, %c0_130, %c0_131] : memref<1x1x64x256xf32, #tpu.memory_space<vmem>>, vector<1x1x64x256xf32>
    %209 = vector.shape_cast %208 : vector<1x1x64x256xf32> to vector<64x256xf32>
    %cst_132 = arith.constant dense<0.000000e+00> : vector<2x256xf32>
    %210 = tpu.matmul %207, %209, %cst_132 {dimension_numbers = #tpu.dot_dimension_numbers<[1], [0], [0], [1], [0, 0, 1, 1], [], []>} : vector<2x64xf32>, vector<64x256xf32>, vector<2x256xf32> -> vector<2x256xf32>
    %211 = arith.addf %206, %210 : vector<2x256xf32>
    %c0_133 = arith.constant 0 : index
    %c0_134 = arith.constant 0 : index
    %212 = vector.load %arg9[%c0_133, %c0_134] : memref<1x256xf32, #tpu.memory_space<vmem>>, vector<1x256xf32>
    %213 = vector.broadcast %212 : vector<1x256xf32> to vector<2x256xf32>
    %214 = arith.addf %211, %213 : vector<2x256xf32>
    %cst_135 = arith.constant 0.000000e+00 : f32
    %215 = vector.broadcast %cst_135 : f32 to vector<2x256xf32>
    %216 = arith.maximumf %214, %215 : vector<2x256xf32>
    %c0_136 = arith.constant 0 : index
    %c0_137 = arith.constant 0 : index
    %217 = vector.load %arg10[%c0_136, %c0_137] : memref<1x256xf32, #tpu.memory_space<vmem>>, vector<1x256xf32>
    %218 = vector.broadcast %217 : vector<1x256xf32> to vector<2x256xf32>
    %219 = arith.mulf %216, %218 : vector<2x256xf32>
    %cst_138 = arith.constant dense<0.000000e+00> : vector<2xf32>
    %220 = vector.multi_reduction <add>, %219, %cst_138 [1] : vector<2x256xf32> to vector<2xf32>
    %221 = vector.shape_cast %220 : vector<2xf32> to vector<2x1xf32>
    %c0_139 = arith.constant 0 : index
    %c0_140 = arith.constant 0 : index
    %222 = vector.load %arg11[%c0_139, %c0_140] : memref<1x1xf32, #tpu.memory_space<vmem>>, vector<1x1xf32>
    %223 = vector.broadcast %222 : vector<1x1xf32> to vector<2x1xf32>
    %224 = arith.addf %221, %223 : vector<2x1xf32>
    %c0_141 = arith.constant 0 : index
    %c0_142 = arith.constant 0 : index
    %225 = vector.load %arg12[%c0_141, %c0_142] : memref<2x1xf32, #tpu.memory_space<vmem>>, vector<2x1xf32>
    tpu.vector_store %arg12[%c0_141, %c0_142], %224 {strides = array<i32>} : memref<2x1xf32, #tpu.memory_space<vmem>>, vector<2x1xf32>,
    return
  }
  func.func @transform_0(%arg0: i32) -> (i32, i32, i32, i32, i32, i32) {
    %c0_i32 = arith.constant 0 : i32
    %c0_i32_0 = arith.constant 0 : i32
    %c0_i32_1 = arith.constant 0 : i32
    %c0_i32_2 = arith.constant 0 : i32
    %c0_i32_3 = arith.constant 0 : i32
    %c0_i32_4 = arith.constant 0 : i32
    return %arg0, %c0_i32, %c0_i32_0, %c0_i32_1, %c0_i32_2, %c0_i32_3 : i32, i32, i32, i32, i32, i32
  }
  func.func @transform_1(%arg0: i32) -> (i32, i32) {
    %c0_i32 = arith.constant 0 : i32
    %c0_i32_0 = arith.constant 0 : i32
    %c0_i32_1 = arith.constant 0 : i32
    return %c0_i32, %c0_i32_0 : i32, i32
  }
  func.func @transform_2(%arg0: i32) -> (i32, i32) {
    %c0_i32 = arith.constant 0 : i32
    %c0_i32_0 = arith.constant 0 : i32
    %c0_i32_1 = arith.constant 0 : i32
    return %c0_i32, %c0_i32_0 : i32, i32
  }
  func.func @transform_3(%arg0: i32) -> (i32, i32, i32) {
    %c0_i32 = arith.constant 0 : i32
    %c0_i32_0 = arith.constant 0 : i32
    %c0_i32_1 = arith.constant 0 : i32
    %c0_i32_2 = arith.constant 0 : i32
    return %c0_i32, %c0_i32_0, %c0_i32_1 : i32, i32, i32
  }
  func.func @transform_4(%arg0: i32) -> (i32, i32) {
    %c0_i32 = arith.constant 0 : i32
    %c0_i32_0 = arith.constant 0 : i32
    %c0_i32_1 = arith.constant 0 : i32
    return %c0_i32, %c0_i32_0 : i32, i32
  }
  func.func @transform_5(%arg0: i32) -> (i32, i32, i32) {
    %c0_i32 = arith.constant 0 : i32
    %c0_i32_0 = arith.constant 0 : i32
    %c0_i32_1 = arith.constant 0 : i32
    %c0_i32_2 = arith.constant 0 : i32
    return %c0_i32, %c0_i32_0, %c0_i32_1 : i32, i32, i32
  }
  func.func @transform_6(%arg0: i32) -> (i32, i32) {
    %c0_i32 = arith.constant 0 : i32
    %c0_i32_0 = arith.constant 0 : i32
    %c0_i32_1 = arith.constant 0 : i32
    return %c0_i32, %c0_i32_0 : i32, i32
  }
  func.func @transform_7(%arg0: i32) -> (i32, i32, i32, i32) {
    %c0_i32 = arith.constant 0 : i32
    %c0_i32_0 = arith.constant 0 : i32
    %c0_i32_1 = arith.constant 0 : i32
    %c0_i32_2 = arith.constant 0 : i32
    %c0_i32_3 = arith.constant 0 : i32
    return %c0_i32, %c0_i32_0, %c0_i32_1, %c0_i32_2 : i32, i32, i32, i32
  }
  func.func @transform_8(%arg0: i32) -> (i32, i32) {
    %c0_i32 = arith.constant 0 : i32
    %c0_i32_0 = arith.constant 0 : i32
    %c0_i32_1 = arith.constant 0 : i32
    return %c0_i32, %c0_i32_0 : i32, i32
  }
  func.func @transform_9(%arg0: i32) -> (i32, i32) {
    %c0_i32 = arith.constant 0 : i32
    %c0_i32_0 = arith.constant 0 : i32
    %c0_i32_1 = arith.constant 0 : i32
    return %c0_i32, %c0_i32_0 : i32, i32
  }
  func.func @transform_10(%arg0: i32) -> (i32, i32) {
    %c0_i32 = arith.constant 0 : i32
    %c0_i32_0 = arith.constant 0 : i32
    %c0_i32_1 = arith.constant 0 : i32
    return %c0_i32, %c0_i32_0 : i32, i32
  }
  func.func @transform_11(%arg0: i32) -> (i32, i32) {
    %c0_i32 = arith.constant 0 : i32
    %c0_i32_0 = arith.constant 0 : i32
    return %arg0, %c0_i32 : i32, i32
  }
}

</mosaic_0001>

<bundles_post_ra>
// kernel: atari_distill_forward.1
= control target key start
LH: loop header
LB: loop body
LE: loop exit
PB: predicated region body
PF: predicated region fallthrough
CT: control target
= control target key end

     0   :  { %vm7210_vm0 = vmmov 0   ;;  %vm1028_vm1 = vcmask 261120   ;;  %vm4744_vm2 = vcmask 523264   ;;  %vm5710_vm3 = vcmask 1041408   ;;  %s9526_s1 = inlined_call_operand.vmem [shape: f32[256,32], index: 1, kind: input, shape index: {}]   ;;  %s9527_s0 = inlined_call_operand.vmem [shape: bf16[2,2,2,4,4,256], index: 0, kind: input, shape index: {}]   ;;  %s9528_s3 = inlined_call_operand.vmem [shape: f32[16,32,64], index: 3, kind: input, shape index: {}]   ;;  %s9529_s2 = inlined_call_operand.vmem [shape: f32[1,32], index: 2, kind: input, shape index: {}]   ;;  %s9530_s5 = inlined_call_operand.vmem [shape: f32[9,64,64], index: 5, kind: input, shape index: {}]   ;;  %s9531_s4 = inlined_call_operand.vmem [shape: f32[1,64], index: 4, kind: input, shape index: {}]   ;;  %s9532_s7 = inlined_call_operand.vmem [shape: f32[1,1,64,256], index: 7, kind: input, shape index: {}]   ;;  %s9533_s6 = inlined_call_operand.vmem [shape: f32[1,64], index: 6, kind: input, shape index: {}]   ;;  %s9534_s10 = inlined_call_operand.<no memory space> [shape: f32[1,1], index: 10, kind: input, shape index: {}]   ;;  %s9535_s8 = inlined_call_operand.vmem [shape: f32[1,256], index: 8, kind: input, shape index: {}]   ;;  %s9536_s9 = inlined_call_operand.vmem [shape: f32[1,256], index: 9, kind: input, shape index: {}]   ;;  %s9537_s11 = inlined_call_operand.vmem [shape: f32[2,1], index: 11, kind: output, shape index: {}]  }
   0x1   :  { %v56_v0 = vld [vmem:[%s9526_s1 + $0x80] sm:$0xff]  ;;  %v57_v1 = vld [vmem:[%s9526_s1 + $0x88] sm:$0xff]  ;;  %v58_v5 = vld [vmem:[%s9526_s1 + $0x90] sm:$0xff]  ;;  %vm5724_vm4 = vcmask 1024  }
   0x2   :  { %v40_v2 = vld [vmem:[%s9526_s1] sm:$0xff]  ;;  %v7282_v3 = vpack.c.bf16 %v57_v1, %v56_v0  ;;  %v41_v4 = vld [vmem:[%s9526_s1 + $0x8] sm:$0xff]  ;;  %v59_v6 = vld [vmem:[%s9526_s1 + $0x98] sm:$0xff] }
   0x3   :  { %v7293_v7 = vpack.c.bf16 %v41_v4, %v40_v2  ;;  %v7295_v8 = vpack.c.bf16 %v59_v6, %v58_v5  ;;  %v42_v9 = vld [vmem:[%s9526_s1 + $0x10] sm:$0xff]  ;;  %v43_v10 = vld [vmem:[%s9526_s1 + $0x18] sm:$0xff]  ;;  %v60_v11 = vld [vmem:[%s9526_s1 + $0xa0] sm:$0xff] }
   0x4   :  { %6858 = vmatprep.subr.bf16.mxu0 %v7282_v3  ;;  %6890 = vmatprep.subr.bf16.mxu1 %v7282_v3  ;;  %v61_v12 = vld [vmem:[%s9526_s1 + $0xa8] sm:$0xff]  ;;  %v7313_v13 = vpack.c.bf16 %v43_v10, %v42_v9  ;;  %v44_v15 = vld [vmem:[%s9526_s1 + $0x20] sm:$0xff]  ;;  %v62_v17 = vld [vmem:[%s9526_s1 + $0xb0] sm:$0xff] }
   0x5   :  { %6860 = vmatpush3.bf16.msra.mxu0 %v7293_v7  ;;  %6892 = vmatpush3.bf16.msra.mxu1 %v7293_v7  ;;  %v7317_v14 = vpack.c.bf16 %v61_v12, %v60_v11  ;;  %v45_v16 = vld [vmem:[%s9526_s1 + $0x28] sm:$0xff]  ;;  %v63_v18 = vld [vmem:[%s9526_s1 + $0xb8] sm:$0xff]  ;;  %v46_v21 = vld [vmem:[%s9526_s1 + $0x30] sm:$0xff] }
   0x6   :  { %6862 = vmatprep.subr.bf16.mxu0 %v7295_v8  ;;  %6894 = vmatprep.subr.bf16.mxu1 %v7295_v8  ;;  %v7333_v19 = vpack.c.bf16 %v45_v16, %v44_v15  ;;  %v7337_v20 = vpack.c.bf16 %v63_v18, %v62_v17  ;;  %v47_v22 = vld [vmem:[%s9526_s1 + $0x38] sm:$0xff]  ;;  %v64_v23 = vld [vmem:[%s9526_s1 + $0xc0] sm:$0xff]  ;;  %v65_v24 = vld [vmem:[%s9526_s1 + $0xc8] sm:$0xff] }
   0x7   :  { %v5967_v25 = vld [vmem:[%s9527_s0] sm:$0xff]   ;;  %v6033_v28 = vld [vmem:[%s9527_s0 + $0x10] sm:$0xff]   ;;  %v7359_v29 = vpack.c.bf16 %v47_v22, %v46_v21  ;;  %v7363_v32 = vpack.c.bf16 %v65_v24, %v64_v23  ;;  %v49_v34 = vld [vmem:[%s9526_s1 + $0x48] sm:$0xff] }
   0x8   :  { %v5968_v26 = vunpack.c.l.bf16 %v5967_v25  ;;  %v5969_v27 = vunpack.c.h.bf16 %v5967_v25  ;;  %v5984_v30 = vunpack.c.l.bf16 %v6033_v28  ;;  %v5985_v31 = vunpack.c.h.bf16 %v6033_v28  ;;  %v48_v33 = vld [vmem:[%s9526_s1 + $0x40] sm:$0xff]  ;;  %v66_v36 = vld [vmem:[%s9526_s1 + $0xd0] sm:$0xff]  ;;  %v67_v37 = vld [vmem:[%s9526_s1 + $0xd8] sm:$0xff] }
   0x9   :  { %6864 = vmatpush3.bf16.msra.mxu0 %v7313_v13  ;;  %6896 = vmatpush3.bf16.msra.mxu1 %v7313_v13  ;;  %v7379_v39 = vpack.c.bf16 %v49_v34, %v48_v33  ;;  %v7383_v40 = vpack.c.bf16 %v67_v37, %v66_v36  ;;  %v50_v41 = vld [vmem:[%s9526_s1 + $0x50] sm:$0xff]  ;;  %v51_v42 = vld [vmem:[%s9526_s1 + $0x58] sm:$0xff]  ;;  %v68_v43 = vld [vmem:[%s9526_s1 + $0xe0] sm:$0xff] }
   0xa   :  { %6866 = vmatprep.subr.bf16.mxu0 %v7317_v14  ;;  %6898 = vmatprep.subr.bf16.mxu1 %v7317_v14  ;;  %v104_v35 = vcombine.high %v5968_v26, %v5969_v27  ;;  %v242_v38 = vcombine.high %v5984_v30, %v5985_v31  ;;  %v69_v44 = vld [vmem:[%s9526_s1 + $0xe8] sm:$0xff]  ;;  %v7399_v45 = vpack.c.bf16 %v51_v42, %v50_v41  ;;  %v52_v47 = vld [vmem:[%s9526_s1 + $0x60] sm:$0xff]  ;;  %v70_v49 = vld [vmem:[%s9526_s1 + $0xf0] sm:$0xff] }
   0xb   :  { %v7403_v46 = vpack.c.bf16 %v69_v44, %v68_v43  ;;  %v53_v48 = vld [vmem:[%s9526_s1 + $0x68] sm:$0xff]  ;;  %v71_v50 = vld [vmem:[%s9526_s1 + $0xf8] sm:$0xff]  ;;  %v54_v52 = vld [vmem:[%s9526_s1 + $0x70] sm:$0xff]  ;;  %v103_v0 = vcombine.low %v5968_v26, %v5969_v27  ;;  %v241_v1 = vcombine.low %v5984_v30, %v5985_v31 }
   0xc   :  { %183 = vmatprep.mubr.f32.mxu0 %v104_v35  ;;  %321 = vmatprep.mubr.f32.mxu1 %v242_v38  ;;  %v7419_v51 = vpack.c.bf16 %v53_v48, %v52_v47  ;;  %v55_v53 = vld [vmem:[%s9526_s1 + $0x78] sm:$0xff]  ;;  %v7429_v54 = vpack.c.bf16 %v71_v50, %v70_v49  ;;  %v6030_v55 = vld [vmem:[%s9527_s0 + $0x8] sm:$0xff]   ;;  %v6031_v62 = vld [vmem:[%s9527_s0 + $0x40] sm:$0xff]  }
   0xd   :  { %6868 = vmatpush3.bf16.msra.mxu0 %v7333_v19  ;;  %6900 = vmatpush3.bf16.msra.mxu1 %v7333_v19  ;;  %v6034_v56 = vld [vmem:[%s9527_s0 + $0x18] sm:$0xff]   ;;  %v7437_v57 = vpack.c.bf16 %v55_v53, %v54_v52  ;;  %v5972_v58 = vunpack.c.l.bf16 %v6030_v55  ;;  %v5973_v59 = vunpack.c.h.bf16 %v6030_v55  ;;  %v6035_v63 = vld [vmem:[%s9527_s0 + $0x50] sm:$0xff]   ;;  %v5976_v5 = vunpack.c.l.bf16 %v6031_v62  ;;  %v6032_v11 = vld [vmem:[%s9527_s0 + $0x48] sm:$0xff]  }
   0xe   :  { %6870 = vmatprep.subr.bf16.mxu0 %v7337_v20  ;;  %6902 = vmatprep.subr.bf16.mxu1 %v7337_v20  ;;  %v5988_v60 = vunpack.c.l.bf16 %v6034_v56  ;;  %v5989_v61 = vunpack.c.h.bf16 %v6034_v56  ;;  %v5977_v6 = vunpack.c.h.bf16 %v6031_v62  ;;  %v5992_v9 = vunpack.c.l.bf16 %v6035_v63  ;;  %v6036_v12 = vld [vmem:[%s9527_s0 + $0x58] sm:$0xff]   ;;  %v6041_v26 = vld [vmem:[%s9527_s0 + $0x30] sm:$0xff]   ;;  %v6039_v38 = vld [vmem:[%s9527_s0 + $0x60] sm:$0xff]  }
   0xf   :  { %v106_v2 = vcombine.high %v5972_v58, %v5973_v59  ;;  %v5993_v10 = vunpack.c.h.bf16 %v6035_v63  ;;  %v105_v15 = vcombine.low %v5972_v58, %v5973_v59  ;;  %v5981_v17 = vunpack.c.h.bf16 %v6032_v11  ;;  %v6040_v48 = vld [vmem:[%s9527_s0 + $0x68] sm:$0xff]   ;;  %v6044_v49 = vld [vmem:[%s9527_s0 + $0x78] sm:$0xff]  }
  0x10   :  { %v244_v4 = vcombine.high %v5988_v60, %v5989_v61  ;;  %v243_v16 = vcombine.low %v5988_v60, %v5989_v61  ;;  %v108_v18 = vcombine.high %v5976_v5, %v5977_v6  ;;  %v5996_v22 = vunpack.c.l.bf16 %v6036_v12 }
  0x11   :  { %6872 = vmatpush3.bf16.msra.mxu0 %v7359_v29  ;;  %6904 = vmatpush3.bf16.msra.mxu1 %v7359_v29  ;;  %v246_v21 = vcombine.high %v5992_v9, %v5993_v10  ;;  %v5997_v23 = vunpack.c.h.bf16 %v6036_v12  ;;  %v107_v24 = vcombine.low %v5976_v5, %v5977_v6  ;;  %v245_v25 = vcombine.low %v5992_v9, %v5993_v10  ;;  %v769_v5 = vld [vmem:[%s9528_s3 + $0x8] sm:$0xff]  ;;  %v5757_v10 = vld [vmem:[%s9528_s3 + $0x30] sm:$0xff] }
  0x12   :  { %6874 = vmatprep.subr.bf16.mxu0 %v7363_v32  ;;  %6906 = vmatprep.subr.bf16.mxu1 %v7363_v32  ;;  %v6016_v31 = vunpack.c.l.bf16 %v6041_v26  ;;  %v6017_v33 = vunpack.c.h.bf16 %v6041_v26  ;;  %v6008_v44 = vunpack.c.l.bf16 %v6039_v38  ;;  %v6012_v52 = vunpack.c.l.bf16 %v6040_v48  ;;  %v770_v12 = vld [vmem:[%s9528_s3 + $0x10] sm:$0xff]  ;;  %v7552_v26 = vld [vmem:[%s9529_s2] ss:$0 sm:$0xff] }
  0x13   :  { %v247_v35 = vcombine.low %v5996_v22, %v5997_v23  ;;  %v6013_v53 = vunpack.c.h.bf16 %v6040_v48  ;;  %v6028_v56 = vunpack.c.l.bf16 %v6044_v49  ;;  %v9538_v6 = vmov 0.0|0.0  }
  0x14   :  { %v517_v41 = vcombine.low %v6016_v31, %v6017_v33 }
  0x15   :  { %6876 = vmatpush3.bf16.msra.mxu0 %v7379_v39  ;;  %6908 = vmatpush3.bf16.msra.mxu1 %v7379_v39  ;;  %v386_v60 = vcombine.high %v6012_v52, %v6013_v53  ;;  %v385_v62 = vcombine.low %v6012_v52, %v6013_v53 }
  0x16   :  { %6878 = vmatprep.subr.bf16.mxu0 %v7383_v40  ;;  %6910 = vmatprep.subr.bf16.mxu1 %v7383_v40 }
  0x19   :  { %6880 = vmatpush3.bf16.msra.mxu0 %v7399_v45  ;;  %6912 = vmatpush3.bf16.msra.mxu1 %v7399_v45 }
  0x1a   :  { %6882 = vmatprep.subr.bf16.mxu0 %v7403_v46  ;;  %6914 = vmatprep.subr.bf16.mxu1 %v7403_v46 }
  0x1d   :  { %6884 = vmatpush3.bf16.msra.mxu0 %v7419_v51  ;;  %6916 = vmatpush3.bf16.msra.mxu1 %v7419_v51 }
  0x1e   :  { %6886 = vmatprep.subr.bf16.mxu0 %v7429_v54  ;;  %6918 = vmatprep.subr.bf16.mxu1 %v7429_v54 }
  0x21   :  { %6888 = vmatpush3.bf16.msra.mxu0 %v7437_v57  ;;  %6920 = vmatpush3.bf16.msra.mxu1 %v7437_v57 }
  0x22   :  { %6922 = vmatprep.subr.bf16.mxu0 %v7282_v3  ;;  %6954 = vmatprep.subr.bf16.mxu1 %v7282_v3  ;;  %v5980_v3 = vunpack.c.l.bf16 %v6032_v11  ;;  %v5758_v11 = vld [vmem:[%s9528_s3 + $0x38] sm:$0xff] }
  0x24   :  { %184 = vmatmul.mubr.f32.vlgmr.msra.gmra.mrb[0].mxu0 %v103_v0  ;;  %322 = vmatmul.mubr.f32.vlgmr.msra.gmra.mrb[0].mxu1 %v241_v1  ;;  %v110_v27 = vcombine.high %v5980_v3, %v5981_v17  ;;  %v109_v34 = vcombine.low %v5980_v3, %v5981_v17  ;;  %v5755_v0 = vld [vmem:[%s9528_s3 + $0x20] sm:$0xff]  ;;  %v5756_v1 = vld [vmem:[%s9528_s3 + $0x28] sm:$0xff]  ;;  %v9540_v17 = vmov 0.0  }
  0x25   :  { %6924 = vmatpush3.bf16.msra.mxu0 %v7293_v7  ;;  %6956 = vmatpush3.bf16.msra.mxu1 %v7293_v7  ;;  %v6037_v7 = vld [vmem:[%s9527_s0 + $0x20] sm:$0xff]  }
  0x26   :  { %188 = vmatprep.mubr.f32.mxu0 %v106_v2  ;;  %326 = vmatprep.mubr.f32.mxu1 %v244_v4  ;;  %v6000_v28 = vunpack.c.l.bf16 %v6037_v7  ;;  %v6001_v30 = vunpack.c.h.bf16 %v6037_v7  ;;  %v768_v2 = vld [vmem:[%s9528_s3] sm:$0xff]  ;;  %v6986_v4 = vpack.c.bf16 %v5756_v1, %v5755_v0 }
  0x27   :  { %6926 = vmatprep.subr.bf16.mxu0 %v7295_v8  ;;  %6958 = vmatprep.subr.bf16.mxu1 %v7295_v8  ;;  %v248_v8 = vcombine.high %v5996_v22, %v5997_v23  ;;  %v6992_v9 = vpack.c.bf16 %v769_v5, %v768_v2  ;;  %v633_v22 = vlaneseq }
  0x28   :  { %189 = vmatmul.mubr.f32.gmra.mrb[2].mxu0 %v105_v15  ;;  %327 = vmatmul.mubr.f32.gmra.mrb[2].mxu1 %v243_v16  ;;  %v6989_v15 = vpack.c.bf16 %v5758_v11, %v5757_v10  ;;  %v771_v16 = vld [vmem:[%s9528_s3 + $0x18] sm:$0xff] }
  0x29   :  { %6928 = vmatpush3.bf16.msra.mxu0 %v7313_v13  ;;  %6960 = vmatpush3.bf16.msra.mxu1 %v7313_v13  ;;  %v380_v13 = vcombine.high %v6000_v28, %v6001_v30  ;;  %v6995_v3 = vpack.c.bf16 %v771_v16, %v770_v12  ;;  %v7547_v7 = vshrl.u32 %v633_v22, 7 }
  0x2a   :  { %193 = vmatprep.mubr.f32.mxu0 %v108_v18  ;;  %331 = vmatprep.mubr.f32.mxu1 %v246_v21  ;;  %v7212_v18 = vmov 1966171168  }
  0x2b   :  { %6930 = vmatprep.subr.bf16.mxu0 %v7317_v14  ;;  %6962 = vmatprep.subr.bf16.mxu1 %v7317_v14  ;;  %v518_v14 = vcombine.high %v6016_v31, %v6017_v33  ;;  %v631_v21 = vunpack.c.l.s4 %v7212_v18  ;;  %9605 = vst [vmem:[#allocation3_spill] sm:$0xff] %v7547_v7  ;;  %v7557_v31 = vld [vmem:[%s9528_s3 + $0x40] sm:$0xff] }
  0x2c   :  { %194 = vmatmul.mubr.f32.gmra.mrb[4].mxu0 %v107_v24  ;;  %332 = vmatmul.mubr.f32.gmra.mrb[4].mxu1 %v245_v25 }
  0x2d   :  { %6932 = vmatpush3.bf16.msra.mxu0 %v7333_v19  ;;  %6964 = vmatpush3.bf16.msra.mxu1 %v7333_v19  ;;  %v6038_v19 = vld [vmem:[%s9527_s0 + $0x28] sm:$0xff]   ;;  %v632_v25 = vunpack.c.0.s8 %v631_v21 }
  0x2e   :  { %198 = vmatprep.mubr.f32.mxu0 %v110_v27  ;;  %336 = vmatprep.mubr.f32.mxu1 %v248_v8 }
  0x2f   :  { %6934 = vmatprep.subr.bf16.mxu0 %v7337_v20  ;;  %6966 = vmatprep.subr.bf16.mxu1 %v7337_v20  ;;  %v6042_v20 = vld [vmem:[%s9527_s0 + $0x38] sm:$0xff]  }
  0x30   :  { %199 = vmatmul.mubr.f32.gmra.mrb[6].mxu0 %v109_v34  ;;  %337 = vmatmul.mubr.f32.gmra.mrb[6].mxu1 %v247_v35  ;;  %v6020_v36 = vunpack.c.l.bf16 %v6042_v20  ;;  %v6021_v37 = vunpack.c.h.bf16 %v6042_v20  ;;  %v7561_v34 = vsub.s32 %v632_v25, %v7547_v7  ;;  %v7572_v20 = vld [vmem:[%s9528_s3 + $0x60] sm:$0xff] }
  0x31   :  { %6936 = vmatpush3.bf16.msra.mxu0 %v7359_v29  ;;  %6968 = vmatpush3.bf16.msra.mxu1 %v7359_v29  ;;  %v6004_v29 = vunpack.c.l.bf16 %v6038_v19 }
  0x32   :  { %6938 = vmatprep.subr.bf16.mxu0 %v7363_v32  ;;  %6970 = vmatprep.subr.bf16.mxu1 %v7363_v32  ;;  %v6005_v32 = vunpack.c.h.bf16 %v6038_v19  ;;  %v520_v43 = vcombine.high %v6020_v36, %v6021_v37  ;;  %v7567_v19 = vld [vmem:[%s9528_s3 + $0x48] sm:$0xff] }
  0x33   :  { %459 = vmatprep.mubr.f32.mxu0 %v380_v13  ;;  %597 = vmatprep.mubr.f32.mxu1 %v518_v14 }
  0x34   :  { %v382_v42 = vcombine.high %v6004_v29, %v6005_v32  ;;  %v381_v50 = vcombine.low %v6004_v29, %v6005_v32  ;;  %v7577_v29 = vld [vmem:[%s9528_s3 + $0x68] sm:$0xff] }
  0x35   :  { %6940 = vmatpush3.bf16.msra.mxu0 %v7379_v39  ;;  %6972 = vmatpush3.bf16.msra.mxu1 %v7379_v39  ;;  %v6043_v39 = vld [vmem:[%s9527_s0 + $0x70] sm:$0xff]  }
  0x36   :  { %6942 = vmatprep.subr.bf16.mxu0 %v7383_v40  ;;  %6974 = vmatprep.subr.bf16.mxu1 %v7383_v40  ;;  %v379_v40 = vcombine.low %v6000_v28, %v6001_v30  ;;  %v6025_v47 = vunpack.c.h.bf16 %v6043_v39 }
  0x39   :  { %6944 = vmatpush3.bf16.msra.mxu0 %v7399_v45  ;;  %6976 = vmatpush3.bf16.msra.mxu1 %v7399_v45  ;;  %v6009_v45 = vunpack.c.h.bf16 %v6039_v38  ;;  %v7587_v38 = vld [vmem:[%s9528_s3 + $0x58] sm:$0xff] }
  0x3a   :  { %6946 = vmatprep.subr.bf16.mxu0 %v7403_v46  ;;  %6978 = vmatprep.subr.bf16.mxu1 %v7403_v46  ;;  %v6024_v46 = vunpack.c.l.bf16 %v6043_v39  ;;  %v7592_v39 = vld [vmem:[%s9528_s3 + $0x70] sm:$0xff] }
  0x3b   :  { %v383_v58 = vcombine.low %v6008_v44, %v6009_v45 }
  0x3c   :  { %v522_v55 = vcombine.high %v6024_v46, %v6025_v47  ;;  %v521_v59 = vcombine.low %v6024_v46, %v6025_v47  ;;  %v7607_v46 = vld [vmem:[%s9528_s3 + $0x88] sm:$0xff] }
  0x3d   :  { %6948 = vmatpush3.bf16.msra.mxu0 %v7419_v51  ;;  %6980 = vmatpush3.bf16.msra.mxu1 %v7419_v51  ;;  %v519_v51 = vcombine.low %v6020_v36, %v6021_v37  ;;  %v7582_v37 = vld [vmem:[%s9528_s3 + $0x50] sm:$0xff]  ;;  %9607 = vst [vmem:[#allocation5_spill] sm:$0xff] %v7607_v46 }
  0x3e   :  { %6950 = vmatprep.subr.bf16.mxu0 %v7429_v54  ;;  %6982 = vmatprep.subr.bf16.mxu1 %v7429_v54  ;;  %v384_v54 = vcombine.high %v6008_v44, %v6009_v45  ;;  %v7597_v44 = vld [vmem:[%s9528_s3 + $0x78] sm:$0xff]  ;;  %v7602_v45 = vld [vmem:[%s9528_s3 + $0x80] sm:$0xff] }
  0x3f   :  { %9606 = vst [vmem:[#allocation4_spill] sm:$0xff] %v7602_v45 }
  0x41   :  { %6952 = vmatpush3.bf16.msra.mxu0 %v7437_v57  ;;  %6984 = vmatpush3.bf16.msra.mxu1 %v7437_v57  ;;  %v6029_v57 = vunpack.c.h.bf16 %v6044_v49 }
  0x42   :  { %6985 = vmatprep.subr.bf16.mxu0 %v9538_v6  ;;  %6991 = vmatprep.subr.bf16.mxu1 %v9538_v6 }
  0x43   :  { %v524_v61 = vcombine.high %v6028_v56, %v6029_v57  ;;  %v523_v63 = vcombine.low %v6028_v56, %v6029_v57  ;;  %v7627_v56 = vld [vmem:[%s9528_s3 + $0xa8] sm:$0xff] }
  0x44   :  { %460 = vmatmul.mubr.f32.vlgmr.msra.gmra.mrb[8].mxu0 %v379_v40  ;;  %598 = vmatmul.mubr.f32.vlgmr.msra.gmra.mrb[8].mxu1 %v517_v41  ;;  %9609 = vst [vmem:[#allocation7_spill] sm:$0xff] %v7627_v56 }
  0x45   :  { %464 = vmatprep.mubr.f32.mxu0 %v382_v42  ;;  %602 = vmatprep.mubr.f32.mxu1 %v520_v43 }
  0x46   :  { %6987 = vmatpush3.bf16.msra.mxu0 %v6986_v4  ;;  %6993 = vmatpush3.bf16.msra.mxu1 %v6992_v9 }
  0x47   :  { %6988 = vmatprep.subr.bf16.mxu0 %v9538_v6  ;;  %6994 = vmatprep.subr.bf16.mxu1 %v9538_v6 }
  0x48   :  { %465 = vmatmul.mubr.f32.gmra.mrb[10].mxu0 %v381_v50  ;;  %603 = vmatmul.mubr.f32.gmra.mrb[10].mxu1 %v519_v51 }
  0x49   :  { %469 = vmatprep.mubr.f32.mxu0 %v384_v54  ;;  %607 = vmatprep.mubr.f32.mxu1 %v522_v55  ;;  %v7622_v55 = vld [vmem:[%s9528_s3 + $0xa0] sm:$0xff] }
  0x4a   :  { %6990 = vmatpush3.bf16.msra.mxu0 %v6989_v15  ;;  %6996 = vmatpush3.bf16.msra.mxu1 %v6995_v3  ;;  %9608 = vst [vmem:[#allocation6_spill] sm:$0xff] %v7622_v55 }
  0x4b   :  { %6997 = vmatprep.subr.bf16.mxu0 %v9538_v6  ;;  %7003 = vmatprep.subr.bf16.mxu1 %v9538_v6 }
  0x4c   :  { %470 = vmatmul.mubr.f32.gmra.mrb[12].mxu0 %v383_v58  ;;  %608 = vmatmul.mubr.f32.gmra.mrb[12].mxu1 %v521_v59 }
  0x4d   :  { %474 = vmatprep.mubr.f32.mxu0 %v386_v60  ;;  %612 = vmatprep.mubr.f32.mxu1 %v524_v61 }
  0x50   :  { %475 = vmatmul.mubr.f32.gmra.mrb[14].mxu0 %v385_v62  ;;  %613 = vmatmul.mubr.f32.gmra.mrb[14].mxu1 %v523_v63 }
  0x51   :  { %6422 = vmatprep.mubr.msk.f32.mxu0 %vm7210_vm0, %v9540_v17  ;;  %6439 = vmatprep.mubr.msk.f32.mxu1 %vm7210_vm0, %v9540_v17 }
  0xf7   :  { %v6077_v23 = vpop.f32.mrb[0].mxu0  ;;  %v6121_v24 = vpop.f32.mrb[0].mxu1 }
  0xf8   :  { %v6078_v27 = vpop.f32.mrb[1].mxu0  ;;  %v6122_v8 = vpop.f32.mrb[1].mxu1 }
  0xf9   :  { %v6079_v28 = vadd.f32 %v6078_v27, %v6077_v23  ;;  %v6123_v30 = vadd.f32 %v6122_v8, %v6121_v24 }
  0xfb   :  { %v186_v33 = vadd.f32 %v6079_v28, %v7552_v26  ;;  %v324_v35 = vadd.f32 %v6123_v30, %v7552_v26  ;;  %v6080_v13 = vpop.f32.mrb[2].mxu0  ;;  %v6124_v14 = vpop.f32.mrb[2].mxu1 }
  0xfc   :  { %v6081_v32 = vpop.f32.mrb[3].mxu0  ;;  %v6125_v36 = vpop.f32.mrb[3].mxu1 }
  0xfd   :  { %v204_v40 = vmax.f32 %v186_v33, 0.0  ;;  %v342_v41 = vmax.f32 %v324_v35, 0.0  ;;  %v6082_v42 = vadd.f32 %v6081_v32, %v6080_v13  ;;  %v6126_v43 = vadd.f32 %v6125_v36, %v6124_v14 }
  0xff   :  { %v212_v49 = vcombine.high %v204_v40, %v204_v40  ;;  %v636_v50 = vrot.slane %v204_v40, %v7561_v34  ;;  %v350_v51 = vcombine.high %v342_v41, %v342_v41  ;;  %v778_v52 = vrot.slane %v342_v41, %v7561_v34  ;;  %v7615_v53 = vpop.f32.mrb[4].mxu0  ;;  %v7617_v54 = vpop.f32.mrb[4].mxu1 }
 0x100   :  { %v191_v57 = vadd.f32 %v6082_v42, %v7552_v26  ;;  %v7630_v58 = vpop.f32.mrb[5].mxu0  ;;  %v7632_v59 = vpop.f32.mrb[5].mxu1  ;;  %v329_v9 = vadd.f32 %v6126_v43, %v7552_v26  ;;  %v7671_v43 = vld [vmem:[%s9528_s3 + $0x90] sm:$0xff] }
 0x101   :  { %v637_v63 = vcombine.high %v636_v50, %v636_v50  ;;  %v644_v0 = vrot.slane %v636_v50, %v7561_v34  ;;  %v659_v1 = vrot.slane %v212_v49, %v7561_v34  ;;  %v779_v2 = vcombine.high %v778_v52, %v778_v52  ;;  %9610 = vst [vmem:[#allocation8_spill] sm:$0xff] %v7671_v43  ;;  %v7676_v49 = vld [vmem:[%s9528_s3 + $0x98] sm:$0xff] }
 0x102   :  { %v786_v4 = vrot.slane %v778_v52, %v7561_v34  ;;  %v801_v5 = vrot.slane %v350_v51, %v7561_v34  ;;  %v205_v42 = vmax.f32 %v191_v57, 0.0  ;;  %9611 = vst [vmem:[#allocation9_spill] sm:$0xff] %v7676_v49 }
 0x103   :  { %v651_v11 = vrot.slane %v637_v63, %v7561_v34  ;;  %v652_v12 = vcombine.high %v644_v0, %v644_v0  ;;  %v660_v15 = vcombine.high %v659_v1, %v659_v1  ;;  %v667_v16 = vrot.slane %v659_v1, %v7561_v34  ;;  %v7649_v3 = vpop.f32.mrb[6].mxu0  ;;  %v7651_v18 = vpop.f32.mrb[6].mxu1 }
 0x104   :  { %v793_v21 = vrot.slane %v779_v2, %v7561_v34  ;;  %v794_v22 = vcombine.high %v786_v4, %v786_v4  ;;  %v802_v23 = vcombine.high %v801_v5, %v801_v5  ;;  %v809_v24 = vrot.slane %v801_v5, %v7561_v34  ;;  %v7655_v25 = vpop.f32.mrb[7].mxu0  ;;  %v7657_v27 = vpop.f32.mrb[7].mxu1 }
 0x105   :  { %v7660_v8 = vrot.slane %v660_v15, %v7561_v34  ;;  %v1115_v28 = vcombine.low %v644_v0, %v651_v11  ;;  %v1116_v30 = vcombine.low %v652_v12, %v667_v16  ;;  %v1314_v33 = vcombine.high %v651_v11, %v651_v11 }
 0x106   :  { %v1325_v35 = vcombine.low %v651_v11, %v652_v12  ;;  %v7663_v13 = vrot.slane %v802_v23, %v7561_v34  ;;  %v915_v14 = vcombine.low %v786_v4, %v793_v21  ;;  %v916_v32 = vcombine.low %v794_v22, %v809_v24 }
 0x107   :  { %v1125_v36 = vrot.slane %v1115_v28, %v7561_v34  ;;  %v1132_v40 = vrot.slane %v1116_v30, %v7561_v34  ;;  %v1326_v41 = vcombine.low %v1314_v33, %v7660_v8  ;;  %v5769_v50 = vcombine.high %v667_v16, %v7660_v8 }
 0x108   :  { %v2907_v51 = vcombine.low %v667_v16, %v7660_v8  ;;  %v925_v52 = vrot.slane %v915_v14, %v7561_v34  ;;  %v932_v63 = vrot.slane %v916_v32, %v7561_v34  ;;  %v1335_v57 = vrot.slane %v1325_v35, %v7561_v34 }
 0x109   :  { %v1147_v0 = vcombine.low %v1125_v36, %v1132_v40  ;;  %v1342_v1 = vrot.slane %v1326_v41, %v7561_v34  ;;  %v1527_v2 = vcombine.high %v793_v21, %v793_v21  ;;  %v1538_v5 = vcombine.low %v793_v21, %v794_v22 }
 0x10a   :  { %v947_v4 = vcombine.low %v925_v52, %v932_v63  ;;  %v5779_v11 = vcombine.high %v809_v24, %v7663_v13  ;;  %v3144_v28 = vcombine.low %v809_v24, %v7663_v13  ;;  %v343_v30 = vmax.f32 %v329_v9, 0.0 }
 0x10b   :  { %v7687_v15 = vcombine.low %v1335_v57, %v1342_v1  ;;  %v1539_v23 = vcombine.low %v1527_v2, %v7663_v13  ;;  %v7692_v33 = vrot.slane %v5769_v50, %v7561_v34  ;;  %v7695_v35 = vrot.slane %v2907_v51, %v7561_v34 }
 0x10c   :  { %v1548_v21 = vrot.slane %v1538_v5, %v7561_v34  ;;  %v213_v22 = vcombine.high %v205_v42, %v205_v42  ;;  %v7699_v14 = vrot.slane %v1147_v0, %v7561_v34  ;;  %v7702_v32 = vrot.slane %v947_v4, %v7561_v34 }
 0x10d   :  { %9612 = vst [vmem:[#allocation10_spill] sm:$0xff] %v7695_v35  ;;  %v1555_v36 = vrot.slane %v1539_v23, %v7561_v34  ;;  %v675_v40 = vcombine.high %v667_v16, %v667_v16  ;;  %v7708_v41 = vrot.slane %v5779_v11, %v7561_v34  ;;  %v682_v50 = vrot.slane %v205_v42, %v7561_v34 }
 0x10e   :  { %v2862_v51 = vrot.slane %v213_v22, %v7561_v34  ;;  %v7715_v63 = vrot.slane %v3144_v28, %v7561_v34  ;;  %v351_v0 = vcombine.high %v343_v30, %v343_v30  ;;  %v824_v57 = vrot.slane %v343_v30, %v7561_v34 }
 0x10f   :  { %v7712_v52 = vcombine.low %v1548_v21, %v1555_v36  ;;  %v683_v1 = vcombine.high %v682_v50, %v682_v50  ;;  %v690_v16 = vrot.slane %v682_v50, %v7561_v34  ;;  %v1117_v5 = vcombine.low %v7660_v8, %v675_v40 }
 0x110   :  { %9613 = vst [vmem:[#allocation11_spill] sm:$0xff] %v7715_v63  ;;  %v2863_v2 = vcombine.high %v2862_v51, %v2862_v51  ;;  %v2870_v4 = vrot.slane %v2862_v51, %v7561_v34  ;;  %v1315_v42 = vcombine.high %v7660_v8, %v7660_v8  ;;  %v817_v11 = vcombine.high %v809_v24, %v809_v24 }
 0x111   :  { %v825_v23 = vcombine.high %v824_v57, %v824_v57  ;;  %v7724_v21 = vrot.slane %v683_v1, %v7561_v34  ;;  %v2908_v22 = vcombine.low %v675_v40, %v690_v16  ;;  %v832_v36 = vrot.slane %v824_v57, %v7561_v34 }
 0x112   :  { %v7727_v28 = vrot.slane %v2863_v2, %v7561_v34  ;;  %v7729_v30 = vcombine.high %v2870_v4, %v2870_v4  ;;  %v917_v51 = vcombine.low %v7663_v13, %v817_v11  ;;  %v3099_v8 = vrot.slane %v351_v0, %v7561_v34 }
 0x113   :  { %v7733_v50 = vrot.slane %v825_v23, %v7561_v34  ;;  %v1118_v1 = vcombine.low %v690_v16, %v7724_v21  ;;  %v7741_v2 = vrot.slane %v2908_v22, %v7561_v34  ;;  %v1528_v40 = vcombine.high %v7663_v13, %v7663_v13 }
 0x114   :  { %9614 = vst [vmem:[#allocation12_spill] sm:$0xff] %v7727_v28  ;;  %9615 = vst [vmem:[#allocation13_spill] sm:$0xff] %v7729_v30  ;;  %v7746_v57 = vcombine.low %v1315_v42, %v7724_v21  ;;  %v5837_v23 = vcombine.high %v690_v16, %v7724_v21  ;;  %v3339_v12 = vcombine.low %v7727_v28, %v7729_v30 }
 0x115   :  { %9616 = vst [vmem:[#allocation14_spill] sm:$0xff] %v7741_v2  ;;  %v918_v0 = vcombine.low %v832_v36, %v7733_v50  ;;  %v7753_v10 = vrot.slane %v1118_v1, %v7561_v34  ;;  %v2909_v62 = vcombine.low %v2870_v4, %v7727_v28  ;;  %v7759_v13 = vrot.slane %v917_v51, %v7561_v34 }
 0x116   :  { %9617 = vst [vmem:[#allocation15_spill] sm:$0xff] %v7746_v57  ;;  %v7762_v42 = vrot.slane %v5837_v23, %v7561_v34  ;;  %v7765_v24 = vrot.slane %v3339_v12, %v7561_v34  ;;  %v3100_v61 = vcombine.high %v3099_v8, %v3099_v8  ;;  %v7775_v4 = vrot.slane %v1117_v5, %v7561_v34 }
 0x117   :  { %9618 = vst [vmem:[#allocation16_spill] sm:$0xff] %v7759_v13  ;;  %v7768_v9 = vrot.slane %v918_v0, %v7561_v34  ;;  %v7770_v1 = vpop.f32.mrb[8].mxu0  ;;  %v7772_v60 = vpop.f32.mrb[8].mxu1  ;;  %v3107_v51 = vrot.slane %v3099_v8, %v7561_v34  ;;  %v3145_v22 = vcombine.low %v817_v11, %v832_v36  ;;  %v7779_v23 = vcombine.low %v1528_v40, %v7733_v50 }
 0x118   :  { %9619 = vst [vmem:[#allocation17_spill] sm:$0xff] %v7775_v4  ;;  %v7781_v6 = vpop.f32.mrb[9].mxu0  ;;  %v7783_v12 = vpop.f32.mrb[9].mxu1  ;;  %v7790_v47 = vrot.slane %v3100_v61, %v7561_v34  ;;  %v5847_v5 = vcombine.high %v832_v36, %v7733_v50  ;;  %v6085_v40 = vadd.f32 %v7630_v58, %v7615_v53  ;;  %v7800_v17 = vcombine.high %v690_v16, %v690_v16 }
 0x119   :  { %9620 = vst [vmem:[#allocation18_spill] sm:$0xff] %v7779_v23  ;;  %v7793_v8 = vcombine.high %v3107_v51, %v3107_v51  ;;  %v7796_v11 = vrot.slane %v3145_v22, %v7561_v34  ;;  %v7805_v48 = vrot.slane %v2909_v62, %v7561_v34  ;;  %v6129_v53 = vadd.f32 %v7632_v59, %v7617_v54 }
 0x11a   :  { %9621 = vst [vmem:[#allocation19_spill] sm:$0xff] %v7790_v47  ;;  %v3146_v7 = vcombine.low %v3107_v51, %v7790_v47  ;;  %v3546_v16 = vrot.slane %v5847_v5, %v7561_v34  ;;  %v196_v62 = vadd.f32 %v6085_v40, %v7552_v26  ;;  %v1316_v51 = vcombine.high %v7724_v21, %v7724_v21 }
 0x11b   :  { %9622 = vst [vmem:[#allocation20_spill] sm:$0xff] %v7793_v8  ;;  %9623 = vst [vmem:[#allocation21_spill] sm:$0xff] %v7796_v11  ;;  %v7810_v28 = vpop.f32.mrb[10].mxu0  ;;  %v7812_v22 = vpop.f32.mrb[10].mxu1  ;;  %v3532_v58 = vcombine.low %v7790_v47, %v7793_v8  ;;  %v1328_v61 = vcombine.low %v7724_v21, %v7800_v17  ;;  %v7830_v57 = vcombine.high %v832_v36, %v832_v36 }
 0x11c   :  { %9624 = vst [vmem:[#allocation22_spill] sm:$0xff] %v7805_v48  ;;  %v7820_v0 = vpop.f32.mrb[11].mxu0  ;;  %v7822_v23 = vpop.f32.mrb[11].mxu1  ;;  %v7833_v8 = vrot.slane %v3146_v7, %v7561_v34  ;;  %v206_v40 = vmax.f32 %v196_v62, 0.0  ;;  %v6088_v30 = vadd.f32 %v7655_v25, %v7649_v3  ;;  %v334_v63 = vadd.f32 %v6129_v53, %v7552_v26 }
 0x11d   :  { %v3553_v5 = vrot.slane %v3532_v58, %v7561_v34  ;;  %v7839_v11 = vrot.slane %v1328_v61, %v7561_v34  ;;  %v1541_v21 = vcombine.low %v7733_v50, %v7830_v57  ;;  %v6132_v54 = vadd.f32 %v7657_v27, %v7651_v18 }
 0x11e   :  { %9625 = vst [vmem:[#allocation23_spill] sm:$0xff] %v7833_v8  ;;  %v214_v58 = vcombine.high %v206_v40, %v206_v40  ;;  %v705_v62 = vrot.slane %v206_v40, %v7561_v34  ;;  %v1529_v3 = vcombine.high %v7733_v50, %v7733_v50  ;;  %v344_v27 = vmax.f32 %v334_v63, 0.0 }
 0x11f   :  { %v7846_v59 = vpop.f32.mrb[12].mxu0  ;;  %v7848_v7 = vpop.f32.mrb[12].mxu1  ;;  %v3555_v36 = vcombine.low %v3546_v16, %v3553_v5  ;;  %v7862_v2 = vrot.slane %v1541_v21, %v7561_v34  ;;  %v201_v40 = vadd.f32 %v6088_v30, %v7552_v26  ;;  %v9629_v55 = vcombine.low %v7762_v42, %v7765_v24 }
 0x120   :  { %v7853_v25 = vpop.f32.mrb[13].mxu0  ;;  %v7855_v61 = vpop.f32.mrb[13].mxu1  ;;  %v706_v16 = vcombine.high %v705_v62, %v705_v62  ;;  %v7865_v5 = vrot.slane %v705_v62, %v7561_v34  ;;  %v728_v50 = vrot.slane %v214_v58, %v7561_v34  ;;  %v352_v35 = vcombine.high %v344_v27, %v344_v27 }
 0x121   :  { %v847_v43 = vrot.slane %v344_v27, %v7561_v34  ;;  %v7905_v45 = vrot.slane %v3555_v36, %v7561_v34  ;;  %v207_v36 = vmax.f32 %v201_v40, 0.0  ;;  %v6167_v47 = vadd.f32 %v7781_v6, %v7770_v1 }
 0x122   :  { %v7879_v62 = vrot.slane %v706_v16, %v7561_v34  ;;  %v721_v58 = vcombine.high %v7865_v5, %v7865_v5  ;;  %v729_v30 = vcombine.high %v728_v50, %v728_v50  ;;  %v7884_v48 = vrot.slane %v728_v50, %v7561_v34 }
 0x123   :  { %v7874_v18 = vpop.f32.mrb[14].mxu0  ;;  %v7876_v21 = vpop.f32.mrb[14].mxu1  ;;  %v848_v8 = vcombine.high %v847_v43, %v847_v43  ;;  %v7893_v49 = vrot.slane %v847_v43, %v7561_v34  ;;  %v870_v16 = vrot.slane %v352_v35, %v7561_v34  ;;  %v7900_v50 = vrot.slane %v9629_v55, %v7561_v34  ;;  %9631 = vst [vmem:[#allocation28_spill] sm:$0xff] %v7905_v45 }
 0x124   :  { %9626 = vst [vmem:[#allocation24_spill] sm:$0xff] %v7879_v62  ;;  %9627 = vst [vmem:[#allocation25_spill] sm:$0xff] %v7884_v48  ;;  %v7886_v27 = vpop.f32.mrb[15].mxu0  ;;  %v7888_v53 = vpop.f32.mrb[15].mxu1  ;;  %v7908_v63 = vcombine.low %v1316_v51, %v7879_v62  ;;  %v7911_v43 = vrot.slane %v729_v30, %v7561_v34  ;;  %v7914_v35 = vcombine.low %v7879_v62, %v721_v58 }
 0x125   :  { %9628 = vst [vmem:[#allocation26_spill] sm:$0xff] %v7893_v49  ;;  %9630 = vst [vmem:[#allocation27_spill] sm:$0xff] %v7900_v50  ;;  %v7917_v46 = vrot.slane %v848_v8, %v7561_v34  ;;  %v871_v55 = vcombine.high %v870_v16, %v870_v16  ;;  %v339_v51 = vadd.f32 %v6132_v54, %v7552_v26 }
 0x126   :  { %9632 = vst [vmem:[#allocation29_spill] sm:$0xff] %v7911_v43  ;;  %v863_v30 = vcombine.high %v7893_v49, %v7893_v49  ;;  %v7927_v56 = vrot.slane %v870_v16, %v7561_v34  ;;  %v7934_v8 = vcombine.high %v7884_v48, %v7884_v48  ;;  %v215_v42 = vcombine.high %v207_v36, %v207_v36 }
 0x127   :  { %9633 = vst [vmem:[#allocation30_spill] sm:$0xff] %v7917_v46  ;;  %v7930_v58 = vcombine.low %v1529_v3, %v7917_v46  ;;  %v7937_v24 = vrot.slane %v871_v55, %v7561_v34  ;;  %v751_v40 = vrot.slane %v207_v36, %v7561_v34  ;;  %v345_v54 = vmax.f32 %v339_v51, 0.0 }
 0x128   :  { %9634 = vst [vmem:[#allocation31_spill] sm:$0xff] %v7927_v56  ;;  %v9637_v45 = vcombine.low %v7759_v13, %v7768_v9  ;;  %v9638_v3 = vcombine.low %v7775_v4, %v7753_v10  ;;  %v6211_v55 = vadd.f32 %v7783_v12, %v7772_v60  ;;  %v2885_v51 = vrot.slane %v215_v42, %v7561_v34 }
 0x129   :  { %9635 = vst [vmem:[#allocation32_spill] sm:$0xff] %v7930_v58  ;;  %9636 = vst [vmem:[#allocation33_spill] sm:$0xff] %v7937_v24  ;;  %v752_v58 = vcombine.high %v751_v40, %v751_v40  ;;  %v7953_v36 = vrot.slane %v751_v40, %v7561_v34  ;;  %v353_v62 = vcombine.high %v345_v54, %v345_v54  ;;  %v9649_v4 = vmov 0.0|0.0  }
 0x12a   :  { %v962_v16 = vrot.slane %v9637_v45, %v7561_v34  ;;  %v1162_v50 = vrot.slane %v9638_v3, %v7561_v34  ;;  %v893_v45 = vrot.slane %v345_v54, %v7561_v34  ;;  %v462_v3 = vadd.f32 %v6167_v47, %v7552_v26 }
 0x12b   :  { %v7961_v6 = vrot.slane %v752_v58, %v7561_v34  ;;  %v7965_v60 = vcombine.high %v7953_v36, %v7953_v36  ;;  %v2886_v1 = vcombine.high %v2885_v51, %v2885_v51  ;;  %v7969_v12 = vcombine.high %v7927_v56, %v7927_v56 }
 0x12c   :  { %v963_v9 = vcombine.low %v7702_v32, %v962_v16  ;;  %v1163_v10 = vcombine.low %v7699_v14, %v1162_v50  ;;  %v7972_v42 = vrot.slane %v2885_v51, %v7561_v34  ;;  %v894_v32 = vcombine.high %v893_v45, %v893_v45 }
 0x12d   :  { %9639 = vst [vmem:[#allocation34_spill] sm:$0xff] %v7965_v60  ;;  %9640 = vst [vmem:[#allocation35_spill] sm:$0xff] %v7969_v12  ;;  %v7975_v14 = vrot.slane %v893_v45, %v7561_v34  ;;  %v7978_v47 = vrot.slane %v353_v62, %v7561_v34  ;;  %v7982_v50 = vcombine.low %v7917_v46, %v863_v30  ;;  %v480_v40 = vmax.f32 %v462_v3, 0.0 }
 0x12e   :  { %9641 = vst [vmem:[#allocation36_spill] sm:$0xff] %v7972_v42  ;;  %6423 = vmatmul.mubr.msk.f32.vlgmr.msra.gmra.mrb[16].mxu0 %vm1028_vm1, %v963_v9  ;;  %6440 = vmatmul.mubr.msk.f32.vlgmr.msra.gmra.mrb[16].mxu1 %vm1028_vm1, %v1163_v10  ;;  %v600_v54 = vadd.f32 %v6211_v55, %v7552_v26  ;;  %v9643_v16 = vmov 0.0   ;;  %v7993_v51 = vrot.slane %v2886_v1, %v7561_v34 }
 0x12f   :  { %9642 = vst [vmem:[#allocation37_spill] sm:$0xff] %v7975_v14  ;;  %6425 = vmatprep.mubr.msk.f32.mxu0 %vm7210_vm0, %v9643_v16  ;;  %v7996_v30 = vrot.slane %v894_v32, %v7561_v34  ;;  %v8000_v45 = vcombine.high %v7975_v14, %v7975_v14  ;;  %6442 = vmatprep.mubr.msk.f32.mxu1 %vm7210_vm0, %v9643_v16 }
 0x130   :  { %9644 = vst [vmem:[#allocation38_spill] sm:$0xff] %v7993_v51  ;;  %v8008_v9 = vrot.slane %v7978_v47, %v7561_v34  ;;  %v488_v10 = vcombine.high %v480_v40, %v480_v40  ;;  %v1746_v3 = vrot.slane %v480_v40, %v7561_v34  ;;  %v9647_v1 = vpack.c.bf16 %v7567_v19, %v7557_v31 }
 0x131   :  { %9645 = vst [vmem:[#allocation39_spill] sm:$0xff] %v8000_v45  ;;  %v967_v58 = vcombine.low %v7969_v12, %v7975_v14  ;;  %v3123_v55 = vcombine.high %v7978_v47, %v7978_v47  ;;  %v618_v62 = vmax.f32 %v600_v54, 0.0  ;;  %v9648_v13 = vpack.c.bf16 %v7577_v29, %v7572_v20 }
 0x132   :  { %9646 = vst [vmem:[#allocation40_spill] sm:$0xff] %v8008_v9  ;;  %6999 = vmatpush3.bf16.msra.mxu0 %v9647_v1  ;;  %v1747_v40 = vcombine.high %v1746_v3, %v1746_v3  ;;  %v1754_v1 = vrot.slane %v1746_v3, %v7561_v34  ;;  %v1769_v47 = vrot.slane %v488_v10, %v7561_v34 }
 0x133   :  { %7005 = vmatpush3.bf16.msra.mxu1 %v9648_v13  ;;  %7000 = vmatprep.subr.bf16.mxu0 %v9649_v4  ;;  %v626_v54 = vcombine.high %v618_v62, %v618_v62  ;;  %v2091_v32 = vrot.slane %v618_v62, %v7561_v34  ;;  %v966_v20 = vcombine.low %v7927_v56, %v7937_v24 }
 0x134   :  { %7006 = vmatprep.subr.bf16.mxu1 %v9649_v4  ;;  %v1761_v29 = vrot.slane %v1747_v40, %v7561_v34  ;;  %v1762_v13 = vcombine.high %v1754_v1, %v1754_v1  ;;  %v9650_v19 = vcombine.low %v7830_v57, %v7893_v49  ;;  %v981_v3 = vrot.slane %v7982_v50, %v7561_v34 }
 0x135   :  { %v9651_v10 = vpack.c.bf16 %v7587_v38, %v7582_v37  ;;  %v1770_v51 = vcombine.high %v1769_v47, %v1769_v47  ;;  %v1777_v62 = vrot.slane %v1769_v47, %v7561_v34  ;;  %v2092_v9 = vcombine.high %v2091_v32, %v2091_v32 }
 0x136   :  { %v974_v31 = vrot.slane %v9650_v19, %v7561_v34  ;;  %v2099_v56 = vrot.slane %v2091_v32, %v7561_v34  ;;  %v9652_v40 = vpack.c.bf16 %v7597_v44, %v7592_v39  ;;  %v1883_v42 = vcombine.low %v1754_v1, %v1761_v29 }
 0x137   :  { %7002 = vmatpush3.bf16.msra.mxu0 %v9651_v10  ;;  %v2430_v57 = vcombine.high %v1761_v29, %v1761_v29  ;;  %v2441_v19 = vcombine.low %v1761_v29, %v1762_v13  ;;  %v2114_v14 = vrot.slane %v626_v54, %v7561_v34  ;;  %v8052_v37 = vrot.slane %v1770_v51, %v7561_v34 }
 0x138   :  { %7008 = vmatpush3.bf16.msra.mxu1 %v9652_v40  ;;  %7009 = vmatprep.subr.bf16.mxu0 %v9649_v4  ;;  %v1884_v38 = vcombine.low %v1762_v13, %v1777_v62  ;;  %v2106_v50 = vrot.slane %v2092_v9, %v7561_v34  ;;  %v2107_v47 = vcombine.high %v2099_v56, %v2099_v56 }
 0x139   :  { %7015 = vmatprep.subr.bf16.mxu1 %v9649_v4  ;;  %v1893_v32 = vrot.slane %v1883_v42, %v7561_v34  ;;  %v2115_v39 = vcombine.high %v2114_v14, %v2114_v14  ;;  %v2122_v44 = vrot.slane %v2114_v14, %v7561_v34  ;;  %v988_v1 = vrot.slane %v966_v20, %v7561_v34 }
 0x13a   :  { %v1900_v54 = vrot.slane %v1884_v38, %v7561_v34  ;;  %v2442_v29 = vcombine.low %v2430_v57, %v8052_v37  ;;  %v5803_v51 = vcombine.high %v1777_v62, %v8052_v37  ;;  %v3767_v13 = vcombine.low %v1777_v62, %v8052_v37 }
 0x13b   :  { %v8064_v9 = vrot.slane %v2115_v39, %v7561_v34  ;;  %v2228_v10 = vcombine.low %v2099_v56, %v2106_v50  ;;  %v2229_v40 = vcombine.low %v2107_v47, %v2122_v44  ;;  %v2643_v46 = vcombine.high %v2106_v50, %v2106_v50 }
 0x13c   :  { %v1915_v42 = vcombine.low %v1893_v32, %v1900_v54  ;;  %v2451_v49 = vrot.slane %v2441_v19, %v7561_v34  ;;  %v2458_v14 = vrot.slane %v2442_v29, %v7561_v34  ;;  %v995_v20 = vrot.slane %v967_v58, %v7561_v34 }
 0x13d   :  { %v2238_v38 = vrot.slane %v2228_v10, %v7561_v34  ;;  %v2245_v57 = vrot.slane %v2229_v40, %v7561_v34  ;;  %v2654_v12 = vcombine.low %v2106_v50, %v2107_v47  ;;  %v2655_v24 = vcombine.low %v2643_v46, %v8064_v9 }
 0x13e   :  { %v8073_v39 = vrot.slane %v3123_v55, %v7561_v34  ;;  %v8076_v56 = vrot.slane %v5803_v51, %v7561_v34  ;;  %v8078_v32 = vcombine.low %v2451_v49, %v2458_v14  ;;  %v5813_v19 = vcombine.high %v2122_v44, %v8064_v9 }
 0x13f   :  { %v8082_v54 = vrot.slane %v1915_v42, %v7561_v34  ;;  %v8085_v58 = vrot.slane %v3767_v13, %v7561_v34  ;;  %v4004_v50 = vcombine.low %v2122_v44, %v8064_v9  ;;  %v996_v47 = vcombine.low %v974_v31, %v981_v3 }
 0x140   :  { %9653 = vst [vmem:[#allocation41_spill] sm:$0xff] %v8073_v39  ;;  %v2260_v46 = vcombine.low %v2238_v38, %v2245_v57  ;;  %v2664_v55 = vrot.slane %v2654_v12, %v7561_v34  ;;  %v2671_v29 = vrot.slane %v2655_v24, %v7561_v34  ;;  %v997_v51 = vcombine.low %v988_v1, %v995_v20 }
 0x141   :  { %9654 = vst [vmem:[#allocation42_spill] sm:$0xff] %v8085_v58  ;;  %v8093_v10 = vrot.slane %v5813_v19, %v7561_v34  ;;  %v1004_v40 = vrot.slane %v996_v47, %v7561_v34  ;;  %v1166_v13 = vcombine.low %v7884_v48, %v7911_v43  ;;  %v9655_v12 = vcombine.low %v7800_v17, %v7865_v5 }
 0x142   :  { %v1011_v42 = vrot.slane %v997_v51, %v7561_v34  ;;  %v1181_v24 = vrot.slane %v7914_v35, %v7561_v34  ;;  %v9656_v3 = vcombine.low %v7934_v8, %v7953_v36  ;;  %v8110_v14 = vrot.slane %v4004_v50, %v7561_v34 }
 0x143   :  { %v1174_v31 = vrot.slane %v9655_v12, %v7561_v34  ;;  %v1188_v20 = vrot.slane %v1166_v13, %v7561_v34  ;;  %v6170_v38 = vadd.f32 %v7820_v0, %v7810_v28  ;;  %v1785_v57 = vcombine.high %v1777_v62, %v1777_v62 }
 0x144   :  { %v1195_v1 = vrot.slane %v9656_v3, %v7561_v34  ;;  %9657 = vst [vmem:[#allocation43_spill] sm:$0xff] %v8110_v14  ;;  %v8116_v17 = vrot.slane %v2260_v46, %v7561_v34  ;;  %v1012_v19 = vcombine.low %v1004_v40, %v1011_v42  ;;  %v6214_v35 = vadd.f32 %v7822_v23, %v7812_v22 }
 0x145   :  { %v1196_v47 = vcombine.low %v1174_v31, %v1181_v24  ;;  %v467_v12 = vadd.f32 %v6170_v38, %v7552_v26  ;;  %v1885_v50 = vcombine.low %v8052_v37, %v1785_v57  ;;  %v2130_v3 = vcombine.high %v2122_v44, %v2122_v44 }
 0x146   :  { %v1197_v51 = vcombine.low %v1188_v20, %v1195_v1  ;;  %v8122_v49 = vcombine.low %v2664_v55, %v2671_v29  ;;  %6426 = vmatmul.mubr.msk.f32.gmra.mrb[18].mxu0 %vm1028_vm1, %v1012_v19  ;;  %v605_v0 = vadd.f32 %v6214_v35, %v7552_v26  ;;  %v1013_v62 = vcombine.low %v7996_v30, %v8000_v45 }
 0x147   :  { %v1204_v28 = vrot.slane %v1196_v47, %v7561_v34  ;;  %v481_v23 = vmax.f32 %v467_v12, 0.0  ;;  %v2431_v22 = vcombine.high %v8052_v37, %v8052_v37  ;;  %v2230_v40 = vcombine.low %v8064_v9, %v2130_v3  ;;  %6428 = vmatprep.mubr.msk.f32.mxu0 %vm7210_vm0, %v9643_v16 }
 0x148   :  { %v1211_v46 = vrot.slane %v1197_v51, %v7561_v34  ;;  %v619_v44 = vmax.f32 %v605_v0, 0.0  ;;  %v2644_v55 = vcombine.high %v8064_v9, %v8064_v9  ;;  %v8138_v29 = vrot.slane %v1013_v62, %v7561_v34 }
 0x149   :  { %v6173_v13 = vadd.f32 %v7853_v25, %v7846_v59  ;;  %v489_v31 = vcombine.high %v481_v23, %v481_v23  ;;  %v1792_v24 = vrot.slane %v481_v23, %v7561_v34  ;;  %v8144_v37 = vrot.slane %v1885_v50, %v7561_v34 }
 0x14a   :  { %9658 = vst [vmem:[#allocation44_spill] sm:$0xff] %v8138_v29  ;;  %v1212_v42 = vcombine.low %v1204_v28, %v1211_v46  ;;  %v627_v1 = vcombine.high %v619_v44, %v619_v44  ;;  %v2137_v20 = vrot.slane %v619_v44, %v7561_v34  ;;  %v1027_v38 = vrot.slane %v8138_v29, %v7561_v34 }
 0x14b   :  { %v1213_v9 = vcombine.low %v7961_v6, %v7965_v60  ;;  %v1793_v19 = vcombine.high %v1792_v24, %v1792_v24  ;;  %v1800_v59 = vrot.slane %v1792_v24, %v7561_v34  ;;  %v3722_v25 = vrot.slane %v489_v31, %v7561_v34 }
 0x14c   :  { %6443 = vmatmul.mubr.msk.f32.gmra.mrb[18].mxu1 %vm1028_vm1, %v1212_v42  ;;  %v8155_v47 = vrot.slane %v2230_v40, %v7561_v34  ;;  %v2138_v35 = vcombine.high %v2137_v20, %v2137_v20  ;;  %v2145_v51 = vrot.slane %v2137_v20, %v7561_v34  ;;  %v3959_v12 = vrot.slane %v627_v1, %v7561_v34 }
 0x14d   :  { %6445 = vmatprep.mubr.msk.f32.mxu1 %vm7210_vm0, %v9643_v16  ;;  %6429 = vmatmul.mubr.msk.f32.gmra.mrb[20].mxu0 %vm1028_vm1, %v1027_v38  ;;  %v8163_v50 = vrot.slane %v1793_v19, %v7561_v34  ;;  %v3723_v28 = vcombine.high %v3722_v25, %v3722_v25  ;;  %v3730_v0 = vrot.slane %v3722_v25, %v7561_v34 }
 0x14e   :  { %v3768_v62 = vcombine.low %v1785_v57, %v1800_v59  ;;  %6456 = vmatprep.mubr.msk.f32.mxu0 %vm7210_vm0, %v9643_v16  ;;  %v8169_v46 = vrot.slane %v2138_v35, %v7561_v34  ;;  %v3960_v23 = vcombine.high %v3959_v12, %v3959_v12  ;;  %v3967_v40 = vrot.slane %v3959_v12, %v7561_v34 }
 0x14f   :  { %v4005_v44 = vcombine.low %v2130_v3, %v2145_v51  ;;  %v1886_v42 = vcombine.low %v1800_v59, %v8163_v50  ;;  %v8174_v31 = vrot.slane %v3723_v28, %v7561_v34  ;;  %v8176_v24 = vcombine.high %v3730_v0, %v3730_v0 }
 0x150   :  { %v8179_v1 = vrot.slane %v3768_v62, %v7561_v34  ;;  %v8182_v57 = vcombine.low %v2431_v22, %v8163_v50  ;;  %v5871_v20 = vcombine.high %v1800_v59, %v8163_v50  ;;  %v2231_v38 = vcombine.low %v2145_v51, %v8169_v46 }
 0x151   :  { %9659 = vst [vmem:[#allocation45_spill] sm:$0xff] %v8174_v31  ;;  %9660 = vst [vmem:[#allocation46_spill] sm:$0xff] %v8176_v24  ;;  %v8187_v19 = vrot.slane %v1213_v9, %v7561_v34  ;;  %v8190_v3 = vrot.slane %v1886_v42, %v7561_v34  ;;  %v8195_v35 = vrot.slane %v3960_v23, %v7561_v34 }
 0x152   :  { %9661 = vst [vmem:[#allocation47_spill] sm:$0xff] %v8179_v1  ;;  %9662 = vst [vmem:[#allocation48_spill] sm:$0xff] %v8182_v57  ;;  %v472_v12 = vadd.f32 %v6173_v13, %v7552_v26  ;;  %v3769_v22 = vcombine.low %v3730_v0, %v8174_v31  ;;  %v4199_v28 = vcombine.low %v8174_v31, %v8176_v24 }
 0x153   :  { %9663 = vst [vmem:[#allocation49_spill] sm:$0xff] %v8187_v19  ;;  %9664 = vst [vmem:[#allocation50_spill] sm:$0xff] %v8195_v35  ;;  %v8202_v62 = vrot.slane %v2231_v38, %v7561_v34  ;;  %v8204_v9 = vcombine.high %v3967_v40, %v3967_v40  ;;  %v8213_v13 = vrot.slane %v4005_v44, %v7561_v34 }
 0x154   :  { %v4213_v0 = vrot.slane %v5871_v20, %v7561_v34  ;;  %v4220_v57 = vrot.slane %v4199_v28, %v7561_v34  ;;  %v8220_v24 = vcombine.low %v2644_v55, %v8169_v46  ;;  %v4006_v42 = vcombine.low %v3967_v40, %v8195_v35 }
 0x155   :  { %9665 = vst [vmem:[#allocation51_spill] sm:$0xff] %v8204_v9  ;;  %9666 = vst [vmem:[#allocation52_spill] sm:$0xff] %v8213_v13  ;;  %v5881_v23 = vcombine.high %v2145_v51, %v8169_v46  ;;  %v4392_v44 = vcombine.low %v8195_v35, %v8204_v9  ;;  %v8229_v20 = vrot.slane %v3769_v22, %v7561_v34  ;;  %v482_v38 = vmax.f32 %v472_v12, 0.0 }
 0x156   :  { %9667 = vst [vmem:[#allocation53_spill] sm:$0xff] %v8220_v24  ;;  %v1227_v28 = vrot.slane %v8187_v19, %v7561_v34  ;;  %v8233_v31 = vcombine.high %v1800_v59, %v1800_v59  ;;  %v6217_v24 = vadd.f32 %v7855_v61, %v7848_v7  ;;  %v4222_v9 = vcombine.low %v4213_v0, %v4220_v57 }
 0x157   :  { %9668 = vst [vmem:[#allocation54_spill] sm:$0xff] %v8229_v20  ;;  %v4406_v40 = vrot.slane %v5881_v23, %v7561_v34  ;;  %v4413_v25 = vrot.slane %v4392_v44, %v7561_v34  ;;  %v490_v22 = vcombine.high %v482_v38, %v482_v38  ;;  %v1815_v13 = vrot.slane %v482_v38, %v7561_v34  ;;  %v9685_v20 = vld [vmem:[#allocation33_spill] sm:$0xff] }
 0x158   :  { %6446 = vmatmul.mubr.msk.f32.gmra.mrb[20].mxu1 %vm1028_vm1, %v1227_v28  ;;  %v2444_v59 = vcombine.low %v8163_v50, %v8233_v31  ;;  %v8246_v12 = vrot.slane %v4006_v42, %v7561_v34  ;;  %v610_v23 = vadd.f32 %v6217_v24, %v7552_v26  ;;  %v8249_v35 = vcombine.high %v2145_v51, %v2145_v51 }
 0x159   :  { %v4415_v55 = vcombine.low %v4406_v40, %v4413_v25  ;;  %6473 = vmatprep.mubr.msk.f32.mxu1 %vm7210_vm0, %v9643_v16  ;;  %v1816_v7 = vcombine.high %v1815_v13, %v1815_v13  ;;  %v8254_v61 = vrot.slane %v1815_v13, %v7561_v34  ;;  %v1838_v57 = vrot.slane %v490_v22, %v7561_v34 }
 0x15a   :  { %9669 = vst [vmem:[#allocation55_spill] sm:$0xff] %v8246_v12  ;;  %v8258_v0 = vrot.slane %v2444_v59, %v7561_v34  ;;  %v2432_v42 = vcombine.high %v8163_v50, %v8163_v50  ;;  %v620_v25 = vmax.f32 %v610_v23, 0.0  ;;  %v2657_v51 = vcombine.low %v8169_v46, %v8249_v35 }
 0x15b   :  { %v9670_v24 = vcombine.low %v7692_v33, %v7839_v11  ;;  %v8269_v13 = vrot.slane %v4222_v9, %v7561_v34  ;;  %v8272_v44 = vrot.slane %v1816_v7, %v7561_v34  ;;  %v1839_v28 = vcombine.high %v1838_v57, %v1838_v57 }
 0x15c   :  { %v2645_v40 = vcombine.high %v8169_v46, %v8169_v46  ;;  %v1831_v50 = vcombine.high %v8254_v61, %v8254_v61  ;;  %v628_v59 = vcombine.high %v620_v25, %v620_v25  ;;  %v8283_v9 = vrot.slane %v4415_v55, %v7561_v34 }
 0x15d   :  { %v1372_v38 = vrot.slane %v9670_v24, %v7561_v34  ;;  %9671 = vst [vmem:[#allocation56_spill] sm:$0xff] %v8269_v13  ;;  %v8286_v23 = vrot.slane %v1838_v57, %v7561_v34  ;;  %v8289_v7 = vcombine.low %v2432_v42, %v8272_v44  ;;  %v2160_v24 = vrot.slane %v620_v25, %v7561_v34 }
 0x15e   :  { %9672 = vst [vmem:[#allocation57_spill] sm:$0xff] %v8283_v9  ;;  %v2183_v22 = vrot.slane %v628_v59, %v7561_v34  ;;  %v8296_v13 = vrot.slane %v2657_v51, %v7561_v34  ;;  %v9673_v55 = vrot.slane %v7687_v15, %v7561_v34  ;;  %v8302_v57 = vrot.slane %v1839_v28, %v7561_v34 }
 0x15f   :  { %v9674_v42 = vcombine.low %v7708_v41, %v7862_v2  ;;  %v6176_v25 = vadd.f32 %v7886_v27, %v7874_v18  ;;  %v6220_v59 = vadd.f32 %v7888_v53, %v7876_v21  ;;  %v8313_v51 = vcombine.low %v8272_v44, %v1831_v50 }
 0x160   :  { %v1373_v33 = vcombine.low %v9673_v55, %v1372_v38  ;;  %v2161_v46 = vcombine.high %v2160_v24, %v2160_v24  ;;  %v8316_v15 = vrot.slane %v2160_v24, %v7561_v34  ;;  %v8319_v38 = vrot.slane %v2183_v22, %v7561_v34  ;;  %v9676_v55 = vld [vmem:[#allocation5_spill] sm:$0xff] }
 0x161   :  { %v1585_v9 = vrot.slane %v9674_v42, %v7561_v34  ;;  %v9675_v53 = vrot.slane %v7712_v52, %v7561_v34  ;;  %v477_v27 = vadd.f32 %v6176_v25, %v7552_v26  ;;  %v2184_v50 = vcombine.high %v2183_v22, %v2183_v22  ;;  %v9677_v42 = vld [vmem:[#allocation4_spill] sm:$0xff] }
 0x162   :  { %6457 = vmatmul.mubr.msk.f32.vlgmr.msra.gmra.mrb[22].mxu0 %vm1028_vm1, %v1373_v33  ;;  %v8333_v28 = vrot.slane %v2161_v46, %v7561_v34  ;;  %v8339_v24 = vcombine.high %v8286_v23, %v8286_v23  ;;  %v9678_v52 = vpack.c.bf16 %v9676_v55, %v9677_v42  ;;  %v615_v46 = vadd.f32 %v6220_v59, %v7552_v26  ;;  %v9682_v33 = vld [vmem:[#allocation24_spill] sm:$0xff] }
 0x163   :  { %v1586_v21 = vcombine.low %v9675_v53, %v1585_v9  ;;  %6459 = vmatprep.mubr.msk.f32.mxu0 %vm7210_vm0, %v9643_v16  ;;  %v483_v25 = vmax.f32 %v477_v27, 0.0  ;;  %v1318_v22 = vcombine.high %v7911_v43, %v7911_v43  ;;  %v2176_v53 = vcombine.high %v8316_v15, %v8316_v15  ;;  %v9680_v9 = vld [vmem:[#allocation6_spill] sm:$0xff] }
 0x164   :  { %7011 = vmatpush3.bf16.msra.mxu0 %v9678_v52  ;;  %v8354_v41 = vcombine.low %v2645_v40, %v8333_v28  ;;  %v8358_v55 = vcombine.high %v8319_v38, %v8319_v38  ;;  %v1376_v26 = vcombine.low %v7911_v43, %v7934_v8  ;;  %v621_v27 = vmax.f32 %v615_v46, 0.0  ;;  %v9679_v52 = vld [vmem:[#allocation7_spill] sm:$0xff]  ;;  %v9686_v46 = vld [vmem:[#allocation9_spill] sm:$0xff] }
 0x165   :  { %6474 = vmatmul.mubr.msk.f32.vlgmr.msra.gmra.mrb[22].mxu1 %vm1028_vm1, %v1586_v21  ;;  %7012 = vmatprep.subr.bf16.mxu0 %v9649_v4  ;;  %v491_v59 = vcombine.high %v483_v25, %v483_v25  ;;  %v1861_v21 = vrot.slane %v483_v25, %v7561_v34  ;;  %v1377_v42 = vcombine.low %v1318_v22, %v7961_v6  ;;  %v9687_v22 = vld [vmem:[#allocation8_spill] sm:$0xff] }
 0x166   :  { %6476 = vmatprep.mubr.msk.f32.mxu1 %vm7210_vm0, %v9643_v16  ;;  %v9681_v40 = vpack.c.bf16 %v9679_v52, %v9680_v9  ;;  %v1384_v18 = vrot.slane %v7908_v63, %v7561_v34  ;;  %v9683_v12 = vcombine.high %v7865_v5, %v9682_v33  ;;  %v8376_v8 = vrot.slane %v1376_v26, %v7561_v34  ;;  %v9689_v26 = vld [vmem:[#allocation35_spill] sm:$0xff] }
 0x167   :  { %v1531_v25 = vcombine.high %v9685_v20, %v9685_v20  ;;  %v9688_v1 = vpack.c.bf16 %v9686_v46, %v9687_v22  ;;  %v1862_v9 = vcombine.high %v1861_v21, %v1861_v21  ;;  %v8384_v52 = vrot.slane %v1861_v21, %v7561_v34 }
 0x168   :  { %7017 = vmatpush3.bf16.msra.mxu1 %v9681_v40  ;;  %v1391_v14 = vrot.slane %v9683_v12, %v7561_v34  ;;  %9684 = vst [vmem:[#allocation5_spill] sm:$0xff] %v8376_v8  ;;  %v3745_v63 = vrot.slane %v491_v59, %v7561_v34  ;;  %v629_v40 = vcombine.high %v621_v27, %v621_v27 }
 0x169   :  { %7014 = vmatpush3.bf16.msra.mxu0 %v9688_v1  ;;  %7018 = vmatprep.subr.bf16.mxu1 %v9649_v4  ;;  %v2206_v5 = vrot.slane %v621_v27, %v7561_v34  ;;  %v1405_v12 = vrot.slane %v1377_v42, %v7561_v34  ;;  %v1589_v58 = vcombine.low %v9685_v20, %v9689_v26 }
 0x16a   :  { %v1406_v33 = vcombine.low %v1384_v18, %v1391_v14  ;;  %7021 = vmatprep.subr.bf16.mxu0 %v9649_v4  ;;  %v8394_v1 = vrot.slane %v1862_v9, %v7561_v34  ;;  %v8398_v21 = vcombine.high %v8384_v52, %v8384_v52  ;;  %v1935_v59 = vcombine.low %v8339_v24, %v8384_v52 }
 0x16b   :  { %v3746_v46 = vcombine.high %v3745_v63, %v3745_v63  ;;  %v8403_v27 = vrot.slane %v3745_v63, %v7561_v34  ;;  %v2207_v14 = vcombine.high %v2206_v5, %v2206_v5  ;;  %v8406_v18 = vrot.slane %v2206_v5, %v7561_v34  ;;  %v5795_v5 = vld [vmem:[%s9528_s3 + $0xb8] sm:$0xff] }
 0x16c   :  { %v3982_v42 = vrot.slane %v629_v40, %v7561_v34  ;;  %v8410_v22 = vrot.slane %v2184_v50, %v7561_v34  ;;  %v8413_v9 = vcombine.low %v8333_v28, %v2176_v53  ;;  %v1407_v26 = vcombine.low %v8376_v8, %v1405_v12  ;;  %v9693_v53 = vld [vmem:[#allocation26_spill] sm:$0xff] }
 0x16d   :  { %9690 = vst [vmem:[#allocation4_spill] sm:$0xff] %v8403_v27  ;;  %v1414_v29 = vrot.slane %v1406_v33, %v7561_v34  ;;  %v8420_v19 = vrot.slane %v3746_v46, %v7561_v34  ;;  %v2280_v50 = vcombine.low %v8358_v55, %v8406_v18  ;;  %v8429_v40 = vrot.slane %v2207_v14, %v7561_v34  ;;  %v5794_v46 = vld [vmem:[%s9528_s3 + $0xb0] sm:$0xff]  ;;  %v9694_v14 = vld [vmem:[#allocation30_spill] sm:$0xff] }
 0x16e   :  { %v1421_v12 = vrot.slane %v1407_v26, %v7561_v34  ;;  %v1590_v33 = vcombine.low %v1531_v25, %v7996_v30  ;;  %v3983_v63 = vcombine.high %v3982_v42, %v3982_v42  ;;  %v9695_v27 = vcombine.high %v9693_v53, %v9694_v14  ;;  %v9696_v53 = vld [vmem:[#allocation37_spill] sm:$0xff] }
 0x16f   :  { %9691 = vst [vmem:[#allocation7_spill] sm:$0xff] %v8420_v19  ;;  %v9692_v19 = vld [vmem:[#allocation32_spill] sm:$0xff]  ;;  %v8446_v26 = vrot.slane %v1589_v58, %v7561_v34  ;;  %v8450_v25 = vcombine.high %v8406_v18, %v8406_v18  ;;  %v8453_v39 = vrot.slane %v3982_v42, %v7561_v34  ;;  %v7019_v14 = vpack.c.bf16 %v5795_v5, %v5794_v46  ;;  %v5799_v46 = vld [vmem:[%s9528_s3 + $0xc0] sm:$0xff] }
 0x170   :  { %v1597_v20 = vrot.slane %v9692_v19, %v7561_v34  ;;  %v1604_v43 = vrot.slane %v9695_v27, %v7561_v34  ;;  %v1422_v8 = vcombine.low %v1414_v29, %v1421_v12  ;;  %v1618_v45 = vrot.slane %v1590_v33, %v7561_v34 }
 0x171   :  { %v5771_v19 = vcombine.high %v7953_v36, %v7961_v6  ;;  %v5781_v27 = vcombine.high %v9696_v53, %v7996_v30  ;;  %v9697_v29 = vcombine.low %v8144_v37, %v8190_v3  ;;  %v8475_v5 = vrot.slane %v3983_v63, %v7561_v34  ;;  %7020 = vmatpush3.bf16.msra.mxu1 %v7019_v14 }
 0x172   :  { %v1619_v60 = vcombine.low %v1597_v20, %v1604_v43  ;;  %6460 = vmatmul.mubr.msk.f32.gmra.mrb[24].mxu0 %vm1028_vm1, %v1422_v8  ;;  %v1620_v48 = vcombine.low %v8446_v26, %v1618_v45  ;;  %v9698_v43 = vcombine.low %v8155_v47, %v8202_v62  ;;  %7027 = vmatprep.subr.bf16.mxu1 %v9649_v4 }
 0x173   :  { %v1930_v42 = vrot.slane %v9697_v29, %v7561_v34  ;;  %6462 = vmatprep.mubr.msk.f32.mxu0 %vm7210_vm0, %v9643_v16  ;;  %v1430_v45 = vrot.slane %v5771_v19, %v7561_v34  ;;  %v1643_v63 = vrot.slane %v5781_v27, %v7561_v34  ;;  %v5800_v19 = vld [vmem:[%s9528_s3 + $0xc8] sm:$0xff]  ;;  %v1949_v27 = vrot.slane %v8313_v51, %v7561_v34  ;;  %v5801_v51 = vld [vmem:[%s9528_s3 + $0xd0] sm:$0xff] }
 0x174   :  { %v8472_v20 = vrot.slane %v9698_v43, %v7561_v34  ;;  %v1627_v12 = vrot.slane %v1619_v60, %v7561_v34  ;;  %v1634_v8 = vrot.slane %v1620_v48, %v7561_v34  ;;  %v1934_v48 = vcombine.low %v8286_v23, %v8302_v57 }
 0x175   :  { %v1931_v62 = vcombine.low %v8082_v54, %v1930_v42  ;;  %v1437_v60 = vrot.slane %v1430_v45, %v7561_v34  ;;  %v9699_v54 = vcombine.low %v8233_v31, %v8254_v61  ;;  %v1963_v42 = vrot.slane %v1935_v59, %v7561_v34  ;;  %v5802_v59 = vld [vmem:[%s9528_s3 + $0xd8] sm:$0xff] }
 0x176   :  { %v2276_v33 = vcombine.low %v8116_v17, %v8472_v20  ;;  %v1635_v29 = vcombine.low %v1627_v12, %v1634_v8  ;;  %v2279_v43 = vcombine.low %v8319_v38, %v8410_v22  ;;  %v1956_v45 = vrot.slane %v1934_v48, %v7561_v34 }
 0x177   :  { %v1942_v14 = vrot.slane %v9699_v54, %v7561_v34  ;;  %6463 = vmatmul.mubr.msk.f32.gmra.mrb[26].mxu0 %vm1028_vm1, %v1437_v60  ;;  %v9700_v3 = vcombine.low %v8249_v35, %v8316_v15  ;;  %v2294_v31 = vrot.slane %v8413_v9, %v7561_v34  ;;  %v2308_v12 = vrot.slane %v2280_v50, %v7561_v34 }
 0x178   :  { %6477 = vmatmul.mubr.msk.f32.gmra.mrb[24].mxu1 %vm1028_vm1, %v1635_v29  ;;  %6490 = vmatprep.mubr.msk.f32.mxu0 %vm7210_vm0, %v9643_v16  ;;  %v7022_v35 = vpack.c.bf16 %v5800_v19, %v5799_v46  ;;  %v2301_v8 = vrot.slane %v2279_v43, %v7561_v34  ;;  %v1965_v9 = vcombine.low %v1956_v45, %v1963_v42  ;;  %v5809_v46 = vld [vmem:[%s9528_s3 + $0xe0] sm:$0xff]  ;;  %v5810_v19 = vld [vmem:[%s9528_s3 + $0xe8] sm:$0xff] }
 0x179   :  { %v2287_v58 = vrot.slane %v9700_v3, %v7561_v34  ;;  %v1964_v3 = vcombine.low %v1942_v14, %v1949_v27  ;;  %6479 = vmatprep.mubr.msk.f32.mxu1 %vm7210_vm0, %v9643_v16  ;;  %v1981_v60 = vcombine.low %v8394_v1, %v8398_v21  ;;  %v2326_v48 = vcombine.low %v8429_v40, %v8450_v25 }
 0x17a   :  { %v1650_v54 = vrot.slane %v1643_v63, %v7561_v34  ;;  %v2310_v14 = vcombine.low %v2301_v8, %v2308_v12  ;;  %v7025_v29 = vpack.c.bf16 %v5802_v59, %v5801_v51  ;;  %v1979_v63 = vrot.slane %v1965_v9, %v7561_v34 }
 0x17b   :  { %v2309_v50 = vcombine.low %v2287_v58, %v2294_v31  ;;  %v9701_v58 = vcombine.low %v8076_v56, %v8258_v0  ;;  %6491 = vmatmul.mubr.msk.f32.vlgmr.msra.gmra.mrb[28].mxu0 %vm1028_vm1, %v1931_v62  ;;  %v1972_v42 = vrot.slane %v1964_v3, %v7561_v34  ;;  %v8548_v45 = vrot.slane %v1981_v60, %v7561_v34  ;;  %v5811_v31 = vld [vmem:[%s9528_s3 + $0xf0] sm:$0xff]  ;;  %v5812_v56 = vld [vmem:[%s9528_s3 + $0xf8] sm:$0xff] }
 0x17c   :  { %6480 = vmatmul.mubr.msk.f32.gmra.mrb[26].mxu1 %vm1028_vm1, %v1650_v54  ;;  %7023 = vmatpush3.bf16.msra.mxu0 %v7022_v35  ;;  %v2324_v62 = vrot.slane %v2310_v14, %v7561_v34  ;;  %v9702_v12 = vrot.slane %v8078_v32, %v7561_v34  ;;  %v9703_v59 = vcombine.low %v8093_v10, %v8296_v13 }
 0x17d   :  { %v2488_v27 = vrot.slane %v9701_v58, %v7561_v34  ;;  %v2317_v43 = vrot.slane %v2309_v50, %v7561_v34  ;;  %6507 = vmatprep.mubr.msk.f32.mxu1 %vm7210_vm0, %v9643_v16  ;;  %v7028_v8 = vpack.c.bf16 %v5810_v19, %v5809_v46  ;;  %6493 = vmatprep.mubr.msk.f32.mxu0 %vm7210_vm0, %v9643_v16  ;;  %v5819_v46 = vld [vmem:[%s9528_s3 + $0x100] sm:$0xff] }
 0x17e   :  { %v2701_v3 = vrot.slane %v9703_v59, %v7561_v34  ;;  %v1980_v9 = vcombine.low %v1972_v42, %v1979_v63  ;;  %v8570_v35 = vrot.slane %v2326_v48, %v7561_v34  ;;  %7024 = vmatprep.subr.bf16.mxu0 %v9649_v4  ;;  %v1995_v32 = vrot.slane %v8548_v45, %v7561_v34  ;;  %v5820_v48 = vld [vmem:[%s9528_s3 + $0x108] sm:$0xff] }
 0x17f   :  { %v2489_v51 = vcombine.low %v9702_v12, %v2488_v27  ;;  %v2325_v50 = vcombine.low %v2317_v43, %v2324_v62  ;;  %v7031_v60 = vpack.c.bf16 %v5812_v56, %v5811_v31  ;;  %v9704_v10 = vrot.slane %v8122_v49, %v7561_v34  ;;  %v5821_v62 = vld [vmem:[%s9528_s3 + $0x110] sm:$0xff] }
 0x180   :  { %6494 = vmatmul.mubr.msk.f32.gmra.mrb[30].mxu0 %vm1028_vm1, %v1980_v9  ;;  %v2434_v19 = vcombine.high %v8302_v57, %v8302_v57  ;;  %v2492_v14 = vcombine.low %v8302_v57, %v8339_v24  ;;  %v2500_v49 = vrot.slane %v8289_v7, %v7561_v34  ;;  %v9705_v58 = vcombine.high %v8254_v61, %v8272_v44 }
 0x181   :  { %v8578_v54 = vcombine.low %v9704_v10, %v2701_v3  ;;  %6508 = vmatmul.mubr.msk.f32.vlgmr.msra.gmra.mrb[28].mxu1 %vm1028_vm1, %v2276_v33  ;;  %7026 = vmatpush3.bf16.msra.mxu0 %v7025_v29  ;;  %v2647_v42 = vcombine.high %v8410_v22, %v8410_v22  ;;  %v2705_v24 = vcombine.low %v8410_v22, %v8358_v55  ;;  %v5827_v55 = vld [vmem:[%s9528_s3 + $0x128] sm:$0xff] }
 0x182   :  { %v2507_v27 = vrot.slane %v9705_v58, %v7561_v34  ;;  %v2713_v7 = vrot.slane %v8354_v41, %v7561_v34  ;;  %7029 = vmatpush3.bf16.msra.mxu1 %v7028_v8  ;;  %6510 = vmatprep.mubr.msk.f32.mxu1 %vm7210_vm0, %v9643_v16  ;;  %v2340_v61 = vrot.slane %v8570_v35, %v7561_v34  ;;  %v5826_v41 = vld [vmem:[%s9528_s3 + $0x120] sm:$0xff] }
 0x183   :  { %v2493_v17 = vcombine.low %v2434_v19, %v8394_v1  ;;  %6496 = vmatprep.mubr.msk.f32.mxu0 %vm7210_vm0, %v9643_v16  ;;  %7030 = vmatprep.subr.bf16.mxu1 %v9649_v4  ;;  %v7034_v20 = vpack.c.bf16 %v5820_v48, %v5819_v46  ;;  %v2706_v33 = vcombine.low %v2647_v42, %v8429_v40  ;;  %v5828_v48 = vld [vmem:[%s9528_s3 + $0x130] sm:$0xff]  ;;  %v9708_v58 = vld [vmem:[#allocation14_spill] sm:$0xff] }
 0x184   :  { %v2522_v44 = vcombine.low %v2500_v49, %v2507_v27  ;;  %v9706_v29 = vcombine.high %v8316_v15, %v8333_v28  ;;  %6497 = vmatmul.mubr.msk.f32.gmra.mrb[32].mxu0 %vm1028_vm1, %v1995_v32  ;;  %7033 = vmatprep.subr.bf16.mxu0 %v9649_v4  ;;  %v8629_v43 = vrot.slane %v2492_v14, %v7561_v34  ;;  %v5822_v15 = vld [vmem:[%s9528_s3 + $0x118] sm:$0xff] }
 0x185   :  { %v2521_v31 = vrot.slane %v2493_v17, %v7561_v34  ;;  %v8633_v56 = vrot.slane %v2705_v24, %v7561_v34  ;;  %6511 = vmatmul.mubr.msk.f32.gmra.mrb[30].mxu1 %vm1028_vm1, %v2325_v50  ;;  %6524 = vmatprep.mubr.msk.f32.mxu0 %vm7210_vm0, %v9643_v16  ;;  %v2734_v28 = vrot.slane %v2706_v33, %v7561_v34  ;;  %v9707_v49 = vld [vmem:[#allocation10_spill] sm:$0xff] }
 0x186   :  { %v2720_v63 = vrot.slane %v9706_v29, %v7561_v34  ;;  %v5805_v59 = vcombine.high %v8384_v52, %v8394_v1  ;;  %6513 = vmatprep.mubr.msk.f32.mxu1 %vm7210_vm0, %v9643_v16  ;;  %7032 = vmatpush3.bf16.msra.mxu1 %v7031_v60  ;;  %v7040_v3 = vpack.c.bf16 %v5827_v55, %v5826_v41  ;;  %v5829_v60 = vld [vmem:[%s9528_s3 + $0x138] sm:$0xff]  ;;  %v9715_v29 = vld [vmem:[#allocation23_spill] sm:$0xff] }
 0x187   :  { %v2523_v8 = vcombine.low %v8629_v43, %v2521_v31  ;;  %v2530_v9 = vrot.slane %v2522_v44, %v7561_v34  ;;  %7039 = vmatprep.subr.bf16.mxu1 %v9649_v4  ;;  %v2736_v50 = vcombine.low %v8633_v56, %v2734_v28  ;;  %v7037_v32 = vpack.c.bf16 %v5822_v15, %v5821_v62  ;;  %v9710_v24 = vld [vmem:[#allocation22_spill] sm:$0xff]  ;;  %v9712_v44 = vld [vmem:[#allocation11_spill] sm:$0xff]  ;;  %v9713_v41 = vld [vmem:[#allocation21_spill] sm:$0xff] }
 0x188   :  { %v2735_v12 = vcombine.low %v2713_v7, %v2720_v63  ;;  %v2546_v10 = vrot.slane %v5805_v59, %v7561_v34  ;;  %v5815_v46 = vcombine.high %v8406_v18, %v8429_v40  ;;  %6525 = vmatmul.mubr.msk.f32.vlgmr.msra.gmra.mrb[34].mxu0 %vm1028_vm1, %v2489_v51  ;;  %v9709_v27 = vcombine.low %v9707_v49, %v9708_v58  ;;  %v5833_v62 = vld [vmem:[%s9528_s3 + $0x140] sm:$0xff] }
 0x189   :  { %v2537_v19 = vrot.slane %v2523_v8, %v7561_v34  ;;  %v9711_v7 = vcombine.low %v7839_v11, %v9710_v24  ;;  %6514 = vmatmul.mubr.msk.f32.gmra.mrb[32].mxu1 %vm1028_vm1, %v2340_v61  ;;  %7035 = vmatpush3.bf16.msra.mxu0 %v7034_v20  ;;  %v2750_v51 = vrot.slane %v2736_v50, %v7561_v34  ;;  %v9717_v8 = vld [vmem:[#allocation25_spill] sm:$0xff]  ;;  %v9723_v58 = vld [vmem:[#allocation31_spill] sm:$0xff] }
 0x18a   :  { %v2743_v14 = vrot.slane %v2735_v12, %v7561_v34  ;;  %v8669_v42 = vrot.slane %v9709_v27, %v7561_v34  ;;  %v9714_v55 = vcombine.low %v9712_v44, %v9713_v41  ;;  %v9716_v63 = vcombine.low %v7862_v2, %v9715_v29  ;;  %6541 = vmatprep.mubr.msk.f32.mxu1 %vm7210_vm0, %v9643_v16  ;;  %v5834_v2 = vld [vmem:[%s9528_s3 + $0x148] sm:$0xff]  ;;  %v5843_v29 = vld [vmem:[%s9528_s3 + $0x160] sm:$0xff] }
 0x18b   :  { %v8675_v17 = vrot.slane %v9711_v7, %v7561_v34  ;;  %6527 = vmatprep.mubr.msk.f32.mxu0 %vm7210_vm0, %v9643_v16  ;;  %v2538_v11 = vcombine.low %v2530_v9, %v2537_v19  ;;  %v7043_v61 = vpack.c.bf16 %v5829_v60, %v5828_v48  ;;  %7036 = vmatprep.subr.bf16.mxu0 %v9649_v4  ;;  %v9718_v9 = vld [vmem:[#allocation13_spill] sm:$0xff]  ;;  %v9720_v19 = vld [vmem:[#allocation34_spill] sm:$0xff] }
 0x18c   :  { %v8683_v33 = vrot.slane %v9714_v55, %v7561_v34  ;;  %v8689_v31 = vrot.slane %v9716_v63, %v7561_v34  ;;  %v2751_v15 = vcombine.low %v2743_v14, %v2750_v51  ;;  %v2553_v28 = vrot.slane %v2546_v10, %v7561_v34  ;;  %v9721_v14 = vld [vmem:[#allocation36_spill] sm:$0xff] }
 0x18d   :  { %v2947_v20 = vcombine.low %v8669_v42, %v8675_v17  ;;  %v2759_v12 = vrot.slane %v5815_v46, %v7561_v34  ;;  %6528 = vmatmul.mubr.msk.f32.gmra.mrb[36].mxu0 %vm1028_vm1, %v2538_v11  ;;  %v2948_v50 = vcombine.low %v9718_v9, %v9717_v8  ;;  %v9719_v48 = vcombine.low %v7953_v36, %v7961_v6  ;;  %v9724_v46 = vld [vmem:[#allocation20_spill] sm:$0xff]  ;;  %v9726_v36 = vld [vmem:[#allocation39_spill] sm:$0xff]  ;;  %v9729_v11 = vld [vmem:[#allocation5_spill] sm:$0xff] }
 0x18e   :  { %v3184_v59 = vcombine.low %v8683_v33, %v8689_v31  ;;  %v9722_v49 = vcombine.low %v9720_v19, %v9721_v14  ;;  %v3185_v27 = vcombine.low %v9724_v46, %v9723_v58  ;;  %6542 = vmatmul.mubr.msk.f32.vlgmr.msra.gmra.mrb[34].mxu1 %vm1028_vm1, %v8578_v54  ;;  %7038 = vmatpush3.bf16.msra.mxu0 %v7037_v32  ;;  %v9727_v17 = vld [vmem:[#allocation40_spill] sm:$0xff] }
 0x18f   :  { %v2964_v60 = vrot.slane %v9719_v48, %v7561_v34  ;;  %v7046_v42 = vpack.c.bf16 %v5834_v2, %v5833_v62  ;;  %v9725_v24 = vcombine.low %v9696_v53, %v7996_v30  ;;  %v9728_v51 = vcombine.low %v9726_v36, %v9727_v17  ;;  %7041 = vmatpush3.bf16.msra.mxu1 %v7040_v3  ;;  %v5844_v63 = vld [vmem:[%s9528_s3 + $0x168] sm:$0xff]  ;;  %v5836_v48 = vld [vmem:[%s9528_s3 + $0x158] sm:$0xff] }
 0x190   :  { %v2971_v10 = vrot.slane %v9722_v49, %v7561_v34  ;;  %6544 = vmatprep.mubr.msk.f32.mxu1 %vm7210_vm0, %v9643_v16  ;;  %v2957_v41 = vrot.slane %v2948_v50, %v7561_v34  ;;  %v3194_v54 = vrot.slane %v3185_v27, %v7561_v34  ;;  %6530 = vmatprep.mubr.msk.f32.mxu0 %vm7210_vm0, %v9643_v16  ;;  %v9731_v49 = vld [vmem:[#allocation41_spill] sm:$0xff]  ;;  %v9743_v33 = vld [vmem:[#allocation28_spill] sm:$0xff] }
 0x191   :  { %v3201_v7 = vrot.slane %v9725_v24, %v7561_v34  ;;  %v3208_v44 = vrot.slane %v9728_v51, %v7561_v34  ;;  %7042 = vmatprep.subr.bf16.mxu1 %v9649_v4  ;;  %v2901_v32 = vcombine.high %v9721_v14, %v9721_v14  ;;  %v3138_v3 = vcombine.high %v9727_v17, %v9727_v17  ;;  %v9732_v51 = vld [vmem:[#allocation15_spill] sm:$0xff] }
 0x192   :  { %v2973_v55 = vcombine.low %v2964_v60, %v2971_v10  ;;  %6531 = vmatmul.mubr.msk.f32.gmra.mrb[38].mxu0 %vm1028_vm1, %v2553_v28  ;;  %7045 = vmatprep.subr.bf16.mxu0 %v9649_v4  ;;  %v2972_v62 = vcombine.low %v2957_v41, %v9729_v11  ;;  %v3209_v9 = vcombine.low %v3194_v54, %v8446_v26  ;;  %v5835_v28 = vld [vmem:[%s9528_s3 + $0x150] sm:$0xff]  ;;  %v9730_v60 = vld [vmem:[#allocation38_spill] sm:$0xff] }
 0x193   :  { %v3210_v53 = vcombine.low %v3201_v7, %v3208_v44  ;;  %6545 = vmatmul.mubr.msk.f32.gmra.mrb[36].mxu1 %vm1028_vm1, %v2751_v15  ;;  %6558 = vmatprep.mubr.msk.f32.mxu0 %vm7210_vm0, %v9643_v16  ;;  %v2989_v19 = vcombine.low %v9730_v60, %v2901_v32  ;;  %v8767_v26 = vcombine.low %v9731_v49, %v3138_v3  ;;  %v8772_v10 = vld [vmem:[%s9528_s3 + $0x170] sm:$0xff]  ;;  %v8777_v15 = vld [vmem:[%s9528_s3 + $0x178] sm:$0xff] }
 0x194   :  { %v2987_v2 = vrot.slane %v2973_v55, %v7561_v34  ;;  %6547 = vmatprep.mubr.msk.f32.mxu1 %vm7210_vm0, %v9643_v16  ;;  %v2766_v46 = vrot.slane %v2759_v12, %v7561_v34  ;;  %7044 = vmatpush3.bf16.msra.mxu1 %v7043_v61  ;;  %v2980_v27 = vrot.slane %v2972_v62, %v7561_v34  ;;  %v9733_v41 = vld [vmem:[#allocation18_spill] sm:$0xff] }
 0x195   :  { %v8760_v50 = vrot.slane %v3210_v53, %v7561_v34  ;;  %v3217_v24 = vrot.slane %v3209_v9, %v7561_v34  ;;  %7051 = vmatprep.subr.bf16.mxu1 %v9649_v4  ;;  %v7052_v7 = vpack.c.bf16 %v5844_v63, %v5843_v29  ;;  %v2996_v36 = vrot.slane %v2989_v19, %v7561_v34  ;;  %v9734_v29 = vld [vmem:[#allocation17_spill] sm:$0xff] }
 0x196   :  { %v3346_v44 = vrot.slane %v9732_v51, %v7561_v34  ;;  %v3539_v55 = vrot.slane %v9733_v41, %v7561_v34  ;;  %6559 = vmatmul.mubr.msk.f32.vlgmr.msra.gmra.mrb[40].mxu0 %vm1028_vm1, %v2947_v20  ;;  %v2988_v54 = vcombine.low %v2980_v27, %v2987_v2  ;;  %v7049_v12 = vpack.c.bf16 %v5836_v48, %v5835_v28  ;;  %v9735_v20 = vld [vmem:[#allocation16_spill] sm:$0xff]  ;;  %v9736_v2 = vld [vmem:[#allocation29_spill] sm:$0xff]  ;;  %v5853_v51 = vld [vmem:[%s9528_s3 + $0x180] sm:$0xff] }
 0x197   :  { %v3225_v61 = vcombine.low %v3217_v24, %v8760_v50  ;;  %v7055_v53 = vpack.c.bf16 %v8777_v15, %v8772_v10  ;;  %6548 = vmatmul.mubr.msk.f32.gmra.mrb[38].mxu1 %vm1028_vm1, %v2766_v46  ;;  %7047 = vmatpush3.bf16.msra.mxu0 %v7046_v42  ;;  %v3003_v32 = vrot.slane %v2996_v36, %v7561_v34  ;;  %v9737_v42 = vld [vmem:[#allocation12_spill] sm:$0xff]  ;;  %v9740_v10 = vld [vmem:[#allocation19_spill] sm:$0xff] }
 0x198   :  { %v3233_v3 = vrot.slane %v8767_v26, %v7561_v34  ;;  %v3361_v63 = vcombine.low %v9734_v29, %v3346_v44  ;;  %6575 = vmatprep.mubr.msk.f32.mxu1 %vm7210_vm0, %v9643_v16  ;;  %6561 = vmatprep.mubr.msk.f32.mxu0 %vm7210_vm0, %v9643_v16  ;;  %v3554_v11 = vcombine.low %v9735_v20, %v3539_v55  ;;  %v9739_v26 = vld [vmem:[#allocation33_spill] sm:$0xff]  ;;  %v5854_v44 = vld [vmem:[%s9528_s3 + $0x188] sm:$0xff] }
 0x199   :  { %v1319_v62 = vcombine.high %v7961_v6, %v7961_v6  ;;  %v9738_v9 = vcombine.high %v9737_v42, %v9737_v42  ;;  %7048 = vmatprep.subr.bf16.mxu0 %v9649_v4  ;;  %v5838_v48 = vcombine.high %v9717_v8, %v9736_v2  ;;  %v1532_v19 = vcombine.high %v7996_v30, %v7996_v30  ;;  %v9742_v30 = vld [vmem:[#allocation27_spill] sm:$0xff] }
 0x19a   :  { %v3369_v50 = vrot.slane %v3361_v63, %v7561_v34  ;;  %v9741_v15 = vcombine.high %v9740_v10, %v9740_v10  ;;  %6562 = vmatmul.mubr.msk.f32.gmra.mrb[42].mxu0 %vm1028_vm1, %v2988_v54  ;;  %v3562_v46 = vrot.slane %v3554_v11, %v7561_v34  ;;  %v5848_v36 = vcombine.high %v9723_v58, %v9739_v26  ;;  %v9744_v63 = vld [vmem:[#allocation49_spill] sm:$0xff] }
 0x19b   :  { %v3378_v28 = vcombine.low %v9738_v9, %v9736_v2  ;;  %v3380_v27 = vcombine.low %v1319_v62, %v9730_v60  ;;  %6576 = vmatmul.mubr.msk.f32.vlgmr.msra.gmra.mrb[40].mxu1 %vm1028_vm1, %v3184_v59  ;;  %7050 = vmatpush3.bf16.msra.mxu0 %v7049_v12  ;;  %v3394_v41 = vrot.slane %v5838_v48, %v7561_v34  ;;  %v5855_v11 = vld [vmem:[%s9528_s3 + $0x190] sm:$0xff]  ;;  %v5856_v62 = vld [vmem:[%s9528_s3 + $0x198] sm:$0xff]  ;;  %v5861_v48 = vld [vmem:[%s9528_s3 + $0x1a8] sm:$0xff] }
 0x19c   :  { %v3571_v6 = vcombine.low %v9741_v15, %v9739_v26  ;;  %v3377_v8 = vcombine.low %v3369_v50, %v9742_v30  ;;  %v3573_v58 = vcombine.low %v1532_v19, %v9731_v49  ;;  %7053 = vmatpush3.bf16.msra.mxu1 %v7052_v7  ;;  %6578 = vmatprep.mubr.msk.f32.mxu1 %vm7210_vm0, %v9643_v16  ;;  %v9745_v9 = vld [vmem:[#allocation44_spill] sm:$0xff] }
 0x19d   :  { %v3387_v24 = vrot.slane %v3378_v28, %v7561_v34  ;;  %v3570_v31 = vcombine.low %v3562_v46, %v9743_v33  ;;  %v3401_v59 = vrot.slane %v3380_v27, %v7561_v34  ;;  %6564 = vmatprep.mubr.msk.f32.mxu0 %vm7210_vm0, %v9643_v16  ;;  %7054 = vmatprep.subr.bf16.mxu1 %v9649_v4  ;;  %v5862_v10 = vld [vmem:[%s9528_s3 + $0x1b0] sm:$0xff]  ;;  %v9747_v46 = vld [vmem:[#allocation47_spill] sm:$0xff] }
 0x19e   :  { %v3580_v55 = vrot.slane %v3571_v6, %v7561_v34  ;;  %v3587_v12 = vrot.slane %v5848_v36, %v7561_v34  ;;  %v3594_v29 = vrot.slane %v3573_v58, %v7561_v34  ;;  %6565 = vmatmul.mubr.msk.f32.gmra.mrb[44].mxu0 %vm1028_vm1, %v3003_v32  ;;  %7057 = vmatprep.subr.bf16.mxu0 %v9649_v4  ;;  %v9746_v6 = vld [vmem:[#allocation42_spill] sm:$0xff] }
 0x19f   :  { %v3402_v54 = vcombine.low %v3387_v24, %v3394_v41  ;;  %v7058_v7 = vpack.c.bf16 %v5854_v44, %v5853_v51  ;;  %v3403_v20 = vcombine.low %v9744_v63, %v3401_v59  ;;  %v5839_v2 = vcombine.high %v9721_v14, %v9730_v60  ;;  %6579 = vmatmul.mubr.msk.f32.gmra.mrb[42].mxu1 %vm1028_vm1, %v3225_v61  ;;  %v5860_v14 = vld [vmem:[%s9528_s3 + $0x1a0] sm:$0xff]  ;;  %v9752_v41 = vld [vmem:[#allocation52_spill] sm:$0xff] }
 0x1a0   :  { %6592 = vmatprep.mubr.msk.f32.mxu0 %vm7210_vm0, %v9643_v16  ;;  %v3595_v42 = vcombine.low %v3580_v55, %v3587_v12  ;;  %v3596_v28 = vcombine.low %v9745_v9, %v3594_v29  ;;  %6581 = vmatprep.mubr.msk.f32.mxu1 %vm7210_vm0, %v9643_v16  ;;  %v3240_v50 = vrot.slane %v3233_v3, %v7561_v34  ;;  %v9749_v36 = vld [vmem:[#allocation54_spill] sm:$0xff]  ;;  %v9751_v44 = vld [vmem:[#allocation43_spill] sm:$0xff] }
 0x1a1   :  { %v3410_v32 = vrot.slane %v3402_v54, %v7561_v34  ;;  %7056 = vmatpush3.bf16.msra.mxu1 %v7055_v53  ;;  %v3417_v60 = vrot.slane %v3403_v20, %v7561_v34  ;;  %v5849_v61 = vcombine.high %v9727_v17, %v9731_v49  ;;  %v7061_v53 = vpack.c.bf16 %v5856_v62, %v5855_v11  ;;  %v5863_v17 = vld [vmem:[%s9528_s3 + $0x1b8] sm:$0xff]  ;;  %v9754_v59 = vld [vmem:[#allocation55_spill] sm:$0xff] }
 0x1a2   :  { %7063 = vmatprep.subr.bf16.mxu1 %v9649_v4  ;;  %v3603_v19 = vrot.slane %v3595_v42, %v7561_v34  ;;  %v3610_v3 = vrot.slane %v3596_v28, %v7561_v34  ;;  %v3426_v26 = vrot.slane %v5839_v2, %v7561_v34  ;;  %6593 = vmatmul.mubr.msk.f32.vlgmr.msra.gmra.mrb[46].mxu0 %vm1028_vm1, %v3377_v8  ;;  %v9756_v63 = vld [vmem:[#allocation46_spill] sm:$0xff]  ;;  %v9758_v2 = vld [vmem:[#allocation4_spill] sm:$0xff]  ;;  %v9760_v9 = vld [vmem:[#allocation51_spill] sm:$0xff] }
 0x1a3   :  { %v3418_v49 = vcombine.low %v3410_v32, %v3417_v60  ;;  %v8889_v15 = vrot.slane %v5849_v61, %v7561_v34  ;;  %v9748_v27 = vcombine.low %v9746_v6, %v9747_v46  ;;  %v9750_v30 = vcombine.low %v8258_v0, %v9749_v36  ;;  %6582 = vmatmul.mubr.msk.f32.gmra.mrb[44].mxu1 %vm1028_vm1, %v3240_v50  ;;  %v5867_v61 = vld [vmem:[%s9528_s3 + $0x1c0] sm:$0xff] }
 0x1a4   :  { %7059 = vmatpush3.bf16.msra.mxu0 %v7058_v7  ;;  %v3611_v8 = vcombine.low %v3603_v19, %v3610_v3  ;;  %v9753_v58 = vcombine.low %v9751_v44, %v9752_v41  ;;  %v9755_v55 = vcombine.low %v8296_v13, %v9754_v59  ;;  %6609 = vmatprep.mubr.msk.f32.mxu1 %vm7210_vm0, %v9643_v16  ;;  %v8969_v19 = vld [vmem:[%s9528_s3 + $0x1e8] sm:$0xff]  ;;  %v5880_v41 = vld [vmem:[%s9528_s3 + $0x1f8] sm:$0xff] }
 0x1a5   :  { %v8895_v24 = vrot.slane %v9748_v27, %v7561_v34  ;;  %v8901_v51 = vrot.slane %v9750_v30, %v7561_v34  ;;  %v7064_v0 = vpack.c.bf16 %v5861_v48, %v5860_v14  ;;  %6595 = vmatprep.mubr.msk.f32.mxu0 %vm7210_vm0, %v9643_v16  ;;  %v7067_v12 = vpack.c.bf16 %v5863_v17, %v5862_v10  ;;  %v5869_v17 = vld [vmem:[%s9528_s3 + $0x1d0] sm:$0xff] }
 0x1a6   :  { %v8908_v33 = vrot.slane %v9753_v58, %v7561_v34  ;;  %v8914_v54 = vrot.slane %v9755_v55, %v7561_v34  ;;  %7060 = vmatprep.subr.bf16.mxu0 %v9649_v4  ;;  %v3433_v7 = vrot.slane %v3426_v26, %v7561_v34  ;;  %v3808_v20 = vcombine.low %v9756_v63, %v8286_v23  ;;  %v9764_v58 = vld [vmem:[#allocation48_spill] sm:$0xff] }
 0x1a7   :  { %v3807_v29 = vcombine.low %v8895_v24, %v8901_v51  ;;  %v9757_v11 = vcombine.low %v8384_v52, %v8394_v1  ;;  %6596 = vmatmul.mubr.msk.f32.gmra.mrb[48].mxu0 %vm1028_vm1, %v3418_v49  ;;  %v9759_v32 = vcombine.low %v8398_v21, %v9758_v2  ;;  %v4045_v28 = vcombine.low %v9760_v9, %v8319_v38  ;;  %v5870_v49 = vld [vmem:[%s9528_s3 + $0x1d8] sm:$0xff] }
 0x1a8   :  { %v4044_v13 = vcombine.low %v8908_v33, %v8914_v54  ;;  %v9761_v50 = vcombine.low %v8406_v18, %v8429_v40  ;;  %v9762_v52 = vcombine.low %v8450_v25, %v8453_v39  ;;  %6610 = vmatmul.mubr.msk.f32.vlgmr.msra.gmra.mrb[46].mxu1 %vm1028_vm1, %v3570_v31  ;;  %7062 = vmatpush3.bf16.msra.mxu0 %v7061_v53  ;;  %v5868_v25 = vld [vmem:[%s9528_s3 + $0x1c8] sm:$0xff]  ;;  %v8964_v31 = vld [vmem:[%s9528_s3 + $0x1e0] sm:$0xff] }
 0x1a9   :  { %v3824_v62 = vrot.slane %v9757_v11, %v7561_v34  ;;  %v3831_v42 = vrot.slane %v9759_v32, %v7561_v34  ;;  %v3626_v21 = vrot.slane %v8889_v15, %v7561_v34  ;;  %v3817_v48 = vrot.slane %v3808_v20, %v7561_v34  ;;  %7065 = vmatpush3.bf16.msra.mxu1 %v7064_v0  ;;  %v9763_v15 = vld [vmem:[#allocation7_spill] sm:$0xff]  ;;  %v9766_v32 = vld [vmem:[#allocation45_spill] sm:$0xff] }
 0x1aa   :  { %v4061_v14 = vrot.slane %v9761_v50, %v7561_v34  ;;  %v4068_v60 = vrot.slane %v9762_v52, %v7561_v34  ;;  %v3761_v18 = vcombine.high %v9758_v2, %v9758_v2  ;;  %6612 = vmatprep.mubr.msk.f32.mxu1 %vm7210_vm0, %v9643_v16  ;;  %v4054_v53 = vrot.slane %v4045_v28, %v7561_v34 }
 0x1ab   :  { %v3833_v3 = vcombine.low %v3824_v62, %v3831_v42  ;;  %6598 = vmatprep.mubr.msk.f32.mxu0 %vm7210_vm0, %v9643_v16  ;;  %7066 = vmatprep.subr.bf16.mxu1 %v9649_v4  ;;  %v3832_v10 = vcombine.low %v3817_v48, %v8629_v43  ;;  %v3998_v46 = vcombine.high %v8453_v39, %v8453_v39  ;;  %v9770_v48 = vld [vmem:[#allocation56_spill] sm:$0xff] }
 0x1ac   :  { %v4070_v26 = vcombine.low %v4061_v14, %v4068_v60  ;;  %v3849_v6 = vcombine.low %v9763_v15, %v3761_v18  ;;  %6599 = vmatmul.mubr.msk.f32.gmra.mrb[50].mxu0 %vm1028_vm1, %v3433_v7  ;;  %7069 = vmatprep.subr.bf16.mxu0 %v9649_v4  ;;  %v4069_v43 = vcombine.low %v4054_v53, %v8633_v56  ;;  %v9765_v7 = vld [vmem:[#allocation53_spill] sm:$0xff] }
 0x1ad   :  { %v3847_v27 = vrot.slane %v3833_v3, %v7561_v34  ;;  %6613 = vmatmul.mubr.msk.f32.gmra.mrb[48].mxu1 %vm1028_vm1, %v3611_v8  ;;  %6626 = vmatprep.mubr.msk.f32.mxu0 %vm7210_vm0, %v9643_v16  ;;  %v7070_v36 = vpack.c.bf16 %v5868_v25, %v5867_v61  ;;  %v7076_v30 = vpack.c.bf16 %v8969_v19, %v8964_v31  ;;  %v5879_v8 = vld [vmem:[%s9528_s3 + $0x1f0] sm:$0xff] }
 0x1ae   :  { %v8990_v24 = vrot.slane %v4070_v26, %v7561_v34  ;;  %v3840_v51 = vrot.slane %v3832_v10, %v7561_v34  ;;  %6615 = vmatprep.mubr.msk.f32.mxu1 %vm7210_vm0, %v9643_v16  ;;  %7068 = vmatpush3.bf16.msra.mxu1 %v7067_v12  ;;  %v4077_v56 = vrot.slane %v4069_v43, %v7561_v34 }
 0x1af   :  { %v7073_v44 = vpack.c.bf16 %v5870_v49, %v5869_v17  ;;  %v4206_v59 = vrot.slane %v9764_v58, %v7561_v34  ;;  %7075 = vmatprep.subr.bf16.mxu1 %v9649_v4  ;;  %v3856_v0 = vrot.slane %v3849_v6, %v7561_v34  ;;  %v4086_v12 = vcombine.low %v8475_v5, %v3998_v46 }
 0x1b0   :  { %v3848_v55 = vcombine.low %v3840_v51, %v3847_v27  ;;  %v4399_v63 = vrot.slane %v9765_v7, %v7561_v34  ;;  %6627 = vmatmul.mubr.msk.f32.vlgmr.msra.gmra.mrb[52].mxu0 %vm1028_vm1, %v3807_v29  ;;  %v4085_v20 = vcombine.low %v4077_v56, %v8990_v24  ;;  %v2435_v62 = vcombine.high %v8394_v1, %v8394_v1  ;;  %v5888_v7 = vld [vmem:[%s9530_s5 + $0x40] sm:$0xff] }
 0x1b1   :  { %v4221_v11 = vcombine.low %v8144_v37, %v4206_v59  ;;  %v9767_v42 = vcombine.high %v9766_v32, %v9766_v32  ;;  %6616 = vmatmul.mubr.msk.f32.gmra.mrb[50].mxu1 %vm1028_vm1, %v3626_v21  ;;  %7071 = vmatpush3.bf16.msra.mxu0 %v7070_v36  ;;  %v7079_v28 = vpack.c.bf16 %v5880_v41, %v5879_v8  ;;  %v5890_v32 = vld [vmem:[%s9530_s5 + $0x50] sm:$0xff] }
 0x1b2   :  { %v4414_v50 = vcombine.low %v8155_v47, %v4399_v63  ;;  %v5872_v29 = vcombine.high %v8286_v23, %v8302_v57  ;;  %6643 = vmatprep.mubr.msk.f32.mxu1 %vm7210_vm0, %v9643_v16  ;;  %6629 = vmatprep.mubr.msk.f32.mxu0 %vm7210_vm0, %v9643_v16  ;;  %v4240_v1 = vcombine.low %v2435_v62, %v9763_v15  ;;  %v5889_v63 = vld [vmem:[%s9530_s5 + $0x48] sm:$0xff] }
 0x1b3   :  { %v4238_v9 = vcombine.low %v9767_v42, %v8302_v57  ;;  %v4229_v37 = vrot.slane %v4221_v11, %v7561_v34  ;;  %7072 = vmatprep.subr.bf16.mxu0 %v9649_v4  ;;  %v2648_v23 = vcombine.high %v8429_v40, %v8429_v40  ;;  %v9768_v57 = vld [vmem:[#allocation50_spill] sm:$0xff]  ;;  %v3863_v61 = vrot.slane %v3856_v0, %v7561_v34  ;;  %v9771_v40 = vld [vmem:[#allocation57_spill] sm:$0xff]  ;;  %v4713_v62 = vld [vmem:[%s9530_s5 + $0x8] sm:$0xff] }
 0x1b4   :  { %v4422_v52 = vrot.slane %v4414_v50, %v7561_v34  ;;  %v4254_v47 = vrot.slane %v5872_v29, %v7561_v34  ;;  %v9769_v60 = vcombine.high %v9768_v57, %v9768_v57  ;;  %6630 = vmatmul.mubr.msk.f32.gmra.mrb[54].mxu0 %vm1028_vm1, %v3848_v55  ;;  %v4261_v25 = vrot.slane %v4240_v1, %v7561_v34  ;;  %v5891_v42 = vld [vmem:[%s9530_s5 + $0x58] sm:$0xff]  ;;  %v4714_v50 = vld [vmem:[%s9530_s5 + $0x10] sm:$0xff]  ;;  %v4716_v57 = vld [vmem:[%s9530_s5 + $0x20] sm:$0xff] }
 0x1b5   :  { %v4247_v14 = vrot.slane %v4238_v9, %v7561_v34  ;;  %v4237_v18 = vcombine.low %v4229_v37, %v9770_v48  ;;  %v5882_v31 = vcombine.high %v8319_v38, %v8410_v22  ;;  %6644 = vmatmul.mubr.msk.f32.vlgmr.msra.gmra.mrb[52].mxu1 %vm1028_vm1, %v4044_v13  ;;  %7074 = vmatpush3.bf16.msra.mxu0 %v7073_v44  ;;  %v4715_v29 = vld [vmem:[%s9530_s5 + $0x18] sm:$0xff]  ;;  %v5894_v48 = vld [vmem:[%s9530_s5 + $0x70] sm:$0xff] }
 0x1b6   :  { %v4431_v21 = vcombine.low %v9769_v60, %v8410_v22  ;;  %v4430_v19 = vcombine.low %v4422_v52, %v9771_v40  ;;  %v4433_v53 = vcombine.low %v2648_v23, %v8475_v5  ;;  %7077 = vmatpush3.bf16.msra.mxu1 %v7076_v30  ;;  %6646 = vmatprep.mubr.msk.f32.mxu1 %vm7210_vm0, %v9643_v16  ;;  %v5893_v23 = vld [vmem:[%s9530_s5 + $0x68] sm:$0xff] }
 0x1b7   :  { %v4262_v3 = vcombine.low %v4247_v14, %v4254_v47  ;;  %v4263_v26 = vcombine.low %v8548_v45, %v4261_v25  ;;  %v4447_v38 = vrot.slane %v5882_v31, %v7561_v34  ;;  %6632 = vmatprep.mubr.msk.f32.mxu0 %vm7210_vm0, %v9643_v16  ;;  %7078 = vmatprep.subr.bf16.mxu1 %v9649_v4  ;;  %v5892_v47 = vld [vmem:[%s9530_s5 + $0x60] sm:$0xff]  ;;  %v4717_v60 = vld [vmem:[%s9530_s5 + $0x28] sm:$0xff]  ;;  %v4718_v25 = vld [vmem:[%s9530_s5 + $0x30] sm:$0xff] }
 0x1b8   :  { %v4440_v10 = vrot.slane %v4431_v21, %v7561_v34  ;;  %v4093_v22 = vrot.slane %v4086_v12, %v7561_v34  ;;  %v4454_v33 = vrot.slane %v4433_v53, %v7561_v34  ;;  %6633 = vmatmul.mubr.msk.f32.gmra.mrb[56].mxu0 %vm1028_vm1, %v3863_v61  ;;  %7081 = vmatprep.subr.bf16.mxu0 %v9649_v4  ;;  %v4719_v31 = vld [vmem:[%s9530_s5 + $0x38] sm:$0xff] }
 0x1b9   :  { %v4270_v54 = vrot.slane %v4262_v3, %v7561_v34  ;;  %v4277_v13 = vrot.slane %v4263_v26, %v7561_v34  ;;  %6647 = vmatmul.mubr.msk.f32.gmra.mrb[54].mxu1 %vm1028_vm1, %v4085_v20  ;;  %6660 = vmatprep.mubr.msk.f32.mxu0 %vm7210_vm0, %v9643_v16  ;;  %v5873_v6 = vcombine.high %v9758_v2, %v9763_v15  ;;  %v4712_v20 = vld [vmem:[%s9530_s5] sm:$0xff] }
 0x1ba   :  { %v4455_v45 = vcombine.low %v4440_v10, %v4447_v38  ;;  %v4456_v17 = vcombine.low %v8570_v35, %v4454_v33  ;;  %6649 = vmatprep.mubr.msk.f32.mxu1 %vm7210_vm0, %v9643_v16  ;;  %7080 = vmatpush3.bf16.msra.mxu1 %v7079_v28  ;;  %v4100_v46 = vrot.slane %v4093_v22, %v7561_v34 }
 0x1bb   :  { %v4278_v49 = vcombine.low %v4270_v54, %v4277_v13  ;;  %7093 = vmatprep.subr.bf16.mxu1 %v9649_v4  ;;  %v4286_v2 = vrot.slane %v5873_v6, %v7561_v34  ;;  %v5883_v15 = vcombine.high %v8453_v39, %v8475_v5  ;;  %v7082_v11 = vpack.c.bf16 %v5889_v63, %v5888_v7 }
 0x1bc   :  { %v4463_v27 = vrot.slane %v4455_v45, %v7561_v34  ;;  %v4470_v43 = vrot.slane %v4456_v17, %v7561_v34  ;;  %6661 = vmatmul.mubr.msk.f32.vlgmr.msra.gmra.mrb[58].mxu0 %vm1028_vm1, %v4237_v18  ;;  %v7094_v28 = vpack.c.bf16 %v4713_v62, %v4712_v20  ;;  %v7085_v14 = vpack.c.bf16 %v5891_v42, %v5890_v32  ;;  %v5895_v18 = vld [vmem:[%s9530_s5 + $0x78] sm:$0xff] }
 0x1bd   :  { %6650 = vmatmul.mubr.msk.f32.gmra.mrb[56].mxu1 %vm1028_vm1, %v4100_v46  ;;  %6663 = vmatprep.mubr.msk.f32.mxu0 %vm7210_vm0, %v9643_v16  ;;  %v4293_v24 = vrot.slane %v4286_v2, %v7561_v34  ;;  %v4479_v36 = vrot.slane %v5883_v15, %v7561_v34  ;;  %v7097_v52 = vpack.c.bf16 %v4715_v29, %v4714_v50 }
 0x1be   :  { %v4471_v35 = vcombine.low %v4463_v27, %v4470_v43  ;;  %6677 = vmatprep.mubr.msk.f32.mxu1 %vm7210_vm0, %v9643_v16  ;;  %7083 = vmatpush3.bf16.msra.mxu0 %v7082_v11  ;;  %v7088_v21 = vpack.c.bf16 %v5893_v23, %v5892_v47  ;;  %v7100_v61 = vpack.c.bf16 %v4717_v60, %v4716_v57 }
 0x1bf   :  { %v4486_v39 = vrot.slane %v4479_v36, %v7561_v34  ;;  %7084 = vmatprep.subr.bf16.mxu0 %v9649_v4  ;;  %v7103_v26 = vpack.c.bf16 %v4719_v31, %v4718_v25 }
 0x1c0   :  { %6664 = vmatmul.mubr.msk.f32.gmra.mrb[60].mxu0 %vm1028_vm1, %v4278_v49 }
 0x1c1   :  { %6678 = vmatmul.mubr.msk.f32.vlgmr.msra.gmra.mrb[58].mxu1 %vm1028_vm1, %v4430_v19  ;;  %6666 = vmatprep.mubr.msk.f32.mxu0 %vm7210_vm0, %v9643_v16  ;;  %v7091_v19 = vpack.c.bf16 %v5895_v18, %v5894_v48 }
 0x1c2   :  { %6680 = vmatprep.mubr.msk.f32.mxu1 %vm7210_vm0, %v9643_v16  ;;  %7095 = vmatpush3.bf16.msra.mxu1 %v7094_v28 }
 0x1c3   :  { %7096 = vmatprep.subr.bf16.mxu1 %v9649_v4  ;;  %7086 = vmatpush3.bf16.msra.mxu0 %v7085_v14 }
 0x1c4   :  { %6667 = vmatmul.mubr.msk.f32.gmra.mrb[62].mxu0 %vm1028_vm1, %v4293_v24  ;;  %7087 = vmatprep.subr.bf16.mxu0 %v9649_v4 }
 0x1c5   :  { %6681 = vmatmul.mubr.msk.f32.gmra.mrb[60].mxu1 %vm1028_vm1, %v4471_v35  ;;  %6702 = vmatprep.mubr.msk.f32.mxu0 %vm7210_vm0, %v9643_v16 }
 0x1c6   :  { %6683 = vmatprep.mubr.msk.f32.mxu1 %vm7210_vm0, %v9643_v16  ;;  %7098 = vmatpush3.bf16.msra.mxu1 %v7097_v52 }
 0x1c7   :  { %7099 = vmatprep.subr.bf16.mxu1 %v9649_v4  ;;  %7089 = vmatpush3.bf16.msra.mxu0 %v7088_v21 }
 0x1c8   :  { %7090 = vmatprep.subr.bf16.mxu0 %v9649_v4 }
 0x1c9   :  { %6684 = vmatmul.mubr.msk.f32.gmra.mrb[62].mxu1 %vm1028_vm1, %v4486_v39 }
 0x1ca   :  { %6721 = vmatprep.mubr.msk.f32.mxu1 %vm7210_vm0, %v9643_v16  ;;  %7101 = vmatpush3.bf16.msra.mxu1 %v7100_v61 }
 0x1cb   :  { %7102 = vmatprep.subr.bf16.mxu1 %v9649_v4  ;;  %7092 = vmatpush3.bf16.msra.mxu0 %v7091_v19 }
 0x1cc   :  { %7105 = vmatprep.subr.bf16.mxu0 %v9649_v4 }
 0x1ce   :  { %7104 = vmatpush3.bf16.msra.mxu1 %v7103_v26 }
 0x1cf   :  { %7117 = vmatprep.subr.bf16.mxu1 %v9649_v4 }
 0x201   :  { %v1101_v5 = vpop.f32.mrb[16].mxu0  ;;  %v1300_v30 = vpop.f32.mrb[16].mxu1 }
 0x202   :  { %v6424_v51 = vpop.f32.mrb[17].mxu0  ;;  %v1301_v56 = vadd.f32 %v1300_v30, %v1101_v5  ;;  %v6441_v44 = vpop.f32.mrb[17].mxu1 }
 0x219   :  { %v1106_v8 = vpop.f32.mrb[18].mxu0 }
 0x21a   :  { %v6427_v41 = vpop.f32.mrb[19].mxu0 }
 0x21f   :  { %v1305_v58 = vpop.f32.mrb[18].mxu1 }
 0x220   :  { %v1306_v59 = vadd.f32 %v1305_v58, %v1106_v8  ;;  %v6444_v55 = vpop.f32.mrb[19].mxu1  ;;  %v1111_v0 = vpop.f32.mrb[20].mxu0 }
 0x221   :  { %v6430_v12 = vpop.f32.mrb[21].mxu0 }
 0x22b   :  { %v1310_v9 = vpop.f32.mrb[20].mxu1 }
 0x22c   :  { %v1311_v37 = vadd.f32 %v1310_v9, %v1111_v0  ;;  %v6447_v1 = vpop.f32.mrb[21].mxu1 }
 0x235   :  { %v1510_v40 = vpop.f32.mrb[22].mxu0 }
 0x236   :  { %v1524_v3 = vadd.f32 %v1510_v40, %v1301_v56  ;;  %v6458_v53 = vpop.f32.mrb[23].mxu0 }
 0x238   :  { %v1723_v10 = vpop.f32.mrb[22].mxu1 }
 0x239   :  { %v1737_v38 = vadd.f32 %v1723_v10, %v1524_v3  ;;  %v6475_v22 = vpop.f32.mrb[23].mxu1 }
 0x245   :  { %v1515_v33 = vpop.f32.mrb[24].mxu0 }
 0x246   :  { %v1525_v54 = vadd.f32 %v1515_v33, %v1306_v59  ;;  %v6461_v13 = vpop.f32.mrb[25].mxu0 }
 0x24a   :  { %v1520_v45 = vpop.f32.mrb[26].mxu0 }
 0x24b   :  { %v1728_v17 = vpop.f32.mrb[24].mxu1  ;;  %v1526_v49 = vadd.f32 %v1520_v45, %v1311_v37  ;;  %v6464_v6 = vpop.f32.mrb[27].mxu0 }
 0x24c   :  { %v1738_v46 = vadd.f32 %v1728_v17, %v1525_v54  ;;  %v6478_v27 = vpop.f32.mrb[25].mxu1 }
 0x24e   :  { %v2068_v43 = vpop.f32.mrb[28].mxu0 }
 0x24f   :  { %v1733_v35 = vpop.f32.mrb[26].mxu1  ;;  %v2082_v2 = vadd.f32 %v2068_v43, %v1737_v38  ;;  %v6492_v15 = vpop.f32.mrb[29].mxu0 }
 0x250   :  { %v1739_v24 = vadd.f32 %v1733_v35, %v1526_v49  ;;  %v6481_v36 = vpop.f32.mrb[27].mxu1 }
 0x253   :  { %v2073_v39 = vpop.f32.mrb[30].mxu0 }
 0x254   :  { %v2413_v5 = vpop.f32.mrb[28].mxu1  ;;  %v2083_v30 = vadd.f32 %v2073_v39, %v1738_v46  ;;  %v6495_v51 = vpop.f32.mrb[31].mxu0 }
 0x255   :  { %v2427_v56 = vadd.f32 %v2413_v5, %v2082_v2  ;;  %v6509_v44 = vpop.f32.mrb[29].mxu1 }
 0x257   :  { %v2078_v8 = vpop.f32.mrb[32].mxu0 }
 0x258   :  { %v2418_v41 = vpop.f32.mrb[30].mxu1  ;;  %v2084_v58 = vadd.f32 %v2078_v8, %v1739_v24  ;;  %v6498_v59 = vpop.f32.mrb[33].mxu0 }
 0x259   :  { %v2428_v55 = vadd.f32 %v2418_v41, %v2083_v30  ;;  %v6512_v0 = vpop.f32.mrb[31].mxu1 }
 0x25b   :  { %v2626_v12 = vpop.f32.mrb[34].mxu0 }
 0x25c   :  { %v2423_v7 = vpop.f32.mrb[32].mxu1  ;;  %v2640_v63 = vadd.f32 %v2626_v12, %v2427_v56  ;;  %v6526_v20 = vpop.f32.mrb[35].mxu0 }
 0x25d   :  { %v2429_v11 = vadd.f32 %v2423_v7, %v2084_v58  ;;  %v6515_v62 = vpop.f32.mrb[33].mxu1 }
 0x260   :  { %v2631_v32 = vpop.f32.mrb[36].mxu0 }
 0x261   :  { %v2839_v42 = vpop.f32.mrb[34].mxu1  ;;  %v2641_v9 = vadd.f32 %v2631_v32, %v2428_v55  ;;  %v6529_v28 = vpop.f32.mrb[37].mxu0 }
 0x262   :  { %v2853_v50 = vadd.f32 %v2839_v42, %v2640_v63  ;;  %v6543_v29 = vpop.f32.mrb[35].mxu1 }
 0x265   :  { %v2636_v37 = vpop.f32.mrb[38].mxu0 }
 0x266   :  { %v2844_v1 = vpop.f32.mrb[36].mxu1  ;;  %v2642_v14 = vadd.f32 %v2636_v37, %v2429_v11  ;;  %v6532_v52 = vpop.f32.mrb[39].mxu0 }
 0x267   :  { %v2854_v47 = vadd.f32 %v2844_v1, %v2641_v9  ;;  %v6546_v23 = vpop.f32.mrb[37].mxu1 }
 0x269   :  { %v3076_v57 = vpop.f32.mrb[40].mxu0 }
 0x26a   :  { %v2849_v60 = vpop.f32.mrb[38].mxu1  ;;  %v3090_v21 = vadd.f32 %v3076_v57, %v2853_v50  ;;  %v6560_v61 = vpop.f32.mrb[41].mxu0 }
 0x26b   :  { %v2855_v48 = vadd.f32 %v2849_v60, %v2642_v14  ;;  %v6549_v18 = vpop.f32.mrb[39].mxu1  ;;  %v5887_v60 = vld [vmem:[%s9531_s4] ss:$0 sm:$0xff] }
 0x26d   :  { %v3081_v25 = vpop.f32.mrb[42].mxu0 }
 0x26e   :  { %v3313_v31 = vpop.f32.mrb[40].mxu1  ;;  %v3091_v40 = vadd.f32 %v3081_v25, %v2854_v47  ;;  %v6563_v19 = vpop.f32.mrb[43].mxu0 }
 0x26f   :  { %v3327_v3 = vadd.f32 %v3313_v31, %v3090_v21  ;;  %v6577_v53 = vpop.f32.mrb[41].mxu1 }
 0x271   :  { %v3086_v26 = vpop.f32.mrb[44].mxu0 }
 0x272   :  { %v3318_v10 = vpop.f32.mrb[42].mxu1  ;;  %v3092_v38 = vadd.f32 %v3086_v26, %v2855_v48  ;;  %v6566_v22 = vpop.f32.mrb[45].mxu0 }
 0x273   :  { %v3328_v33 = vadd.f32 %v3318_v10, %v3091_v40  ;;  %v6580_v54 = vpop.f32.mrb[43].mxu1 }
 0x275   :  { %v3506_v13 = vpop.f32.mrb[46].mxu0 }
 0x276   :  { %v3323_v45 = vpop.f32.mrb[44].mxu1  ;;  %v3520_v17 = vadd.f32 %v3506_v13, %v3327_v3  ;;  %v6594_v49 = vpop.f32.mrb[47].mxu0 }
 0x277   :  { %v3329_v6 = vadd.f32 %v3323_v45, %v3092_v38  ;;  %v6583_v46 = vpop.f32.mrb[45].mxu1 }
 0x27a   :  { %v3511_v27 = vpop.f32.mrb[48].mxu0 }
 0x27b   :  { %v3699_v43 = vpop.f32.mrb[46].mxu1  ;;  %v3521_v35 = vadd.f32 %v3511_v27, %v3328_v33  ;;  %v6597_v2 = vpop.f32.mrb[49].mxu0 }
 0x27c   :  { %v3713_v15 = vadd.f32 %v3699_v43, %v3520_v17  ;;  %v6611_v24 = vpop.f32.mrb[47].mxu1 }
 0x27f   :  { %v3516_v36 = vpop.f32.mrb[50].mxu0 }
 0x280   :  { %v3704_v39 = vpop.f32.mrb[48].mxu1  ;;  %v3522_v5 = vadd.f32 %v3516_v36, %v3329_v6  ;;  %v6600_v30 = vpop.f32.mrb[51].mxu0 }
 0x281   :  { %v3714_v51 = vadd.f32 %v3704_v39, %v3521_v35  ;;  %v6614_v56 = vpop.f32.mrb[49].mxu1 }
 0x283   :  { %v3936_v44 = vpop.f32.mrb[52].mxu0 }
 0x284   :  { %v3709_v8 = vpop.f32.mrb[50].mxu1  ;;  %v3950_v41 = vadd.f32 %v3936_v44, %v3713_v15  ;;  %v6628_v58 = vpop.f32.mrb[53].mxu0 }
 0x285   :  { %v3715_v59 = vadd.f32 %v3709_v8, %v3522_v5  ;;  %v6617_v55 = vpop.f32.mrb[51].mxu1 }
 0x287   :  { %v3941_v0 = vpop.f32.mrb[54].mxu0 }
 0x288   :  { %v4173_v12 = vpop.f32.mrb[52].mxu1  ;;  %v3951_v7 = vadd.f32 %v3941_v0, %v3714_v51  ;;  %v6631_v63 = vpop.f32.mrb[55].mxu0 }
 0x289   :  { %v4187_v20 = vadd.f32 %v4173_v12, %v3950_v41  ;;  %v6645_v11 = vpop.f32.mrb[53].mxu1 }
 0x28b   :  { %v3946_v62 = vpop.f32.mrb[56].mxu0 }
 0x28c   :  { %v4178_v32 = vpop.f32.mrb[54].mxu1  ;;  %v3952_v42 = vadd.f32 %v3946_v62, %v3715_v59  ;;  %v6634_v9 = vpop.f32.mrb[57].mxu0 }
 0x28d   :  { %v4188_v28 = vadd.f32 %v4178_v32, %v3951_v7  ;;  %v6648_v50 = vpop.f32.mrb[55].mxu1  ;;  %v5898_v7 = vld [vmem:[%s9530_s5 + $0x80] sm:$0xff]  ;;  %v5899_v32 = vld [vmem:[%s9530_s5 + $0x88] sm:$0xff] }
 0x28e   :  { %v5909_v9 = vld [vmem:[%s9530_s5 + $0xc8] sm:$0xff] }
 0x28f   :  { %v4366_v29 = vpop.f32.mrb[58].mxu0 }
 0x290   :  { %v4183_v37 = vpop.f32.mrb[56].mxu1  ;;  %v4380_v1 = vadd.f32 %v4366_v29, %v4187_v20  ;;  %v6662_v14 = vpop.f32.mrb[59].mxu0 }
 0x291   :  { %v4189_v52 = vadd.f32 %v4183_v37, %v3952_v42  ;;  %v6651_v47 = vpop.f32.mrb[57].mxu1  ;;  %v5908_v42 = vld [vmem:[%s9530_s5 + $0xc0] sm:$0xff] }
 0x293   :  { %v4371_v23 = vpop.f32.mrb[60].mxu0 }
 0x294   :  { %v4559_v57 = vpop.f32.mrb[58].mxu1  ;;  %v4381_v21 = vadd.f32 %v4371_v23, %v4188_v28  ;;  %v6665_v61 = vpop.f32.mrb[61].mxu0  ;;  %v7106_v23 = vpack.c.bf16 %v5899_v32, %v5898_v7  ;;  %v5930_v7 = vld [vmem:[%s9530_s5 + $0x160] sm:$0xff]  ;;  %v5924_v32 = vld [vmem:[%s9530_s5 + $0x138] sm:$0xff] }
 0x295   :  { %v4573_v48 = vadd.f32 %v4559_v57, %v4380_v1  ;;  %v6679_v18 = vpop.f32.mrb[59].mxu1  ;;  %v7118_v57 = vpack.c.bf16 %v5909_v9, %v5908_v42  ;;  %v5932_v42 = vld [vmem:[%s9530_s5 + $0x170] sm:$0xff]  ;;  %v5933_v9 = vld [vmem:[%s9530_s5 + $0x178] sm:$0xff] }
 0x296   :  { %v5901_v18 = vld [vmem:[%s9530_s5 + $0x98] sm:$0xff] }
 0x297   :  { %v4583_v25 = vadd.f32 %v5887_v60, %v4573_v48  ;;  %v4376_v31 = vpop.f32.mrb[62].mxu0 }
 0x298   :  { %v4564_v40 = vpop.f32.mrb[60].mxu1  ;;  %v4382_v19 = vadd.f32 %v4376_v31, %v4189_v52  ;;  %v6668_v3 = vpop.f32.mrb[63].mxu0  ;;  %v5911_v31 = vld [vmem:[%s9530_s5 + $0xd8] sm:$0xff] }
 0x299   :  { %v4586_v53 = vmax.f32 %v4583_v25, 0.0  ;;  %v4574_v26 = vadd.f32 %v4564_v40, %v4381_v21  ;;  %v6682_v10 = vpop.f32.mrb[61].mxu1  ;;  %v5910_v25 = vld [vmem:[%s9530_s5 + $0xd0] sm:$0xff] }
 0x29a   :  { %v7121_v3 = vpack.c.bf16 %v5911_v31, %v5910_v25  ;;  %v5912_v10 = vld [vmem:[%s9530_s5 + $0xe0] sm:$0xff]  ;;  %v5938_v31 = vld [vmem:[%s9530_s5 + $0x198] sm:$0xff] }
 0x29b   :  { %v4592_v38 = vcombine.high %v4586_v53, %v4586_v53  ;;  %v4599_v22 = vrot.slane %v4586_v53, %v7561_v34  ;;  %v4584_v33 = vadd.f32 %v5887_v60, %v4574_v26  ;;  %v5902_v53 = vld [vmem:[%s9530_s5 + $0xa0] sm:$0xff]  ;;  %v5903_v26 = vld [vmem:[%s9530_s5 + $0xa8] sm:$0xff] }
 0x29c   :  { %v4569_v54 = vpop.f32.mrb[62].mxu1 }
 0x29d   :  { %v4606_v13 = vrot.slane %v4592_v38, %v7561_v34  ;;  %v4607_v45 = vcombine.high %v4599_v22, %v4599_v22  ;;  %v4587_v17 = vmax.f32 %v4584_v33, 0.0  ;;  %v6685_v49 = vpop.f32.mrb[63].mxu1  ;;  %v4575_v6 = vadd.f32 %v4569_v54, %v4382_v19  ;;  %v5913_v38 = vld [vmem:[%s9530_s5 + $0xe8] sm:$0xff]  ;;  %v5904_v54 = vld [vmem:[%s9530_s5 + $0xb0] sm:$0xff] }
 0x29e   :  { %v9176_v5 = vrot.slane %v4599_v22, %v7561_v34  ;;  %v7112_v22 = vpack.c.bf16 %v5903_v26, %v5902_v53  ;;  %v7124_v33 = vpack.c.bf16 %v5913_v38, %v5912_v10  ;;  %v5939_v10 = vld [vmem:[%s9530_s5 + $0x1a0] sm:$0xff]  ;;  %v5940_v38 = vld [vmem:[%s9530_s5 + $0x1a8] sm:$0xff] }
 0x29f   :  { %v4629_v46 = vrot.slane %v4607_v45, %v7561_v34  ;;  %v4641_v27 = vcombine.high %v4587_v17, %v4587_v17  ;;  %v4608_v43 = vcombine.high %v4606_v13, %v4606_v13  ;;  %v4648_v35 = vrot.slane %v4587_v17, %v7561_v34  ;;  %v5914_v45 = vld [vmem:[%s9530_s5 + $0xf0] sm:$0xff]  ;;  %v5915_v17 = vld [vmem:[%s9530_s5 + $0xf8] sm:$0xff] }
 0x2a0   :  { %v4585_v2 = vadd.f32 %v5887_v60, %v4575_v6  ;;  %v9187_v59 = vrot.slane %v4606_v13, %v7561_v34  ;;  %v5900_v60 = vld [vmem:[%s9530_s5 + $0x90] sm:$0xff]  ;;  %v5905_v13 = vld [vmem:[%s9530_s5 + $0xb8] sm:$0xff]  ;;  %v7127_v6 = vpack.c.bf16 %v5915_v17, %v5914_v45 }
 0x2a1   :  { %v4655_v15 = vrot.slane %v4641_v27, %v7561_v34  ;;  %v4656_v24 = vcombine.high %v4648_v35, %v4648_v35  ;;  %v9173_v36 = vrot.slane %v4648_v35, %v7561_v34  ;;  %v4639_v30 = vcombine.high %v4629_v46, %v4629_v46  ;;  %v5918_v35 = vld [vmem:[%s9530_s5 + $0x108] sm:$0xff]  ;;  %v5941_v45 = vld [vmem:[%s9530_s5 + $0x1b0] sm:$0xff]  ;;  %v5942_v17 = vld [vmem:[%s9530_s5 + $0x1b8] sm:$0xff] }
 0x2a2   :  { %v4588_v39 = vmax.f32 %v4585_v2, 0.0  ;;  %v4636_v44 = vrot.slane %v4608_v43, %v7561_v34  ;;  %v7109_v19 = vpack.c.bf16 %v5901_v18, %v5900_v60  ;;  %v7115_v49 = vpack.c.bf16 %v5905_v13, %v5904_v54  ;;  %v5926_v2 = vld [vmem:[%s9530_s5 + $0x140] sm:$0xff] }
 0x2a3   :  { %v4657_v51 = vcombine.high %v4655_v15, %v4655_v15  ;;  %v4671_v56 = vrot.slane %v4655_v15, %v7561_v34  ;;  %v9181_v8 = vrot.slane %v4656_v24, %v7561_v34  ;;  %v4686_v41 = vcombine.high %v9173_v36, %v9173_v36  ;;  %v5927_v15 = vld [vmem:[%s9530_s5 + $0x148] sm:$0xff]  ;;  %v5945_v60 = vld [vmem:[%s9530_s5 + $0x1c0] sm:$0xff] }
 0x2a4   :  { %v4696_v58 = vrot.slane %v4588_v39, %v7561_v34  ;;  %v4640_v14 = vcombine.high %v4636_v44, %v4636_v44  ;;  %v7142_v39 = vpack.c.bf16 %v5927_v15, %v5926_v2  ;;  %v7160_v54 = vpack.c.bf16 %v5940_v38, %v5939_v10  ;;  %v5954_v2 = vld [vmem:[%s9530_s5 + $0x200] sm:$0xff]  ;;  %v5955_v15 = vld [vmem:[%s9530_s5 + $0x208] sm:$0xff] }
 0x2a5   :  { %v9190_v55 = vrot.slane %v4657_v51, %v7561_v34  ;;  %v4687_v0 = vcombine.high %v4671_v56, %v4671_v56  ;;  %v9192_v12 = vcombine.low %v4639_v30, %v4671_v56  ;;  %v4729_v63 = vcombine.low %v4629_v46, %v4686_v41  ;;  %v5917_v46 = vld [vmem:[%s9530_s5 + $0x100] sm:$0xff]  ;;  %v5920_v56 = vld [vmem:[%s9530_s5 + $0x118] sm:$0xff] }
 0x2a6   :  { %v4817_v20 = vcombine.low %v9176_v5, %v9181_v8  ;;  %v5906_v11 = vcombine.high %v9176_v5, %v9181_v8  ;;  %v4697_v62 = vcombine.high %v4696_v58, %v4696_v58  ;;  %v4704_v52 = vrot.slane %v4696_v58, %v7561_v34  ;;  %v5919_v5 = vld [vmem:[%s9530_s5 + $0x110] sm:$0xff]  ;;  %v5929_v8 = vld [vmem:[%s9530_s5 + $0x158] sm:$0xff] }
 0x2a7   :  { %v5107_v28 = vcombine.low %v9187_v59, %v9190_v55  ;;  %v9212_v50 = vcombine.low %v4636_v44, %v4687_v0  ;;  %v5943_v29 = vcombine.high %v9187_v59, %v9190_v55  ;;  %v4736_v37 = vrot.slane %v4729_v63, %v7561_v34  ;;  %v5928_v44 = vld [vmem:[%s9530_s5 + $0x150] sm:$0xff]  ;;  %v5921_v0 = vld [vmem:[%s9530_s5 + $0x120] sm:$0xff]  ;;  %v5931_v63 = vld [vmem:[%s9530_s5 + $0x168] sm:$0xff] }
 0x2a8   :  { %v4824_v1 = vrot.slane %v4817_v20, %v7561_v34  ;;  %v9220_v47 = vrot.slane %v4697_v62, %v7561_v34  ;;  %v9227_v48 = vcombine.low %v4640_v14, %v4704_v52  ;;  %v4920_v27 = vrot.slane %v5906_v11, %v7561_v34  ;;  %v5923_v62 = vld [vmem:[%s9530_s5 + $0x130] sm:$0xff]  ;;  %v5935_v14 = vld [vmem:[%s9530_s5 + $0x180] sm:$0xff]  ;;  %v5957_v55 = vld [vmem:[%s9530_s5 + $0x218] sm:$0xff] }
 0x2a9   :  { %v4743_v21 = vrot.slane %v4736_v37, %v7561_v34  ;;  %v5017_v43 = vrot.slane %v9192_v12, %v7561_v34  ;;  %v7130_v24 = vpack.c.bf16 %v5918_v35, %v5917_v46  ;;  %v7133_v41 = vpack.c.bf16 %v5920_v56, %v5919_v5  ;;  %v5922_v12 = vld [vmem:[%s9530_s5 + $0x128] sm:$0xff]  ;;  %v5956_v59 = vld [vmem:[%s9530_s5 + $0x210] sm:$0xff]  ;;  %v5958_v5 = vld [vmem:[%s9530_s5 + $0x220] sm:$0xff] }
 0x2aa   :  { %v4831_v61 = vrot.slane %v4824_v1, %v7561_v34  ;;  %v5495_v40 = vcombine.low %v9173_v36, %v9220_v47  ;;  %v4927_v30 = vrot.slane %v4920_v27, %v7561_v34  ;;  %v7145_v58 = vpack.c.bf16 %v5929_v8, %v5928_v44  ;;  %v5960_v56 = vld [vmem:[%s9530_s5 + $0x230] sm:$0xff]  ;;  %v5961_v44 = vld [vmem:[%s9530_s5 + $0x238] sm:$0xff]  ;;  %v5592_v36 = vld [vmem:[%s9532_s7] sm:$0xff] }
 0x2ab   :  { %6703 = vmatmul.mubr.msk.f32.vlgmr.msra.gmra.mrb[64].mxu0 %vm4744_vm2, %v4743_v21  ;;  %v5024_v51 = vrot.slane %v5017_v43, %v7561_v34  ;;  %v7136_v20 = vpack.c.bf16 %v5922_v12, %v5921_v0  ;;  %v7148_v11 = vpack.c.bf16 %v5931_v63, %v5930_v7  ;;  %v7139_v37 = vpack.c.bf16 %v5924_v32, %v5923_v62  ;;  %v5946_v21 = vld [vmem:[%s9530_s5 + $0x1c8] sm:$0xff]  ;;  %v5595_v0 = vld [vmem:[%s9532_s7 + $0x18] sm:$0xff]  ;;  %v5596_v63 = vld [vmem:[%s9532_s7 + $0x20] sm:$0xff] }
 0x2ac   :  { %6722 = vmatmul.mubr.msk.f32.vlgmr.msra.gmra.mrb[64].mxu1 %vm4744_vm2, %v4831_v61  ;;  %7107 = vmatpush3.bf16.msra.mxu0 %v7106_v23  ;;  %v7151_v1 = vpack.c.bf16 %v5933_v9, %v5932_v42  ;;  %v5114_v52 = vrot.slane %v5107_v28, %v7561_v34  ;;  %v5211_v23 = vrot.slane %v9212_v50, %v7561_v34  ;;  %v5937_v28 = vld [vmem:[%s9530_s5 + $0x190] sm:$0xff]  ;;  %v5603_v62 = vld [vmem:[%s9532_s7 + $0x58] sm:$0xff]  ;;  %v5600_v9 = vld [vmem:[%s9532_s7 + $0x40] sm:$0xff] }
 0x2ad   :  { %7119 = vmatpush3.bf16.msra.mxu1 %v7118_v57  ;;  %7108 = vmatprep.subr.bf16.mxu0 %v9649_v4  ;;  %v5936_v57 = vld [vmem:[%s9530_s5 + $0x188] sm:$0xff]  ;;  %v7166_v18 = vpack.c.bf16 %v5946_v21, %v5945_v60  ;;  %v7157_v53 = vpack.c.bf16 %v5938_v31, %v5937_v28  ;;  %v7163_v46 = vpack.c.bf16 %v5942_v17, %v5941_v45 }
 0x2ae   :  { %7120 = vmatprep.subr.bf16.mxu1 %v9649_v4  ;;  %6740 = vmatprep.mubr.msk.f32.mxu0 %vm7210_vm0, %v9643_v16  ;;  %v7154_v61 = vpack.c.bf16 %v5936_v57, %v5935_v14  ;;  %v5121_v50 = vrot.slane %v5114_v52, %v7561_v34  ;;  %v5218_v25 = vrot.slane %v5211_v23, %v7561_v34  ;;  %v5607_v52 = vld [vmem:[%s9532_s7 + $0x78] sm:$0xff]  ;;  %v5604_v23 = vld [vmem:[%s9532_s7 + $0x60] sm:$0xff]  ;;  %v5606_v57 = vld [vmem:[%s9532_s7 + $0x70] sm:$0xff] }
 0x2af   :  { %6759 = vmatprep.mubr.msk.f32.mxu1 %vm7210_vm0, %v9643_v16  ;;  %v5405_v43 = vrot.slane %v9227_v48, %v7561_v34  ;;  %v5308_v35 = vrot.slane %v5943_v29, %v7561_v34  ;;  %v7178_v48 = vpack.c.bf16 %v5955_v15, %v5954_v2  ;;  %v7181_v29 = vpack.c.bf16 %v5957_v55, %v5956_v59  ;;  %v5963_v2 = vld [vmem:[%s9533_s6] ss:$0 sm:$0xff]  ;;  %v9772_v55 = vld [vmem:[#allocation3_spill] sm:$0xff] }
 0x2b0   :  { %7110 = vmatpush3.bf16.msra.mxu0 %v7109_v19  ;;  %v5947_v19 = vld [vmem:[%s9530_s5 + $0x1d0] sm:$0xff]  ;;  %v7187_v8 = vpack.c.bf16 %v5961_v44, %v5960_v56  ;;  %v7203_v21 = vpack.c.bf16 %v5606_v57, %v5604_v23  ;;  %v16_v59 = vstv %s9534_s10  ;;  %v5696_v44 = vld [vmem:[%s9536_s9] sm:$0x3] }
 0x2b1   :  { %7122 = vmatpush3.bf16.msra.mxu1 %v7121_v3  ;;  %7111 = vmatprep.subr.bf16.mxu0 %v9649_v4  ;;  %v5948_v3 = vld [vmem:[%s9530_s5 + $0x1d8] sm:$0xff]  ;;  %17 = vst [vmem:[#allocation2] sm:$0x1] %v16_v59 }
 0x2b2   :  { %7123 = vmatprep.subr.bf16.mxu1 %v9649_v4  ;;  %v7169_v26 = vpack.c.bf16 %v5948_v3, %v5947_v19 }
 0x2b4   :  { %7113 = vmatpush3.bf16.msra.mxu0 %v7112_v22  ;;  %v5949_v22 = vld [vmem:[%s9530_s5 + $0x1e0] sm:$0xff] }
 0x2b5   :  { %7125 = vmatpush3.bf16.msra.mxu1 %v7124_v33  ;;  %7114 = vmatprep.subr.bf16.mxu0 %v9649_v4  ;;  %v5950_v33 = vld [vmem:[%s9530_s5 + $0x1e8] sm:$0xff] }
 0x2b6   :  { %7126 = vmatprep.subr.bf16.mxu1 %v9649_v4  ;;  %v7172_v13 = vpack.c.bf16 %v5950_v33, %v5949_v22 }
 0x2b8   :  { %7116 = vmatpush3.bf16.msra.mxu0 %v7115_v49  ;;  %v5951_v49 = vld [vmem:[%s9530_s5 + $0x1f0] sm:$0xff] }
 0x2b9   :  { %7128 = vmatpush3.bf16.msra.mxu1 %v7127_v6  ;;  %7129 = vmatprep.subr.bf16.mxu0 %v9649_v4  ;;  %v5952_v6 = vld [vmem:[%s9530_s5 + $0x1f8] sm:$0xff] }
 0x2ba   :  { %7141 = vmatprep.subr.bf16.mxu1 %v9649_v4  ;;  %v7175_v27 = vpack.c.bf16 %v5952_v6, %v5951_v49 }
 0x2bb   :  { %6741 = vmatmul.mubr.msk.f32.vlgmr.msra.gmra.mrb[66].mxu0 %vm4744_vm2, %v4927_v30  ;;  %v5959_v30 = vld [vmem:[%s9530_s5 + $0x228] sm:$0xff] }
 0x2bc   :  { %6760 = vmatmul.mubr.msk.f32.vlgmr.msra.gmra.mrb[66].mxu1 %vm4744_vm2, %v5024_v51  ;;  %7131 = vmatpush3.bf16.msra.mxu0 %v7130_v24  ;;  %v5315_v24 = vrot.slane %v5308_v35, %v7561_v34  ;;  %v7184_v51 = vpack.c.bf16 %v5959_v30, %v5958_v5  ;;  %v5608_v5 = vld [vmem:[%s9535_s8] sm:$0x3]  ;;  %v5616_v30 = vsub.s32 1, %v9772_v55 }
 0x2bd   :  { %7143 = vmatpush3.bf16.msra.mxu1 %v7142_v39  ;;  %7132 = vmatprep.subr.bf16.mxu0 %v9649_v4  ;;  %v5412_v39 = vrot.slane %v5405_v43, %v7561_v34 }
 0x2be   :  { %7144 = vmatprep.subr.bf16.mxu1 %v9649_v4  ;;  %6778 = vmatprep.mubr.msk.f32.mxu0 %vm7210_vm0, %v9643_v16  ;;  %v5617_v56 = vrot.slane %v5608_v5, %v5616_v30 }
 0x2bf   :  { %6797 = vmatprep.mubr.msk.f32.mxu1 %vm7210_vm0, %v9643_v16 }
 0x2c0   :  { %7134 = vmatpush3.bf16.msra.mxu0 %v7133_v41  ;;  %v5502_v41 = vrot.slane %v5495_v40, %v7561_v34  ;;  %v5599_v40 = vld [vmem:[%s9532_s7 + $0x38] sm:$0xff] }
 0x2c1   :  { %7146 = vmatpush3.bf16.msra.mxu1 %v7145_v58  ;;  %7135 = vmatprep.subr.bf16.mxu0 %v9649_v4  ;;  %v5593_v58 = vld [vmem:[%s9532_s7 + $0x8] sm:$0xff] }
 0x2c2   :  { %7147 = vmatprep.subr.bf16.mxu1 %v9649_v4  ;;  %v7189_v47 = vpack.c.bf16 %v5595_v0, %v5593_v58 }
 0x2c4   :  { %7137 = vmatpush3.bf16.msra.mxu0 %v7136_v20  ;;  %v5598_v20 = vld [vmem:[%s9532_s7 + $0x30] sm:$0xff] }
 0x2c5   :  { %7149 = vmatpush3.bf16.msra.mxu1 %v7148_v11  ;;  %7138 = vmatprep.subr.bf16.mxu0 %v9649_v4  ;;  %v5601_v11 = vld [vmem:[%s9532_s7 + $0x48] sm:$0xff]  ;;  %v7195_v32 = vpack.c.bf16 %v5598_v20, %v5596_v63  ;;  %v5965_v20 = vld [vmem:[#allocation2] ss:$0 sm:$0xff] }
 0x2c6   :  { %7150 = vmatprep.subr.bf16.mxu1 %v9649_v4  ;;  %v7197_v42 = vpack.c.bf16 %v5603_v62, %v5601_v11 }
 0x2c8   :  { %7140 = vmatpush3.bf16.msra.mxu0 %v7139_v37  ;;  %v5602_v37 = vld [vmem:[%s9532_s7 + $0x50] sm:$0xff] }
 0x2c9   :  { %7152 = vmatpush3.bf16.msra.mxu1 %v7151_v1  ;;  %7153 = vmatprep.subr.bf16.mxu0 %v9649_v4  ;;  %v5605_v1 = vld [vmem:[%s9532_s7 + $0x68] sm:$0xff]  ;;  %v7199_v14 = vpack.c.bf16 %v5602_v37, %v5600_v9 }
 0x2ca   :  { %7165 = vmatprep.subr.bf16.mxu1 %v9649_v4  ;;  %v7201_v60 = vpack.c.bf16 %v5607_v52, %v5605_v1 }
 0x2cb   :  { %6779 = vmatmul.mubr.msk.f32.vlgmr.msra.gmra.mrb[68].mxu0 %vm4744_vm2, %v5121_v50 }
 0x2cc   :  { %6798 = vmatmul.mubr.msk.f32.vlgmr.msra.gmra.mrb[68].mxu1 %vm4744_vm2, %v5218_v25  ;;  %7155 = vmatpush3.bf16.msra.mxu0 %v7154_v61 }
 0x2cd   :  { %7167 = vmatpush3.bf16.msra.mxu1 %v7166_v18  ;;  %7156 = vmatprep.subr.bf16.mxu0 %v9649_v4 }
 0x2ce   :  { %7168 = vmatprep.subr.bf16.mxu1 %v9649_v4  ;;  %6816 = vmatprep.mubr.msk.f32.mxu0 %vm7210_vm0, %v9643_v16 }
 0x2cf   :  { %6835 = vmatprep.mubr.msk.f32.mxu1 %vm7210_vm0, %v9643_v16 }
 0x2d0   :  { %7158 = vmatpush3.bf16.msra.mxu0 %v7157_v53 }
 0x2d1   :  { %7170 = vmatpush3.bf16.msra.mxu1 %v7169_v26  ;;  %7159 = vmatprep.subr.bf16.mxu0 %v9649_v4 }
 0x2d2   :  { %7171 = vmatprep.subr.bf16.mxu1 %v9649_v4 }
 0x2d4   :  { %7161 = vmatpush3.bf16.msra.mxu0 %v7160_v54 }
 0x2d5   :  { %7173 = vmatpush3.bf16.msra.mxu1 %v7172_v13  ;;  %7162 = vmatprep.subr.bf16.mxu0 %v9649_v4 }
 0x2d6   :  { %7174 = vmatprep.subr.bf16.mxu1 %v9649_v4 }
 0x2d8   :  { %7164 = vmatpush3.bf16.msra.mxu0 %v7163_v46 }
 0x2d9   :  { %7176 = vmatpush3.bf16.msra.mxu1 %v7175_v27  ;;  %7177 = vmatprep.subr.bf16.mxu0 %v9649_v4 }
 0x2da   :  { %7190 = vmatprep.subr.bf16.mxu1 %v7189_v47 }
 0x2db   :  { %6817 = vmatmul.mubr.msk.f32.vlgmr.msra.gmra.mrb[70].mxu0 %vm4744_vm2, %v5315_v24 }
 0x2dc   :  { %6836 = vmatmul.mubr.msk.f32.vlgmr.msra.gmra.mrb[70].mxu1 %vm4744_vm2, %v5412_v39  ;;  %7179 = vmatpush3.bf16.msra.mxu0 %v7178_v48 }
 0x2dd   :  { %6854 = vmatprep.mubr.msk.f32.mxu0 %vm7210_vm0, %v9643_v16  ;;  %7180 = vmatprep.subr.bf16.mxu0 %v9649_v4 }
 0x2de   :  { %5687 = vmatprep.mubr.f32.mxu1 %v9643_v16  ;;  %v5509_v16 = vrot.slane %v5502_v41, %v7561_v34  ;;  %v5597_v34 = vld [vmem:[%s9532_s7 + $0x28] sm:$0xff] }
 0x2df   :  { %v7193_v7 = vpack.c.bf16 %v5599_v40, %v5597_v34 }
 0x2e0   :  { %7182 = vmatpush3.bf16.msra.mxu0 %v7181_v29  ;;  %v5612_v29 = vsub.s32 0, %v9772_v55 }
 0x2e1   :  { %7183 = vmatprep.subr.bf16.mxu0 %v9649_v4 }
 0x2e2   :  { %v5701_v58 = vrot.slane %v5696_v44, %v5612_v29 }
 0x2e4   :  { %7185 = vmatpush3.bf16.msra.mxu0 %v7184_v51  ;;  %v5613_v51 = vrot.slane %v5608_v5, %v5612_v29 }
 0x2e5   :  { %7186 = vmatprep.subr.bf16.mxu0 %v9649_v4  ;;  %v5594_v4 = vld [vmem:[%s9532_s7 + $0x10] sm:$0xff] }
 0x2e6   :  { %v7191_v12 = vpack.c.bf16 %v5594_v4, %v5592_v36  ;;  %v5705_v36 = vrot.slane %v5696_v44, %v5616_v30 }
 0x2e8   :  { %7188 = vmatpush3.bf16.msra.mxu0 %v7187_v8  ;;  %7192 = vmatpush1.bf16.msra.mxu1 %v7191_v12 }
 0x2e9   :  { %7194 = vmatprep.subr.bf16.mxu1 %v7193_v7 }
 0x2eb   :  { %6855 = vmatmul.mubr.msk.f32.vlgmr.msra.gmra.mrb[72].mxu0 %vm4744_vm2, %v5509_v16 }
 0x2ec   :  { %7196 = vmatpush1.bf16.msra.mxu1 %v7195_v32 }
 0x2ed   :  { %7198 = vmatprep.subr.bf16.mxu1 %v7197_v42 }
 0x2f0   :  { %7200 = vmatpush1.bf16.msra.mxu1 %v7199_v14 }
 0x2f1   :  { %7202 = vmatprep.subr.bf16.mxu1 %v7201_v60 }
 0x2f4   :  { %7204 = vmatpush1.bf16.msra.mxu1 %v7203_v21 }
 0x37e   :  { %v4813_v61 = vpop.f32.mrb[64].mxu0 }
 0x37f   :  { %v4900_v18 = vpop.f32.mrb[64].mxu1  ;;  %v6704_v50 = vpop.f32.mrb[65].mxu0 }
 0x380   :  { %v4901_v28 = vadd.f32 %v4900_v18, %v4813_v61  ;;  %v6723_v25 = vpop.f32.mrb[65].mxu1 }
 0x38e   :  { %v4996_v31 = vpop.f32.mrb[66].mxu0 }
 0x38f   :  { %v5093_v19 = vpop.f32.mrb[66].mxu1  ;;  %v5000_v3 = vadd.f32 %v4996_v31, %v4901_v28  ;;  %v6742_v53 = vpop.f32.mrb[67].mxu0 }
 0x390   :  { %v6761_v26 = vpop.f32.mrb[67].mxu1 }
 0x391   :  { %v5097_v10 = vadd.f32 %v5093_v19, %v5000_v3 }
 0x39e   :  { %v5190_v38 = vpop.f32.mrb[68].mxu0 }
 0x39f   :  { %v5287_v22 = vpop.f32.mrb[68].mxu1  ;;  %v5194_v33 = vadd.f32 %v5190_v38, %v5097_v10  ;;  %v6780_v54 = vpop.f32.mrb[69].mxu0 }
 0x3a0   :  { %v6799_v13 = vpop.f32.mrb[69].mxu1 }
 0x3a1   :  { %v5291_v45 = vadd.f32 %v5287_v22, %v5194_v33 }
 0x3ae   :  { %v5384_v17 = vpop.f32.mrb[70].mxu0 }
 0x3af   :  { %v5481_v49 = vpop.f32.mrb[70].mxu1  ;;  %v5388_v6 = vadd.f32 %v5384_v17, %v5291_v45  ;;  %v6818_v46 = vpop.f32.mrb[71].mxu0 }
 0x3b0   :  { %v6837_v27 = vpop.f32.mrb[71].mxu1 }
 0x3b1   :  { %v5485_v43 = vadd.f32 %v5481_v49, %v5388_v6 }
 0x3be   :  { %v5578_v35 = vpop.f32.mrb[72].mxu0 }
 0x3bf   :  { %v5582_v15 = vadd.f32 %v5578_v35, %v5485_v43  ;;  %v6856_v48 = vpop.f32.mrb[73].mxu0 }
 0x3c1   :  { %v5590_v24 = vadd.f32 %v5963_v2, %v5582_v15 }
 0x3c3   :  { %v5591_v39 = vmax.f32 %v5590_v24, 0.0 }
 0x3c5   :  { %5964 = vmatmul.mubr.msk.f32.vlgmr.msra.gmra.mrb[72].mxu1 %vm4744_vm2, %v5591_v39 }
 0x498   :  { %v5689_v8 = vpop.f32.mrb[72].mxu1 }
 0x499   :  { %v5690_v41 = vadd.f32 %v5689_v8, %v5613_v51  ;;  %v5691_v16 = vpop.f32.mrb[73].mxu1 }
 0x49a   :  { %v5692_v0 = vadd.f32 %v5691_v16, %v5617_v56 }
 0x49b   :  { %v5694_v47 = vmax.f32 %v5690_v41, 0.0 }
 0x49c   :  { %v5695_v4 = vmax.f32 %v5692_v0, 0.0 }
 0x49d   :  { %v5708_v34 = vmul.f32 %v5701_v58, %v5694_v47 }
 0x49e   :  { %v5709_v40 = vmul.f32 %v5705_v36, %v5695_v4 }
 0x49f   :  { %v5711_v12 = vsel %vm5710_vm3, %v5708_v34, 0.0 }
 0x4a0   :  { %v5712_v7 = vsel %vm5710_vm3, %v5709_v40, 0.0 }
 0x4a1   :  { %v5713_v63 = vadd.f32 %v5712_v7, %v5711_v12 }
 0x4a3   :  { %5714 = vadd.xlane.f32.xlu0 %v5713_v63 }
 0x530   :  { %v5715_v11 = vpop.xlane.xlu0 %5714 }
 0x531   :  { %v5723_v62 = vadd.f32 %v5965_v20, %v5715_v11 }
 0x533   :  { %5725 = vst.msk [vmem:[%s9537_s11] sm:$0x3] %vm5724_vm4, %v5723_v62 }

</bundles_post_ra>
